<compile_context>
chip_gen: v7x
topology: tpu7x:2x2x1
jax: 0.10.0
libtpu: 0.0.40
codegen_flags: <defaults>
</compile_context>

<pallas_src>
import numpy as np
import jax
import jax.numpy as jnp
from jax import lax
from jax.experimental import pallas as pl
from jax.experimental.pallas import tpu as pltpu

PLANE_TYPES = ("xz", "xy", "yz")
# (column of p -> plane width/x axis, column of p -> plane height/y axis)
_PLANE_COLS = {"xz": (0, 2), "xy": (0, 1), "yz": (1, 2)}


def make_decoder_kernel(n_blocks, reso, padding):
    """Builds the per-(batch, point-tile) kernel body (all shapes static)."""
    hw = reso * reso
    inv_scale = 1.0 / (1.0 + padding + 10e-6)

    def kernel(p_ref, planes_ref, wp_ref, bp_ref, wc_ref, bc_ref,
               w0_ref, b0_ref, w1_ref, b1_ref, wout_ref, bout_ref, out_ref):
        p = p_ref[0]                                  # (3, Nt) f32, lane-dense
        nt = p.shape[1]

        # ---------------- plane feature sampling ----------------
        # F.grid_sample(mode='bilinear', padding_mode='border',
        # align_corners=True) summed over the 3 planes, expressed as a single
        # fused contraction: c_t = planes(C, 3*hw) @ gather(3*hw, Nt).
        row_iota = lax.broadcasted_iota(jnp.int32, (reso, nt), 0)

        def axis_mask(coord_row):                     # coord_row: (1, Nt)
            # normalize_coordinate: /(1+padding+1e-5) + 0.5, clamp to [0, 1-1e-5)
            u = jnp.clip(coord_row * inv_scale + 0.5, 0.0, 1.0 - 10e-6)
            x = u * (reso - 1)                        # align_corners=True pixels
            x0f = jnp.floor(x)
            w1 = x - x0f
            x0 = jnp.clip(x0f.astype(jnp.int32), 0, reso - 1)
            x1 = jnp.minimum(x0 + 1, reso - 1)        # border padding
            # degenerate x0==x1 case: both terms hit the same row and sum to 1.
            return (jnp.where(row_iota == x0, 1.0 - w1, 0.0) +
                    jnp.where(row_iota == x1, w1, 0.0))        # (reso, Nt) f32

        gathers = []
        for plane in PLANE_TYPES:
            cu, cv = _PLANE_COLS[plane]
            mask_x = axis_mask(p[cu:cu + 1, :])       # width  axis weights
            mask_y = axis_mask(p[cv:cv + 1, :])       # height axis weights
            # gather[y*reso + x, n] = mask_y[y, n] * mask_x[x, n]
            g = (mask_y[:, None, :] * mask_x[None, :, :]).reshape(hw, nt)
            gathers.append(g)
        # cast only at the MXU boundary (keeps the weight math in f32 for v5e)
        gather_all = jnp.concatenate(gathers, axis=0).astype(jnp.bfloat16)
        c_t = jnp.dot(planes_ref[0], gather_all,
                      preferred_element_type=jnp.float32)       # (C, Nt) f32

        # ------------------------- MLP --------------------------
        # fc_p has K=3: three outer-product multiply-adds on the VPU instead of
        # a degenerate MXU matmul.
        wp = wp_ref[...]                               # (hidden, 3)
        net = (wp[:, 0:1] * p[0:1, :] +
               wp[:, 1:2] * p[1:2, :] +
               wp[:, 2:3] * p[2:3, :]) + bp_ref[...]   # (hidden, Nt)
        for i in range(n_blocks):
            net = net + jnp.dot(wc_ref[i], c_t,
                                preferred_element_type=jnp.float32) + bc_ref[i]
            # ResnetBlockFC (size_in == size_out -> identity shortcut)
            h = jnp.dot(w0_ref[i], jax.nn.relu(net),
                        preferred_element_type=jnp.float32) + b0_ref[i]
            dx = jnp.dot(w1_ref[i], jax.nn.relu(h),
                         preferred_element_type=jnp.float32) + b1_ref[i]
            net = net + dx
        out_t = jnp.dot(wout_ref[...], jax.nn.relu(net),
                        preferred_element_type=jnp.float32) + bout_ref[...]
        out_ref[0] = out_t.astype(out_ref.dtype)       # (3, Nt): lane-dense store

    return kernel


def _vmem_limit_bytes():
    try:
        cap = int(pltpu.get_tpu_info().vmem_capacity_bytes)
    except Exception:
        cap = 64 * 1024 * 1024
    # leave headroom for double-buffering / compiler scratch
    return min(cap * 3 // 4, 100 * 1024 * 1024)


def _pick_n_tile(reso, hidden, c_dim, vmem_limit):
    """Point-tile sized so the fused gather slab + temps fit well under VMEM."""
    hw = reso * reso
    per_point = (3 * hw * (4 + 2)      # fused gather: f32 build + bf16 copy
                 + hw * 4              # per-plane broadcast temp
                 + 16 * hidden * 4     # activations / relu temps
                 + c_dim * 4)          # sampled features
    budget = max(vmem_limit // 4, 2 * 1024 * 1024)
    nt = (budget // per_point) // 128 * 128
    return int(max(128, min(nt, 512)))


def local_decoder_forward(p, c_plane, params, *, n_blocks, padding=0.1):
    B, N, _ = p.shape
    reso = c_plane[PLANE_TYPES[0]].shape[-1]
    c_dim = c_plane[PLANE_TYPES[0]].shape[1]
    hw = reso * reso
    hidden = params["wp"].shape[1]
    n_planes = len(PLANE_TYPES)

    vmem_limit = _vmem_limit_bytes()
    n_tile = _pick_n_tile(reso, hidden, c_dim, vmem_limit)
    num_tiles = pl.cdiv(N, n_tile)
    n_pad = num_tiles * n_tile

    # points: (B, N, 3) -> (B, 3, N_pad)   (lane-dense coordinate math)
    p_t = jnp.transpose(p, (0, 2, 1)).astype(jnp.float32)
    if n_pad != N:
        p_t = jnp.pad(p_t, ((0, 0), (0, 0), (0, n_pad - N)))

    # planes: NCHW per plane -> (B, C, 3*hw) bf16 (flat index = y*W + x),
    # concatenated in the same plane order used for the gather slabs.
    planes = jnp.concatenate(
        [c_plane[k].reshape(B, c_dim, hw) for k in PLANE_TYPES],
        axis=-1).astype(jnp.bfloat16)

    # Linear params stored (in, out); kernel wants (out, in) so activations
    # stay (features=sublanes, points=lanes).
    wp_t = jnp.transpose(params["wp"])                 # (hidden, 3)
    bp_t = params["bp"].reshape(hidden, 1)
    wc_t = jnp.swapaxes(params["wc"], 1, 2)            # (nb, hidden, c_dim)
    bc_t = params["bc"][:, :, None]                    # (nb, hidden, 1)
    w0_t = jnp.swapaxes(params["w0"], 1, 2)
    b0_t = params["b0"][:, :, None]
    w1_t = jnp.swapaxes(params["w1"], 1, 2)
    b1_t = params["b1"][:, :, None]
    wout_t = jnp.transpose(params["wout"])             # (3, hidden)
    bout_t = params["bout"].reshape(3, 1)

    kernel = make_decoder_kernel(n_blocks, reso, padding)

    def full(arr):
        nd = arr.ndim
        return pl.BlockSpec(arr.shape, lambda b, t, _nd=nd: (0,) * _nd)

    in_specs = [
        pl.BlockSpec((1, 3, n_tile), lambda b, t: (b, 0, t)),
        pl.BlockSpec((1, c_dim, n_planes * hw), lambda b, t: (b, 0, 0)),
        full(wp_t), full(bp_t), full(wc_t), full(bc_t),
        full(w0_t), full(b0_t), full(w1_t), full(b1_t),
        full(wout_t), full(bout_t),
    ]
    out_specs = pl.BlockSpec((1, 3, n_tile), lambda b, t: (b, 0, t))

    out_t = pl.pallas_call(
        kernel,
        out_shape=jax.ShapeDtypeStruct((B, 3, n_pad), jnp.float32),
        grid=(B, num_tiles),
        in_specs=in_specs,
        out_specs=out_specs,
        compiler_params=pltpu.CompilerParams(
            dimension_semantics=("parallel", "parallel"),
            vmem_limit_bytes=vmem_limit),
    )(p_t, planes, wp_t, bp_t, wc_t, bc_t, w0_t, b0_t, w1_t, b1_t,
      wout_t, bout_t)

    return jnp.transpose(out_t, (0, 2, 1))[:, :N, :]


def local_decoder_reference(p, c_plane, params, *, n_blocks, padding=0.1):
    """Pure-JAX reference (gather-based bilinear sampling) for validation."""
    B, N, _ = p.shape
    c = 0.0
    for plane in PLANE_TYPES:
        feat = c_plane[plane]                       # (B, C, H, W)
        _, C, Hr, Wr = feat.shape
        cu, cv = _PLANE_COLS[plane]
        u = jnp.clip(p[..., cu] / (1 + padding + 10e-6) + 0.5, 0.0, 1.0 - 10e-6)
        v = jnp.clip(p[..., cv] / (1 + padding + 10e-6) + 0.5, 0.0, 1.0 - 10e-6)
        x = u * (Wr - 1)
        y = v * (Hr - 1)
        x0 = jnp.floor(x).astype(jnp.int32)
        y0 = jnp.floor(y).astype(jnp.int32)
        x1 = jnp.minimum(x0 + 1, Wr - 1)
        y1 = jnp.minimum(y0 + 1, Hr - 1)
        wx = x - x0
        wy = y - y0
        feat_flat = jnp.transpose(feat, (0, 2, 3, 1)).reshape(B, Hr * Wr, C)

        def gather(yy, xx):
            idx = (yy * Wr + xx)[..., None]
            return jnp.take_along_axis(feat_flat, idx, axis=1)    # (B, N, C)

        samp = (gather(y0, x0) * ((1 - wx) * (1 - wy))[..., None] +
                gather(y0, x1) * (wx * (1 - wy))[..., None] +
                gather(y1, x0) * ((1 - wx) * wy)[..., None] +
                gather(y1, x1) * (wx * wy)[..., None])
        c = c + samp

    net = p @ params["wp"] + params["bp"]
    for i in range(n_blocks):
        net = net + c @ params["wc"][i] + params["bc"][i]
        h = jax.nn.relu(net) @ params["w0"][i] + params["b0"][i]
        dx = jax.nn.relu(h) @ params["w1"][i] + params["b1"][i]
        net = net + dx
    return jax.nn.relu(net) @ params["wout"] + params["bout"]


if __name__ == "__main__":
    key = jax.random.PRNGKey(0)
    B, N, dim = 2, 64, 3
    c_dim, hidden, n_blocks = 32, 32, 3
    reso = 16
    padding = 0.1
    keys = jax.random.split(key, 16)

    # query points roughly in the padded unit cube [-0.55, 0.55]^3
    p = jax.random.uniform(keys[0], (B, N, dim), jnp.float32, -0.55, 0.55)
    c_plane = {
        "xz": jax.random.normal(keys[1], (B, c_dim, reso, reso), jnp.float32),
        "xy": jax.random.normal(keys[2], (B, c_dim, reso, reso), jnp.float32),
        "yz": jax.random.normal(keys[3], (B, c_dim, reso, reso), jnp.float32),
    }

    def lin(k, fan_in, shape):
        return jax.random.normal(k, shape, jnp.float32) * (1.0 / np.sqrt(fan_in))

    # Linear weights stored as (in, out); biases as trailing-(hidden) rows.
    # NOTE: the real ResnetBlockFC zero-inits fc_1.weight; random values are used
    # here so the kernel path is exercised non-trivially (same shapes/semantics).
    params = {
        "wp":   lin(keys[4],  dim,    (dim, hidden)),
        "bp":   lin(keys[5],  dim,    (1, hidden)),
        "wc":   lin(keys[6],  c_dim,  (n_blocks, c_dim, hidden)),
        "bc":   lin(keys[7],  c_dim,  (n_blocks, hidden)),
        "w0":   lin(keys[8],  hidden, (n_blocks, hidden, hidden)),
        "b0":   lin(keys[9],  hidden, (n_blocks, hidden)),
        "w1":   lin(keys[10], hidden, (n_blocks, hidden, hidden)),
        "b1":   lin(keys[11], hidden, (n_blocks, hidden)),
        "wout": lin(keys[12], hidden, (hidden, 3)),
        "bout": lin(keys[13], hidden, (1, 3)),
    }

    out = local_decoder_forward(p, c_plane, params, n_blocks=n_blocks, padding=padding)
    out = jax.block_until_ready(out)

    ref = local_decoder_reference(p, c_plane, params, n_blocks=n_blocks, padding=padding)
    np.testing.assert_allclose(np.asarray(out), np.asarray(ref), rtol=5e-2, atol=5e-2)
    print("KERNEL_OK")
</pallas_src>

<mosaic_0001>
module attributes {stable_mosaic.version = 11 : i64} {
  func.func @kernel(%arg0: i32, %arg1: i32, %arg2: memref<1x3x512xf32, #tpu.memory_space<vmem>>, %arg3: memref<1x32x768xbf16, #tpu.memory_space<vmem>>, %arg4: memref<32x3xf32, #tpu.memory_space<vmem>>, %arg5: memref<32x1xf32, #tpu.memory_space<vmem>>, %arg6: memref<3x32x32xf32, #tpu.memory_space<vmem>>, %arg7: memref<3x32x1xf32, #tpu.memory_space<vmem>>, %arg8: memref<3x32x32xf32, #tpu.memory_space<vmem>>, %arg9: memref<3x32x1xf32, #tpu.memory_space<vmem>>, %arg10: memref<3x32x32xf32, #tpu.memory_space<vmem>>, %arg11: memref<3x32x1xf32, #tpu.memory_space<vmem>>, %arg12: memref<3x32xf32, #tpu.memory_space<vmem>>, %arg13: memref<3x1xf32, #tpu.memory_space<vmem>>, %arg14: memref<1x3x512xf32, #tpu.memory_space<vmem>>) attributes {dimension_semantics = [#tpu.dimension_semantics<parallel>, #tpu.dimension_semantics<parallel>], iteration_bounds = array<i64: 2, 1>, scalar_prefetch = 0 : i64, scratch_operands = 0 : i64, tpu.core_type = #tpu.core_type<tc>, window_params = [{transform_indices = @transform_0, window_bounds = array<i64: 1, 3, 512>}, {transform_indices = @transform_1, window_bounds = array<i64: 1, 32, 768>}, {pipeline_mode = #tpu.pipeline_mode<synchronous>, transform_indices = @transform_2, window_bounds = array<i64: 32, 3>}, {pipeline_mode = #tpu.pipeline_mode<synchronous>, transform_indices = @transform_3, window_bounds = array<i64: 32, 1>}, {pipeline_mode = #tpu.pipeline_mode<synchronous>, transform_indices = @transform_4, window_bounds = array<i64: 3, 32, 32>}, {pipeline_mode = #tpu.pipeline_mode<synchronous>, transform_indices = @transform_5, window_bounds = array<i64: 3, 32, 1>}, {pipeline_mode = #tpu.pipeline_mode<synchronous>, transform_indices = @transform_6, window_bounds = array<i64: 3, 32, 32>}, {pipeline_mode = #tpu.pipeline_mode<synchronous>, transform_indices = @transform_7, window_bounds = array<i64: 3, 32, 1>}, {pipeline_mode = #tpu.pipeline_mode<synchronous>, transform_indices = @transform_8, window_bounds = array<i64: 3, 32, 32>}, {pipeline_mode = #tpu.pipeline_mode<synchronous>, transform_indices = @transform_9, window_bounds = array<i64: 3, 32, 1>}, {pipeline_mode = #tpu.pipeline_mode<synchronous>, transform_indices = @transform_10, window_bounds = array<i64: 3, 32>}, {pipeline_mode = #tpu.pipeline_mode<synchronous>, transform_indices = @transform_11, window_bounds = array<i64: 3, 1>}, {transform_indices = @transform_12, window_bounds = array<i64: 1, 3, 512>}]} {
    %c0 = arith.constant 0 : index
    %c0_0 = arith.constant 0 : index
    %c0_1 = arith.constant 0 : index
    %0 = vector.load %arg2[%c0, %c0_0, %c0_1] : memref<1x3x512xf32, #tpu.memory_space<vmem>>, vector<1x3x512xf32>
    %1 = vector.shape_cast %0 : vector<1x3x512xf32> to vector<3x512xf32>
    %2 = tpu.iota {dimensions = array<i32: 0>} : vector<16x512xi32>
    %3 = vector.extract_strided_slice %1 {offsets = [0, 0], sizes = [1, 512], strides = [1, 1]} : vector<3x512xf32> to vector<1x512xf32>
    %cst = arith.constant 0.909082651 : f32
    %4 = vector.broadcast %cst : f32 to vector<1x512xf32>
    %5 = arith.mulf %3, %4 : vector<1x512xf32>
    %cst_2 = arith.constant 5.000000e-01 : f32
    %6 = vector.broadcast %cst_2 : f32 to vector<1x512xf32>
    %7 = arith.addf %5, %6 : vector<1x512xf32>
    %cst_3 = arith.constant 0.000000e+00 : f32
    %cst_4 = arith.constant 0.999989986 : f32
    %8 = vector.broadcast %cst_3 : f32 to vector<1x512xf32>
    %9 = arith.maximumf %8, %7 : vector<1x512xf32>
    %10 = vector.broadcast %cst_4 : f32 to vector<1x512xf32>
    %11 = arith.minimumf %10, %9 : vector<1x512xf32>
    %cst_5 = arith.constant 1.500000e+01 : f32
    %12 = vector.broadcast %cst_5 : f32 to vector<1x512xf32>
    %13 = arith.mulf %11, %12 : vector<1x512xf32>
    %14 = math.floor %13 : vector<1x512xf32>
    %15 = arith.subf %13, %14 : vector<1x512xf32>
    %16 = arith.fptosi %14 : vector<1x512xf32> to vector<1x512xi32>
    %c0_i32 = arith.constant 0 : i32
    %c15_i32 = arith.constant 15 : i32
    %17 = vector.broadcast %c0_i32 : i32 to vector<1x512xi32>
    %18 = arith.maxsi %17, %16 : vector<1x512xi32>
    %19 = vector.broadcast %c15_i32 : i32 to vector<1x512xi32>
    %20 = arith.minsi %19, %18 : vector<1x512xi32>
    %c1_i32 = arith.constant 1 : i32
    %21 = vector.broadcast %c1_i32 : i32 to vector<1x512xi32>
    %22 = arith.addi %20, %21 : vector<1x512xi32>
    %c15_i32_6 = arith.constant 15 : i32
    %23 = vector.broadcast %c15_i32_6 : i32 to vector<1x512xi32>
    %24 = arith.minsi %22, %23 : vector<1x512xi32>
    %25 = vector.broadcast %20 : vector<1x512xi32> to vector<16x512xi32>
    %26 = arith.cmpi eq, %2, %25 : vector<16x512xi32>
    %cst_7 = arith.constant 1.000000e+00 : f32
    %27 = vector.broadcast %cst_7 : f32 to vector<1x512xf32>
    %28 = arith.subf %27, %15 : vector<1x512xf32>
    %cst_8 = arith.constant 0.000000e+00 : f32
    %29 = vector.shape_cast %28 : vector<1x512xf32> to vector<1x512xf32>
    %30 = vector.broadcast %29 : vector<1x512xf32> to vector<16x512xf32>
    %31 = vector.broadcast %cst_8 : f32 to vector<16x512xf32>
    %32 = arith.select %26, %30, %31 : vector<16x512xi1>, vector<16x512xf32>
    %33 = vector.broadcast %24 : vector<1x512xi32> to vector<16x512xi32>
    %34 = arith.cmpi eq, %2, %33 : vector<16x512xi32>
    %cst_9 = arith.constant 0.000000e+00 : f32
    %35 = vector.shape_cast %15 : vector<1x512xf32> to vector<1x512xf32>
    %36 = vector.broadcast %35 : vector<1x512xf32> to vector<16x512xf32>
    %37 = vector.broadcast %cst_9 : f32 to vector<16x512xf32>
    %38 = arith.select %34, %36, %37 : vector<16x512xi1>, vector<16x512xf32>
    %39 = arith.addf %32, %38 : vector<16x512xf32>
    %40 = vector.extract_strided_slice %1 {offsets = [2, 0], sizes = [1, 512], strides = [1, 1]} : vector<3x512xf32> to vector<1x512xf32>
    %cst_10 = arith.constant 0.909082651 : f32
    %41 = vector.broadcast %cst_10 : f32 to vector<1x512xf32>
    %42 = arith.mulf %40, %41 : vector<1x512xf32>
    %cst_11 = arith.constant 5.000000e-01 : f32
    %43 = vector.broadcast %cst_11 : f32 to vector<1x512xf32>
    %44 = arith.addf %42, %43 : vector<1x512xf32>
    %cst_12 = arith.constant 0.000000e+00 : f32
    %cst_13 = arith.constant 0.999989986 : f32
    %45 = vector.broadcast %cst_12 : f32 to vector<1x512xf32>
    %46 = arith.maximumf %45, %44 : vector<1x512xf32>
    %47 = vector.broadcast %cst_13 : f32 to vector<1x512xf32>
    %48 = arith.minimumf %47, %46 : vector<1x512xf32>
    %cst_14 = arith.constant 1.500000e+01 : f32
    %49 = vector.broadcast %cst_14 : f32 to vector<1x512xf32>
    %50 = arith.mulf %48, %49 : vector<1x512xf32>
    %51 = math.floor %50 : vector<1x512xf32>
    %52 = arith.subf %50, %51 : vector<1x512xf32>
    %53 = arith.fptosi %51 : vector<1x512xf32> to vector<1x512xi32>
    %c0_i32_15 = arith.constant 0 : i32
    %c15_i32_16 = arith.constant 15 : i32
    %54 = vector.broadcast %c0_i32_15 : i32 to vector<1x512xi32>
    %55 = arith.maxsi %54, %53 : vector<1x512xi32>
    %56 = vector.broadcast %c15_i32_16 : i32 to vector<1x512xi32>
    %57 = arith.minsi %56, %55 : vector<1x512xi32>
    %c1_i32_17 = arith.constant 1 : i32
    %58 = vector.broadcast %c1_i32_17 : i32 to vector<1x512xi32>
    %59 = arith.addi %57, %58 : vector<1x512xi32>
    %c15_i32_18 = arith.constant 15 : i32
    %60 = vector.broadcast %c15_i32_18 : i32 to vector<1x512xi32>
    %61 = arith.minsi %59, %60 : vector<1x512xi32>
    %62 = vector.broadcast %57 : vector<1x512xi32> to vector<16x512xi32>
    %63 = arith.cmpi eq, %2, %62 : vector<16x512xi32>
    %cst_19 = arith.constant 1.000000e+00 : f32
    %64 = vector.broadcast %cst_19 : f32 to vector<1x512xf32>
    %65 = arith.subf %64, %52 : vector<1x512xf32>
    %cst_20 = arith.constant 0.000000e+00 : f32
    %66 = vector.shape_cast %65 : vector<1x512xf32> to vector<1x512xf32>
    %67 = vector.broadcast %66 : vector<1x512xf32> to vector<16x512xf32>
    %68 = vector.broadcast %cst_20 : f32 to vector<16x512xf32>
    %69 = arith.select %63, %67, %68 : vector<16x512xi1>, vector<16x512xf32>
    %70 = vector.broadcast %61 : vector<1x512xi32> to vector<16x512xi32>
    %71 = arith.cmpi eq, %2, %70 : vector<16x512xi32>
    %cst_21 = arith.constant 0.000000e+00 : f32
    %72 = vector.shape_cast %52 : vector<1x512xf32> to vector<1x512xf32>
    %73 = vector.broadcast %72 : vector<1x512xf32> to vector<16x512xf32>
    %74 = vector.broadcast %cst_21 : f32 to vector<16x512xf32>
    %75 = arith.select %71, %73, %74 : vector<16x512xi1>, vector<16x512xf32>
    %76 = arith.addf %69, %75 : vector<16x512xf32>
    %77 = vector.shape_cast %76 : vector<16x512xf32> to vector<16x1x512xf32>
    %78 = vector.shape_cast %39 : vector<16x512xf32> to vector<1x16x512xf32>
    %79 = vector.broadcast %77 : vector<16x1x512xf32> to vector<16x16x512xf32>
    %80 = vector.broadcast %78 : vector<1x16x512xf32> to vector<16x16x512xf32>
    %81 = arith.mulf %79, %80 : vector<16x16x512xf32>
    %82 = vector.shape_cast %81 : vector<16x16x512xf32> to vector<256x512xf32>
    %83 = vector.extract_strided_slice %1 {offsets = [0, 0], sizes = [1, 512], strides = [1, 1]} : vector<3x512xf32> to vector<1x512xf32>
    %cst_22 = arith.constant 0.909082651 : f32
    %84 = vector.broadcast %cst_22 : f32 to vector<1x512xf32>
    %85 = arith.mulf %83, %84 : vector<1x512xf32>
    %cst_23 = arith.constant 5.000000e-01 : f32
    %86 = vector.broadcast %cst_23 : f32 to vector<1x512xf32>
    %87 = arith.addf %85, %86 : vector<1x512xf32>
    %cst_24 = arith.constant 0.000000e+00 : f32
    %cst_25 = arith.constant 0.999989986 : f32
    %88 = vector.broadcast %cst_24 : f32 to vector<1x512xf32>
    %89 = arith.maximumf %88, %87 : vector<1x512xf32>
    %90 = vector.broadcast %cst_25 : f32 to vector<1x512xf32>
    %91 = arith.minimumf %90, %89 : vector<1x512xf32>
    %cst_26 = arith.constant 1.500000e+01 : f32
    %92 = vector.broadcast %cst_26 : f32 to vector<1x512xf32>
    %93 = arith.mulf %91, %92 : vector<1x512xf32>
    %94 = math.floor %93 : vector<1x512xf32>
    %95 = arith.subf %93, %94 : vector<1x512xf32>
    %96 = arith.fptosi %94 : vector<1x512xf32> to vector<1x512xi32>
    %c0_i32_27 = arith.constant 0 : i32
    %c15_i32_28 = arith.constant 15 : i32
    %97 = vector.broadcast %c0_i32_27 : i32 to vector<1x512xi32>
    %98 = arith.maxsi %97, %96 : vector<1x512xi32>
    %99 = vector.broadcast %c15_i32_28 : i32 to vector<1x512xi32>
    %100 = arith.minsi %99, %98 : vector<1x512xi32>
    %c1_i32_29 = arith.constant 1 : i32
    %101 = vector.broadcast %c1_i32_29 : i32 to vector<1x512xi32>
    %102 = arith.addi %100, %101 : vector<1x512xi32>
    %c15_i32_30 = arith.constant 15 : i32
    %103 = vector.broadcast %c15_i32_30 : i32 to vector<1x512xi32>
    %104 = arith.minsi %102, %103 : vector<1x512xi32>
    %105 = vector.broadcast %100 : vector<1x512xi32> to vector<16x512xi32>
    %106 = arith.cmpi eq, %2, %105 : vector<16x512xi32>
    %cst_31 = arith.constant 1.000000e+00 : f32
    %107 = vector.broadcast %cst_31 : f32 to vector<1x512xf32>
    %108 = arith.subf %107, %95 : vector<1x512xf32>
    %cst_32 = arith.constant 0.000000e+00 : f32
    %109 = vector.shape_cast %108 : vector<1x512xf32> to vector<1x512xf32>
    %110 = vector.broadcast %109 : vector<1x512xf32> to vector<16x512xf32>
    %111 = vector.broadcast %cst_32 : f32 to vector<16x512xf32>
    %112 = arith.select %106, %110, %111 : vector<16x512xi1>, vector<16x512xf32>
    %113 = vector.broadcast %104 : vector<1x512xi32> to vector<16x512xi32>
    %114 = arith.cmpi eq, %2, %113 : vector<16x512xi32>
    %cst_33 = arith.constant 0.000000e+00 : f32
    %115 = vector.shape_cast %95 : vector<1x512xf32> to vector<1x512xf32>
    %116 = vector.broadcast %115 : vector<1x512xf32> to vector<16x512xf32>
    %117 = vector.broadcast %cst_33 : f32 to vector<16x512xf32>
    %118 = arith.select %114, %116, %117 : vector<16x512xi1>, vector<16x512xf32>
    %119 = arith.addf %112, %118 : vector<16x512xf32>
    %120 = vector.extract_strided_slice %1 {offsets = [1, 0], sizes = [1, 512], strides = [1, 1]} : vector<3x512xf32> to vector<1x512xf32>
    %cst_34 = arith.constant 0.909082651 : f32
    %121 = vector.broadcast %cst_34 : f32 to vector<1x512xf32>
    %122 = arith.mulf %120, %121 : vector<1x512xf32>
    %cst_35 = arith.constant 5.000000e-01 : f32
    %123 = vector.broadcast %cst_35 : f32 to vector<1x512xf32>
    %124 = arith.addf %122, %123 : vector<1x512xf32>
    %cst_36 = arith.constant 0.000000e+00 : f32
    %cst_37 = arith.constant 0.999989986 : f32
    %125 = vector.broadcast %cst_36 : f32 to vector<1x512xf32>
    %126 = arith.maximumf %125, %124 : vector<1x512xf32>
    %127 = vector.broadcast %cst_37 : f32 to vector<1x512xf32>
    %128 = arith.minimumf %127, %126 : vector<1x512xf32>
    %cst_38 = arith.constant 1.500000e+01 : f32
    %129 = vector.broadcast %cst_38 : f32 to vector<1x512xf32>
    %130 = arith.mulf %128, %129 : vector<1x512xf32>
    %131 = math.floor %130 : vector<1x512xf32>
    %132 = arith.subf %130, %131 : vector<1x512xf32>
    %133 = arith.fptosi %131 : vector<1x512xf32> to vector<1x512xi32>
    %c0_i32_39 = arith.constant 0 : i32
    %c15_i32_40 = arith.constant 15 : i32
    %134 = vector.broadcast %c0_i32_39 : i32 to vector<1x512xi32>
    %135 = arith.maxsi %134, %133 : vector<1x512xi32>
    %136 = vector.broadcast %c15_i32_40 : i32 to vector<1x512xi32>
    %137 = arith.minsi %136, %135 : vector<1x512xi32>
    %c1_i32_41 = arith.constant 1 : i32
    %138 = vector.broadcast %c1_i32_41 : i32 to vector<1x512xi32>
    %139 = arith.addi %137, %138 : vector<1x512xi32>
    %c15_i32_42 = arith.constant 15 : i32
    %140 = vector.broadcast %c15_i32_42 : i32 to vector<1x512xi32>
    %141 = arith.minsi %139, %140 : vector<1x512xi32>
    %142 = vector.broadcast %137 : vector<1x512xi32> to vector<16x512xi32>
    %143 = arith.cmpi eq, %2, %142 : vector<16x512xi32>
    %cst_43 = arith.constant 1.000000e+00 : f32
    %144 = vector.broadcast %cst_43 : f32 to vector<1x512xf32>
    %145 = arith.subf %144, %132 : vector<1x512xf32>
    %cst_44 = arith.constant 0.000000e+00 : f32
    %146 = vector.shape_cast %145 : vector<1x512xf32> to vector<1x512xf32>
    %147 = vector.broadcast %146 : vector<1x512xf32> to vector<16x512xf32>
    %148 = vector.broadcast %cst_44 : f32 to vector<16x512xf32>
    %149 = arith.select %143, %147, %148 : vector<16x512xi1>, vector<16x512xf32>
    %150 = vector.broadcast %141 : vector<1x512xi32> to vector<16x512xi32>
    %151 = arith.cmpi eq, %2, %150 : vector<16x512xi32>
    %cst_45 = arith.constant 0.000000e+00 : f32
    %152 = vector.shape_cast %132 : vector<1x512xf32> to vector<1x512xf32>
    %153 = vector.broadcast %152 : vector<1x512xf32> to vector<16x512xf32>
    %154 = vector.broadcast %cst_45 : f32 to vector<16x512xf32>
    %155 = arith.select %151, %153, %154 : vector<16x512xi1>, vector<16x512xf32>
    %156 = arith.addf %149, %155 : vector<16x512xf32>
    %157 = vector.shape_cast %156 : vector<16x512xf32> to vector<16x1x512xf32>
    %158 = vector.shape_cast %119 : vector<16x512xf32> to vector<1x16x512xf32>
    %159 = vector.broadcast %157 : vector<16x1x512xf32> to vector<16x16x512xf32>
    %160 = vector.broadcast %158 : vector<1x16x512xf32> to vector<16x16x512xf32>
    %161 = arith.mulf %159, %160 : vector<16x16x512xf32>
    %162 = vector.shape_cast %161 : vector<16x16x512xf32> to vector<256x512xf32>
    %163 = vector.extract_strided_slice %1 {offsets = [1, 0], sizes = [1, 512], strides = [1, 1]} : vector<3x512xf32> to vector<1x512xf32>
    %cst_46 = arith.constant 0.909082651 : f32
    %164 = vector.broadcast %cst_46 : f32 to vector<1x512xf32>
    %165 = arith.mulf %163, %164 : vector<1x512xf32>
    %cst_47 = arith.constant 5.000000e-01 : f32
    %166 = vector.broadcast %cst_47 : f32 to vector<1x512xf32>
    %167 = arith.addf %165, %166 : vector<1x512xf32>
    %cst_48 = arith.constant 0.000000e+00 : f32
    %cst_49 = arith.constant 0.999989986 : f32
    %168 = vector.broadcast %cst_48 : f32 to vector<1x512xf32>
    %169 = arith.maximumf %168, %167 : vector<1x512xf32>
    %170 = vector.broadcast %cst_49 : f32 to vector<1x512xf32>
    %171 = arith.minimumf %170, %169 : vector<1x512xf32>
    %cst_50 = arith.constant 1.500000e+01 : f32
    %172 = vector.broadcast %cst_50 : f32 to vector<1x512xf32>
    %173 = arith.mulf %171, %172 : vector<1x512xf32>
    %174 = math.floor %173 : vector<1x512xf32>
    %175 = arith.subf %173, %174 : vector<1x512xf32>
    %176 = arith.fptosi %174 : vector<1x512xf32> to vector<1x512xi32>
    %c0_i32_51 = arith.constant 0 : i32
    %c15_i32_52 = arith.constant 15 : i32
    %177 = vector.broadcast %c0_i32_51 : i32 to vector<1x512xi32>
    %178 = arith.maxsi %177, %176 : vector<1x512xi32>
    %179 = vector.broadcast %c15_i32_52 : i32 to vector<1x512xi32>
    %180 = arith.minsi %179, %178 : vector<1x512xi32>
    %c1_i32_53 = arith.constant 1 : i32
    %181 = vector.broadcast %c1_i32_53 : i32 to vector<1x512xi32>
    %182 = arith.addi %180, %181 : vector<1x512xi32>
    %c15_i32_54 = arith.constant 15 : i32
    %183 = vector.broadcast %c15_i32_54 : i32 to vector<1x512xi32>
    %184 = arith.minsi %182, %183 : vector<1x512xi32>
    %185 = vector.broadcast %180 : vector<1x512xi32> to vector<16x512xi32>
    %186 = arith.cmpi eq, %2, %185 : vector<16x512xi32>
    %cst_55 = arith.constant 1.000000e+00 : f32
    %187 = vector.broadcast %cst_55 : f32 to vector<1x512xf32>
    %188 = arith.subf %187, %175 : vector<1x512xf32>
    %cst_56 = arith.constant 0.000000e+00 : f32
    %189 = vector.shape_cast %188 : vector<1x512xf32> to vector<1x512xf32>
    %190 = vector.broadcast %189 : vector<1x512xf32> to vector<16x512xf32>
    %191 = vector.broadcast %cst_56 : f32 to vector<16x512xf32>
    %192 = arith.select %186, %190, %191 : vector<16x512xi1>, vector<16x512xf32>
    %193 = vector.broadcast %184 : vector<1x512xi32> to vector<16x512xi32>
    %194 = arith.cmpi eq, %2, %193 : vector<16x512xi32>
    %cst_57 = arith.constant 0.000000e+00 : f32
    %195 = vector.shape_cast %175 : vector<1x512xf32> to vector<1x512xf32>
    %196 = vector.broadcast %195 : vector<1x512xf32> to vector<16x512xf32>
    %197 = vector.broadcast %cst_57 : f32 to vector<16x512xf32>
    %198 = arith.select %194, %196, %197 : vector<16x512xi1>, vector<16x512xf32>
    %199 = arith.addf %192, %198 : vector<16x512xf32>
    %200 = vector.extract_strided_slice %1 {offsets = [2, 0], sizes = [1, 512], strides = [1, 1]} : vector<3x512xf32> to vector<1x512xf32>
    %cst_58 = arith.constant 0.909082651 : f32
    %201 = vector.broadcast %cst_58 : f32 to vector<1x512xf32>
    %202 = arith.mulf %200, %201 : vector<1x512xf32>
    %cst_59 = arith.constant 5.000000e-01 : f32
    %203 = vector.broadcast %cst_59 : f32 to vector<1x512xf32>
    %204 = arith.addf %202, %203 : vector<1x512xf32>
    %cst_60 = arith.constant 0.000000e+00 : f32
    %cst_61 = arith.constant 0.999989986 : f32
    %205 = vector.broadcast %cst_60 : f32 to vector<1x512xf32>
    %206 = arith.maximumf %205, %204 : vector<1x512xf32>
    %207 = vector.broadcast %cst_61 : f32 to vector<1x512xf32>
    %208 = arith.minimumf %207, %206 : vector<1x512xf32>
    %cst_62 = arith.constant 1.500000e+01 : f32
    %209 = vector.broadcast %cst_62 : f32 to vector<1x512xf32>
    %210 = arith.mulf %208, %209 : vector<1x512xf32>
    %211 = math.floor %210 : vector<1x512xf32>
    %212 = arith.subf %210, %211 : vector<1x512xf32>
    %213 = arith.fptosi %211 : vector<1x512xf32> to vector<1x512xi32>
    %c0_i32_63 = arith.constant 0 : i32
    %c15_i32_64 = arith.constant 15 : i32
    %214 = vector.broadcast %c0_i32_63 : i32 to vector<1x512xi32>
    %215 = arith.maxsi %214, %213 : vector<1x512xi32>
    %216 = vector.broadcast %c15_i32_64 : i32 to vector<1x512xi32>
    %217 = arith.minsi %216, %215 : vector<1x512xi32>
    %c1_i32_65 = arith.constant 1 : i32
    %218 = vector.broadcast %c1_i32_65 : i32 to vector<1x512xi32>
    %219 = arith.addi %217, %218 : vector<1x512xi32>
    %c15_i32_66 = arith.constant 15 : i32
    %220 = vector.broadcast %c15_i32_66 : i32 to vector<1x512xi32>
    %221 = arith.minsi %219, %220 : vector<1x512xi32>
    %222 = vector.broadcast %217 : vector<1x512xi32> to vector<16x512xi32>
    %223 = arith.cmpi eq, %2, %222 : vector<16x512xi32>
    %cst_67 = arith.constant 1.000000e+00 : f32
    %224 = vector.broadcast %cst_67 : f32 to vector<1x512xf32>
    %225 = arith.subf %224, %212 : vector<1x512xf32>
    %cst_68 = arith.constant 0.000000e+00 : f32
    %226 = vector.shape_cast %225 : vector<1x512xf32> to vector<1x512xf32>
    %227 = vector.broadcast %226 : vector<1x512xf32> to vector<16x512xf32>
    %228 = vector.broadcast %cst_68 : f32 to vector<16x512xf32>
    %229 = arith.select %223, %227, %228 : vector<16x512xi1>, vector<16x512xf32>
    %230 = vector.broadcast %221 : vector<1x512xi32> to vector<16x512xi32>
    %231 = arith.cmpi eq, %2, %230 : vector<16x512xi32>
    %cst_69 = arith.constant 0.000000e+00 : f32
    %232 = vector.shape_cast %212 : vector<1x512xf32> to vector<1x512xf32>
    %233 = vector.broadcast %232 : vector<1x512xf32> to vector<16x512xf32>
    %234 = vector.broadcast %cst_69 : f32 to vector<16x512xf32>
    %235 = arith.select %231, %233, %234 : vector<16x512xi1>, vector<16x512xf32>
    %236 = arith.addf %229, %235 : vector<16x512xf32>
    %237 = vector.shape_cast %236 : vector<16x512xf32> to vector<16x1x512xf32>
    %238 = vector.shape_cast %199 : vector<16x512xf32> to vector<1x16x512xf32>
    %239 = vector.broadcast %237 : vector<16x1x512xf32> to vector<16x16x512xf32>
    %240 = vector.broadcast %238 : vector<1x16x512xf32> to vector<16x16x512xf32>
    %241 = arith.mulf %239, %240 : vector<16x16x512xf32>
    %242 = vector.shape_cast %241 : vector<16x16x512xf32> to vector<256x512xf32>
    %243 = tpu.concatenate %82, %162, %242 in 0 : vector<256x512xf32>, vector<256x512xf32>, vector<256x512xf32> -> vector<768x512xf32>
    %244 = arith.truncf %243 : vector<768x512xf32> to vector<768x512xbf16>
    %c0_70 = arith.constant 0 : index
    %c0_71 = arith.constant 0 : index
    %c0_72 = arith.constant 0 : index
    %245 = vector.load %arg3[%c0_70, %c0_71, %c0_72] : memref<1x32x768xbf16, #tpu.memory_space<vmem>>, vector<1x32x768xbf16>
    %246 = vector.shape_cast %245 : vector<1x32x768xbf16> to vector<32x768xbf16>
    %cst_73 = arith.constant dense<0.000000e+00> : vector<32x512xf32>
    %247 = tpu.matmul %246, %244, %cst_73 {dimension_numbers = #tpu.dot_dimension_numbers<[1], [0], [0], [1], [0, 0, 1, 1], [], []>} : vector<32x768xbf16>, vector<768x512xbf16>, vector<32x512xf32> -> vector<32x512xf32>
    %c0_74 = arith.constant 0 : index
    %c0_75 = arith.constant 0 : index
    %248 = vector.load %arg4[%c0_74, %c0_75] : memref<32x3xf32, #tpu.memory_space<vmem>>, vector<32x3xf32>
    %249 = vector.extract_strided_slice %248 {offsets = [0, 0], sizes = [32, 1], strides = [1, 1]} : vector<32x3xf32> to vector<32x1xf32>
    %250 = vector.extract_strided_slice %1 {offsets = [0, 0], sizes = [1, 512], strides = [1, 1]} : vector<3x512xf32> to vector<1x512xf32>
    %251 = vector.broadcast %249 : vector<32x1xf32> to vector<32x512xf32>
    %252 = vector.broadcast %250 : vector<1x512xf32> to vector<32x512xf32>
    %253 = arith.mulf %251, %252 : vector<32x512xf32>
    %254 = vector.extract_strided_slice %248 {offsets = [0, 1], sizes = [32, 1], strides = [1, 1]} : vector<32x3xf32> to vector<32x1xf32>
    %255 = vector.extract_strided_slice %1 {offsets = [1, 0], sizes = [1, 512], strides = [1, 1]} : vector<3x512xf32> to vector<1x512xf32>
    %256 = vector.broadcast %254 : vector<32x1xf32> to vector<32x512xf32>
    %257 = vector.broadcast %255 : vector<1x512xf32> to vector<32x512xf32>
    %258 = arith.mulf %256, %257 : vector<32x512xf32>
    %259 = arith.addf %253, %258 : vector<32x512xf32>
    %260 = vector.extract_strided_slice %248 {offsets = [0, 2], sizes = [32, 1], strides = [1, 1]} : vector<32x3xf32> to vector<32x1xf32>
    %261 = vector.extract_strided_slice %1 {offsets = [2, 0], sizes = [1, 512], strides = [1, 1]} : vector<3x512xf32> to vector<1x512xf32>
    %262 = vector.broadcast %260 : vector<32x1xf32> to vector<32x512xf32>
    %263 = vector.broadcast %261 : vector<1x512xf32> to vector<32x512xf32>
    %264 = arith.mulf %262, %263 : vector<32x512xf32>
    %265 = arith.addf %259, %264 : vector<32x512xf32>
    %c0_76 = arith.constant 0 : index
    %c0_77 = arith.constant 0 : index
    %266 = vector.load %arg5[%c0_76, %c0_77] : memref<32x1xf32, #tpu.memory_space<vmem>>, vector<32x1xf32>
    %267 = vector.broadcast %266 : vector<32x1xf32> to vector<32x512xf32>
    %268 = arith.addf %265, %267 : vector<32x512xf32>
    %c0_78 = arith.constant 0 : index
    %c0_79 = arith.constant 0 : index
    %c0_80 = arith.constant 0 : index
    %269 = vector.load %arg6[%c0_78, %c0_79, %c0_80] : memref<3x32x32xf32, #tpu.memory_space<vmem>>, vector<1x32x32xf32>
    %270 = vector.shape_cast %269 : vector<1x32x32xf32> to vector<32x32xf32>
    %cst_81 = arith.constant dense<0.000000e+00> : vector<32x512xf32>
    %271 = tpu.matmul %270, %247, %cst_81 {dimension_numbers = #tpu.dot_dimension_numbers<[1], [0], [0], [1], [0, 0, 1, 1], [], []>} : vector<32x32xf32>, vector<32x512xf32>, vector<32x512xf32> -> vector<32x512xf32>
    %272 = arith.addf %268, %271 : vector<32x512xf32>
    %c0_82 = arith.constant 0 : index
    %c0_83 = arith.constant 0 : index
    %c0_84 = arith.constant 0 : index
    %273 = vector.load %arg7[%c0_82, %c0_83, %c0_84] : memref<3x32x1xf32, #tpu.memory_space<vmem>>, vector<1x32x1xf32>
    %274 = vector.shape_cast %273 : vector<1x32x1xf32> to vector<32x1xf32>
    %275 = vector.broadcast %274 : vector<32x1xf32> to vector<32x512xf32>
    %276 = arith.addf %272, %275 : vector<32x512xf32>
    %c0_85 = arith.constant 0 : index
    %c0_86 = arith.constant 0 : index
    %c0_87 = arith.constant 0 : index
    %277 = vector.load %arg8[%c0_85, %c0_86, %c0_87] : memref<3x32x32xf32, #tpu.memory_space<vmem>>, vector<1x32x32xf32>
    %278 = vector.shape_cast %277 : vector<1x32x32xf32> to vector<32x32xf32>
    %cst_88 = arith.constant 0.000000e+00 : f32
    %279 = vector.broadcast %cst_88 : f32 to vector<32x512xf32>
    %280 = arith.maximumf %276, %279 : vector<32x512xf32>
    %cst_89 = arith.constant dense<0.000000e+00> : vector<32x512xf32>
    %281 = tpu.matmul %278, %280, %cst_89 {dimension_numbers = #tpu.dot_dimension_numbers<[1], [0], [0], [1], [0, 0, 1, 1], [], []>} : vector<32x32xf32>, vector<32x512xf32>, vector<32x512xf32> -> vector<32x512xf32>
    %c0_90 = arith.constant 0 : index
    %c0_91 = arith.constant 0 : index
    %c0_92 = arith.constant 0 : index
    %282 = vector.load %arg9[%c0_90, %c0_91, %c0_92] : memref<3x32x1xf32, #tpu.memory_space<vmem>>, vector<1x32x1xf32>
    %283 = vector.shape_cast %282 : vector<1x32x1xf32> to vector<32x1xf32>
    %284 = vector.broadcast %283 : vector<32x1xf32> to vector<32x512xf32>
    %285 = arith.addf %281, %284 : vector<32x512xf32>
    %c0_93 = arith.constant 0 : index
    %c0_94 = arith.constant 0 : index
    %c0_95 = arith.constant 0 : index
    %286 = vector.load %arg10[%c0_93, %c0_94, %c0_95] : memref<3x32x32xf32, #tpu.memory_space<vmem>>, vector<1x32x32xf32>
    %287 = vector.shape_cast %286 : vector<1x32x32xf32> to vector<32x32xf32>
    %cst_96 = arith.constant 0.000000e+00 : f32
    %288 = vector.broadcast %cst_96 : f32 to vector<32x512xf32>
    %289 = arith.maximumf %285, %288 : vector<32x512xf32>
    %cst_97 = arith.constant dense<0.000000e+00> : vector<32x512xf32>
    %290 = tpu.matmul %287, %289, %cst_97 {dimension_numbers = #tpu.dot_dimension_numbers<[1], [0], [0], [1], [0, 0, 1, 1], [], []>} : vector<32x32xf32>, vector<32x512xf32>, vector<32x512xf32> -> vector<32x512xf32>
    %c0_98 = arith.constant 0 : index
    %c0_99 = arith.constant 0 : index
    %c0_100 = arith.constant 0 : index
    %291 = vector.load %arg11[%c0_98, %c0_99, %c0_100] : memref<3x32x1xf32, #tpu.memory_space<vmem>>, vector<1x32x1xf32>
    %292 = vector.shape_cast %291 : vector<1x32x1xf32> to vector<32x1xf32>
    %293 = vector.broadcast %292 : vector<32x1xf32> to vector<32x512xf32>
    %294 = arith.addf %290, %293 : vector<32x512xf32>
    %295 = arith.addf %276, %294 : vector<32x512xf32>
    %c1 = arith.constant 1 : index
    %c0_101 = arith.constant 0 : index
    %c0_102 = arith.constant 0 : index
    %296 = vector.load %arg6[%c1, %c0_101, %c0_102] : memref<3x32x32xf32, #tpu.memory_space<vmem>>, vector<1x32x32xf32>
    %297 = vector.shape_cast %296 : vector<1x32x32xf32> to vector<32x32xf32>
    %cst_103 = arith.constant dense<0.000000e+00> : vector<32x512xf32>
    %298 = tpu.matmul %297, %247, %cst_103 {dimension_numbers = #tpu.dot_dimension_numbers<[1], [0], [0], [1], [0, 0, 1, 1], [], []>} : vector<32x32xf32>, vector<32x512xf32>, vector<32x512xf32> -> vector<32x512xf32>
    %299 = arith.addf %295, %298 : vector<32x512xf32>
    %c1_104 = arith.constant 1 : index
    %c0_105 = arith.constant 0 : index
    %c0_106 = arith.constant 0 : index
    %300 = vector.load %arg7[%c1_104, %c0_105, %c0_106] : memref<3x32x1xf32, #tpu.memory_space<vmem>>, vector<1x32x1xf32>
    %301 = vector.shape_cast %300 : vector<1x32x1xf32> to vector<32x1xf32>
    %302 = vector.broadcast %301 : vector<32x1xf32> to vector<32x512xf32>
    %303 = arith.addf %299, %302 : vector<32x512xf32>
    %c1_107 = arith.constant 1 : index
    %c0_108 = arith.constant 0 : index
    %c0_109 = arith.constant 0 : index
    %304 = vector.load %arg8[%c1_107, %c0_108, %c0_109] : memref<3x32x32xf32, #tpu.memory_space<vmem>>, vector<1x32x32xf32>
    %305 = vector.shape_cast %304 : vector<1x32x32xf32> to vector<32x32xf32>
    %cst_110 = arith.constant 0.000000e+00 : f32
    %306 = vector.broadcast %cst_110 : f32 to vector<32x512xf32>
    %307 = arith.maximumf %303, %306 : vector<32x512xf32>
    %cst_111 = arith.constant dense<0.000000e+00> : vector<32x512xf32>
    %308 = tpu.matmul %305, %307, %cst_111 {dimension_numbers = #tpu.dot_dimension_numbers<[1], [0], [0], [1], [0, 0, 1, 1], [], []>} : vector<32x32xf32>, vector<32x512xf32>, vector<32x512xf32> -> vector<32x512xf32>
    %c1_112 = arith.constant 1 : index
    %c0_113 = arith.constant 0 : index
    %c0_114 = arith.constant 0 : index
    %309 = vector.load %arg9[%c1_112, %c0_113, %c0_114] : memref<3x32x1xf32, #tpu.memory_space<vmem>>, vector<1x32x1xf32>
    %310 = vector.shape_cast %309 : vector<1x32x1xf32> to vector<32x1xf32>
    %311 = vector.broadcast %310 : vector<32x1xf32> to vector<32x512xf32>
    %312 = arith.addf %308, %311 : vector<32x512xf32>
    %c1_115 = arith.constant 1 : index
    %c0_116 = arith.constant 0 : index
    %c0_117 = arith.constant 0 : index
    %313 = vector.load %arg10[%c1_115, %c0_116, %c0_117] : memref<3x32x32xf32, #tpu.memory_space<vmem>>, vector<1x32x32xf32>
    %314 = vector.shape_cast %313 : vector<1x32x32xf32> to vector<32x32xf32>
    %cst_118 = arith.constant 0.000000e+00 : f32
    %315 = vector.broadcast %cst_118 : f32 to vector<32x512xf32>
    %316 = arith.maximumf %312, %315 : vector<32x512xf32>
    %cst_119 = arith.constant dense<0.000000e+00> : vector<32x512xf32>
    %317 = tpu.matmul %314, %316, %cst_119 {dimension_numbers = #tpu.dot_dimension_numbers<[1], [0], [0], [1], [0, 0, 1, 1], [], []>} : vector<32x32xf32>, vector<32x512xf32>, vector<32x512xf32> -> vector<32x512xf32>
    %c1_120 = arith.constant 1 : index
    %c0_121 = arith.constant 0 : index
    %c0_122 = arith.constant 0 : index
    %318 = vector.load %arg11[%c1_120, %c0_121, %c0_122] : memref<3x32x1xf32, #tpu.memory_space<vmem>>, vector<1x32x1xf32>
    %319 = vector.shape_cast %318 : vector<1x32x1xf32> to vector<32x1xf32>
    %320 = vector.broadcast %319 : vector<32x1xf32> to vector<32x512xf32>
    %321 = arith.addf %317, %320 : vector<32x512xf32>
    %322 = arith.addf %303, %321 : vector<32x512xf32>
    %c2 = arith.constant 2 : index
    %c0_123 = arith.constant 0 : index
    %c0_124 = arith.constant 0 : index
    %323 = vector.load %arg6[%c2, %c0_123, %c0_124] : memref<3x32x32xf32, #tpu.memory_space<vmem>>, vector<1x32x32xf32>
    %324 = vector.shape_cast %323 : vector<1x32x32xf32> to vector<32x32xf32>
    %cst_125 = arith.constant dense<0.000000e+00> : vector<32x512xf32>
    %325 = tpu.matmul %324, %247, %cst_125 {dimension_numbers = #tpu.dot_dimension_numbers<[1], [0], [0], [1], [0, 0, 1, 1], [], []>} : vector<32x32xf32>, vector<32x512xf32>, vector<32x512xf32> -> vector<32x512xf32>
    %326 = arith.addf %322, %325 : vector<32x512xf32>
    %c2_126 = arith.constant 2 : index
    %c0_127 = arith.constant 0 : index
    %c0_128 = arith.constant 0 : index
    %327 = vector.load %arg7[%c2_126, %c0_127, %c0_128] : memref<3x32x1xf32, #tpu.memory_space<vmem>>, vector<1x32x1xf32>
    %328 = vector.shape_cast %327 : vector<1x32x1xf32> to vector<32x1xf32>
    %329 = vector.broadcast %328 : vector<32x1xf32> to vector<32x512xf32>
    %330 = arith.addf %326, %329 : vector<32x512xf32>
    %c2_129 = arith.constant 2 : index
    %c0_130 = arith.constant 0 : index
    %c0_131 = arith.constant 0 : index
    %331 = vector.load %arg8[%c2_129, %c0_130, %c0_131] : memref<3x32x32xf32, #tpu.memory_space<vmem>>, vector<1x32x32xf32>
    %332 = vector.shape_cast %331 : vector<1x32x32xf32> to vector<32x32xf32>
    %cst_132 = arith.constant 0.000000e+00 : f32
    %333 = vector.broadcast %cst_132 : f32 to vector<32x512xf32>
    %334 = arith.maximumf %330, %333 : vector<32x512xf32>
    %cst_133 = arith.constant dense<0.000000e+00> : vector<32x512xf32>
    %335 = tpu.matmul %332, %334, %cst_133 {dimension_numbers = #tpu.dot_dimension_numbers<[1], [0], [0], [1], [0, 0, 1, 1], [], []>} : vector<32x32xf32>, vector<32x512xf32>, vector<32x512xf32> -> vector<32x512xf32>
    %c2_134 = arith.constant 2 : index
    %c0_135 = arith.constant 0 : index
    %c0_136 = arith.constant 0 : index
    %336 = vector.load %arg9[%c2_134, %c0_135, %c0_136] : memref<3x32x1xf32, #tpu.memory_space<vmem>>, vector<1x32x1xf32>
    %337 = vector.shape_cast %336 : vector<1x32x1xf32> to vector<32x1xf32>
    %338 = vector.broadcast %337 : vector<32x1xf32> to vector<32x512xf32>
    %339 = arith.addf %335, %338 : vector<32x512xf32>
    %c2_137 = arith.constant 2 : index
    %c0_138 = arith.constant 0 : index
    %c0_139 = arith.constant 0 : index
    %340 = vector.load %arg10[%c2_137, %c0_138, %c0_139] : memref<3x32x32xf32, #tpu.memory_space<vmem>>, vector<1x32x32xf32>
    %341 = vector.shape_cast %340 : vector<1x32x32xf32> to vector<32x32xf32>
    %cst_140 = arith.constant 0.000000e+00 : f32
    %342 = vector.broadcast %cst_140 : f32 to vector<32x512xf32>
    %343 = arith.maximumf %339, %342 : vector<32x512xf32>
    %cst_141 = arith.constant dense<0.000000e+00> : vector<32x512xf32>
    %344 = tpu.matmul %341, %343, %cst_141 {dimension_numbers = #tpu.dot_dimension_numbers<[1], [0], [0], [1], [0, 0, 1, 1], [], []>} : vector<32x32xf32>, vector<32x512xf32>, vector<32x512xf32> -> vector<32x512xf32>
    %c2_142 = arith.constant 2 : index
    %c0_143 = arith.constant 0 : index
    %c0_144 = arith.constant 0 : index
    %345 = vector.load %arg11[%c2_142, %c0_143, %c0_144] : memref<3x32x1xf32, #tpu.memory_space<vmem>>, vector<1x32x1xf32>
    %346 = vector.shape_cast %345 : vector<1x32x1xf32> to vector<32x1xf32>
    %347 = vector.broadcast %346 : vector<32x1xf32> to vector<32x512xf32>
    %348 = arith.addf %344, %347 : vector<32x512xf32>
    %349 = arith.addf %330, %348 : vector<32x512xf32>
    %c0_145 = arith.constant 0 : index
    %c0_146 = arith.constant 0 : index
    %350 = vector.load %arg12[%c0_145, %c0_146] : memref<3x32xf32, #tpu.memory_space<vmem>>, vector<3x32xf32>
    %cst_147 = arith.constant 0.000000e+00 : f32
    %351 = vector.broadcast %cst_147 : f32 to vector<32x512xf32>
    %352 = arith.maximumf %349, %351 : vector<32x512xf32>
    %cst_148 = arith.constant dense<0.000000e+00> : vector<3x512xf32>
    %353 = tpu.matmul %350, %352, %cst_148 {dimension_numbers = #tpu.dot_dimension_numbers<[1], [0], [0], [1], [0, 0, 1, 1], [], []>} : vector<3x32xf32>, vector<32x512xf32>, vector<3x512xf32> -> vector<3x512xf32>
    %c0_149 = arith.constant 0 : index
    %c0_150 = arith.constant 0 : index
    %354 = vector.load %arg13[%c0_149, %c0_150] : memref<3x1xf32, #tpu.memory_space<vmem>>, vector<3x1xf32>
    %355 = vector.broadcast %354 : vector<3x1xf32> to vector<3x512xf32>
    %356 = arith.addf %353, %355 : vector<3x512xf32>
    %c0_151 = arith.constant 0 : index
    %c0_152 = arith.constant 0 : index
    %c0_153 = arith.constant 0 : index
    %357 = vector.load %arg14[%c0_151, %c0_152, %c0_153] : memref<1x3x512xf32, #tpu.memory_space<vmem>>, vector<1x3x512xf32>
    %358 = vector.shape_cast %357 : vector<1x3x512xf32> to vector<3x512xf32>
    %359 = vector.shape_cast %356 : vector<3x512xf32> to vector<1x3x512xf32>
    tpu.vector_store %arg14[%c0_151, %c0_152, %c0_153], %359 {strides = array<i32>} : memref<1x3x512xf32, #tpu.memory_space<vmem>>, vector<1x3x512xf32>,
    return
  }
  func.func @transform_0(%arg0: i32, %arg1: i32) -> (i32, i32, i32) {
    %c0_i32 = arith.constant 0 : i32
    %c0_i32_0 = arith.constant 0 : i32
    return %arg0, %c0_i32, %arg1 : i32, i32, i32
  }
  func.func @transform_1(%arg0: i32, %arg1: i32) -> (i32, i32, i32) {
    %c0_i32 = arith.constant 0 : i32
    %c0_i32_0 = arith.constant 0 : i32
    %c0_i32_1 = arith.constant 0 : i32
    return %arg0, %c0_i32, %c0_i32_0 : i32, i32, i32
  }
  func.func @transform_2(%arg0: i32, %arg1: i32) -> (i32, i32) {
    %c0_i32 = arith.constant 0 : i32
    %c0_i32_0 = arith.constant 0 : i32
    %c0_i32_1 = arith.constant 0 : i32
    return %c0_i32, %c0_i32_0 : i32, i32
  }
  func.func @transform_3(%arg0: i32, %arg1: i32) -> (i32, i32) {
    %c0_i32 = arith.constant 0 : i32
    %c0_i32_0 = arith.constant 0 : i32
    %c0_i32_1 = arith.constant 0 : i32
    return %c0_i32, %c0_i32_0 : i32, i32
  }
  func.func @transform_4(%arg0: i32, %arg1: i32) -> (i32, i32, i32) {
    %c0_i32 = arith.constant 0 : i32
    %c0_i32_0 = arith.constant 0 : i32
    %c0_i32_1 = arith.constant 0 : i32
    %c0_i32_2 = arith.constant 0 : i32
    return %c0_i32, %c0_i32_0, %c0_i32_1 : i32, i32, i32
  }
  func.func @transform_5(%arg0: i32, %arg1: i32) -> (i32, i32, i32) {
    %c0_i32 = arith.constant 0 : i32
    %c0_i32_0 = arith.constant 0 : i32
    %c0_i32_1 = arith.constant 0 : i32
    %c0_i32_2 = arith.constant 0 : i32
    return %c0_i32, %c0_i32_0, %c0_i32_1 : i32, i32, i32
  }
  func.func @transform_6(%arg0: i32, %arg1: i32) -> (i32, i32, i32) {
    %c0_i32 = arith.constant 0 : i32
    %c0_i32_0 = arith.constant 0 : i32
    %c0_i32_1 = arith.constant 0 : i32
    %c0_i32_2 = arith.constant 0 : i32
    return %c0_i32, %c0_i32_0, %c0_i32_1 : i32, i32, i32
  }
  func.func @transform_7(%arg0: i32, %arg1: i32) -> (i32, i32, i32) {
    %c0_i32 = arith.constant 0 : i32
    %c0_i32_0 = arith.constant 0 : i32
    %c0_i32_1 = arith.constant 0 : i32
    %c0_i32_2 = arith.constant 0 : i32
    return %c0_i32, %c0_i32_0, %c0_i32_1 : i32, i32, i32
  }
  func.func @transform_8(%arg0: i32, %arg1: i32) -> (i32, i32, i32) {
    %c0_i32 = arith.constant 0 : i32
    %c0_i32_0 = arith.constant 0 : i32
    %c0_i32_1 = arith.constant 0 : i32
    %c0_i32_2 = arith.constant 0 : i32
    return %c0_i32, %c0_i32_0, %c0_i32_1 : i32, i32, i32
  }
  func.func @transform_9(%arg0: i32, %arg1: i32) -> (i32, i32, i32) {
    %c0_i32 = arith.constant 0 : i32
    %c0_i32_0 = arith.constant 0 : i32
    %c0_i32_1 = arith.constant 0 : i32
    %c0_i32_2 = arith.constant 0 : i32
    return %c0_i32, %c0_i32_0, %c0_i32_1 : i32, i32, i32
  }
  func.func @transform_10(%arg0: i32, %arg1: i32) -> (i32, i32) {
    %c0_i32 = arith.constant 0 : i32
    %c0_i32_0 = arith.constant 0 : i32
    %c0_i32_1 = arith.constant 0 : i32
    return %c0_i32, %c0_i32_0 : i32, i32
  }
  func.func @transform_11(%arg0: i32, %arg1: i32) -> (i32, i32) {
    %c0_i32 = arith.constant 0 : i32
    %c0_i32_0 = arith.constant 0 : i32
    %c0_i32_1 = arith.constant 0 : i32
    return %c0_i32, %c0_i32_0 : i32, i32
  }
  func.func @transform_12(%arg0: i32, %arg1: i32) -> (i32, i32, i32) {
    %c0_i32 = arith.constant 0 : i32
    %c0_i32_0 = arith.constant 0 : i32
    return %arg0, %c0_i32, %arg1 : i32, i32, i32
  }
}

</mosaic_0001>

<bundles_post_ra>
// kernel: tpu_custom_call.1
= control target key start
LH: loop header
LB: loop body
LE: loop exit
PB: predicated region body
PF: predicated region fallthrough
CT: control target
= control target key end

     0   :  { %17 = vsyncpa [#allocation3], 0  ;;  %s6375_s21 = smov 0   ;;  %s6377_s22 = smov 0   ;;  %s8683_s0 = inlined_call_operand.vmem [shape: f32[2,3,512], index: 0, kind: input, shape index: {}]   ;;  %s8684_s1 = inlined_call_operand.vmem [shape: bf16[2,32,768], index: 1, kind: input, shape index: {}]   ;;  %s8685_s2 = inlined_call_operand.vmem [shape: f32[32,3], index: 2, kind: input, shape index: {}]   ;;  %s8686_s3 = inlined_call_operand.vmem [shape: f32[32,1], index: 3, kind: input, shape index: {}]   ;;  %s8687_s4 = inlined_call_operand.vmem [shape: f32[3,32,32], index: 4, kind: input, shape index: {}]   ;;  %s8688_s5 = inlined_call_operand.vmem [shape: f32[3,32,1], index: 5, kind: input, shape index: {}]   ;;  %s8689_s6 = inlined_call_operand.vmem [shape: f32[3,32,32], index: 6, kind: input, shape index: {}]   ;;  %s8690_s7 = inlined_call_operand.vmem [shape: f32[3,32,1], index: 7, kind: input, shape index: {}]   ;;  %s8691_s8 = inlined_call_operand.hbm [shape: f32[3,32,32], index: 8, kind: input, shape index: {}]   ;;  %s8692_s9 = inlined_call_operand.vmem [shape: f32[3,32,1], index: 9, kind: input, shape index: {}]   ;;  %s8693_s10 = inlined_call_operand.vmem [shape: f32[3,32], index: 10, kind: input, shape index: {}]   ;;  %s8694_s11 = inlined_call_operand.vmem [shape: f32[3,1], index: 11, kind: input, shape index: {}]   ;;  %s8695_s12 = inlined_call_operand.vmem [shape: f32[2,3,512], index: 12, kind: output, shape index: {}]  }
   0x1   :  { %s6379_s23 = smov 0  }
   0x2 LB: > { %s5741_s24 = sadd.s32 4294967295, %s6300_s23   ;;  %s35_s25 = sadd.s32 1, %s6296_s22  ;;  %s6300_s23 = sphi %s6379_s23, %s23_s23   ;;  %s6296_s22 = sphi %s6377_s22, %s8987_s22   ;;  %s6292_s21 = sphi %s6375_s21, %s8986_s21  }
   0x3   : > { %p37_p0 = scmp.ge.s32.totalorder %s35_s25, 2  ;;  %p5743_p1 = scmp.ge.s32.totalorder %s6300_s23, 1 }
   0x4   : > { %p332_p2 = scmp.lt.s32.totalorder %s6300_s23, 3  ;;  %p6400_p4 = scmp.eq.s32.totalorder %s5741_s24, 0 }
   0x5   : > { %s8989_s25 = smov (%p37_p0, %s35_s25), 0  ;;  %s6302_s28 = smov [#allocation2]  }
   0x6   : > { %p6396_p3 = pnand %p5743_p1, %p332_p2  ;;  %s362_s29 = sshll.u32 %s6302_s28, 4  ;;  %s363_s29 = int_to_ptr.vmem [resolvable:$true] %s362_s29 }
   0x7   : > { %s8835_s27 = scalar_select %p6400_p4, 1, 0 }
   0x8   : > { %s8834_s26 = scalar_select %p6396_p3, 1, 0 }
   0x9   : > { %p6180_p5 = pneg %p6396_p3  ;;  %s6246_s15 = scalar_lea.hbm %s8691_s8, 1536 }
   0xa   : > { %p6247_p7 = scmp.ne.s32.totalorder %s8691_s8, %s6246_s15  ;;  %p6253_p11 = scmp.lt.u32.totalorder %s6246_s15, %s8691_s8 }
   0xb   : > { %p6408_p6 = pnand %p6400_p4, %p6180_p5 }
   0xd   : > { %p6248_p8 = pneg %p6408_p6 }
   0xf   : > { %p6249_p9 = pnand %p6248_p8, %p6247_p7 }
  0x11   : > { %p6250_p10 = pneg %p6249_p9 }
  0x13   : > { %p6255_p12 = pnand %p6253_p11, %p6250_p10 }
  0x15   : > { %6258 = shalt.err (!%p6255_p12)
}
  0x16   : > { %s6259_s20 = scalar_lea.vmem %s363_s29, 1536  ;;  %p6267_p2 = scmp.lt.s32.totalorder %s363_s29, %s363_s29 }
  0x17   : > { %p6260_p13 = scmp.ne.s32.totalorder %s363_s29, %s6259_s20  ;;  %p6268_p5 = scmp.lt.s32.totalorder %s6259_s20, %s6259_s20 }
  0x19   : > { %p6262_p0 = pnand %p6260_p13, %p6248_p8  ;;  %p6269_p4 = por %p6268_p5, %p6267_p2 }
  0x1b   : > { %p6263_p1 = pneg %p6262_p0 }
  0x1d   : > { %p6270_p3 = pnand %p6269_p4, %p6263_p1 }
  0x1f   : > { %6273 = shalt.err (!%p6270_p3)
}
  0x20   : > { %s6303_s24 = smov 128   ;;  %s6304_s28 = smov 8  }
  0x21   : > { %6183 = dma.hbm_to_vmem [thread:$0]  (!%p6408_p6), %s8691_s8, 1536, %s363_s29, [#allocation3], %s6303_s24, %s6303_s24, %s6304_s28  }
  0x22   : > { %p8837_p7 = scmp.ne.s32.totalorder %s8834_s26, 0 }
  0x24   : > { %408 = sbr.rel (%p8837_p7) target bundleno = 2494 (0x9be), region = 68 }
  0x2b   : > { %p8838_p9 = scmp.ne.s32.totalorder %s8835_s27, 0 }
  0x2d   : > { %6287 = dma.done.wait (%p8838_p9), [#allocation3], 1536  }
  0x2e   : > { %6289 = vsyncadd (%p8838_p9), [#allocation3], 4294965760  ;;  %p464_p3 = scmp.lt.s32.totalorder %s6292_s21, 1  ;;  %v490_v6 = vlaneseq  ;;  %v6305_v9 = vmov 1966171168  }
  0x2f   : > { %v894_v10 = vunpack.c.l.s4 %v6305_v9 }
  0x30   : > { %s8991_s21 = smov (!%p464_p3, %s6292_s21), 1  ;;  %v6448_v13 = vshrl.u32 %v490_v6, 7 }
  0x31   : > { %s5881_s30 = sshll.u32 %s8991_s21, 4  ;;  %v895_v16 = vunpack.c.0.s8 %v894_v10  ;;  %s6171_s27 = smul.u32 96, %s8991_s21 }
  0x32   : > { %s6444_s26 = scalar_lea.vmem %s8683_s0, %s5881_s30  ;;  %v6451_v17 = vadd.s32 8, %v6448_v13  ;;  %v6454_v20 = vsub.s32 0, %v6448_v13  ;;  %v6457_v21 = vsub.s32 4, %v6448_v13  ;;  %v6460_v22 = vsub.s32 2, %v6448_v13  ;;  %s486_s15 = scalar_lea.vmem %s8695_s12, %s5881_s30 }
  0x33   : > { %v488_v0 = vld [vmem:[%s6444_s26] sm:$0x77]  ;;  %v489_v1 = vld [vmem:[%s6444_s26 + $0x8] sm:$0x77]  ;;  %v6463_v23 = vsub.s32 6, %v6448_v13  ;;  %v6470_v28 = vsub.s32 %v895_v16, %v6448_v13  ;;  %v6473_v29 = vsub.s32 1, %v6448_v13  ;;  %s6571_s18 = scalar_lea.vmem %s8684_s1, %s6171_s27 }
  0x34   : > { %v493_v2 = vmul.f32 0.90908265, %v488_v0  ;;  %v494_v3 = vmul.f32 0.90908265, %v489_v1  ;;  %8839 = vst [vmem:[#allocation5_spill] sm:$0xff] %v6457_v21  ;;  %v6476_v30 = vsub.s32 5, %v6448_v13 }
  0x35   : > { %8840 = vst [vmem:[#allocation6_spill] sm:$0xff] %v6463_v23  ;;  %v6479_v31 = vsub.s32 3, %v6448_v13 }
  0x36   : > { %v495_v4 = vadd.f32 0.5, %v493_v2  ;;  %v496_v5 = vadd.f32 0.5, %v494_v3  ;;  %8841 = vst [vmem:[#allocation7_spill] sm:$0xff] %v6476_v30 }
  0x38   : > { %v497_v7 = vmax.f32 %v495_v4, 0.0  ;;  %v498_v8 = vmax.f32 %v496_v5, 0.0 }
  0x3a   : > { %v499_v11 = vmin.f32 %v497_v7, 0.99999  ;;  %v500_v12 = vmin.f32 %v498_v8, 0.99999 }
  0x3c   : > { %v501_v14 = vmul.f32 15.0, %v499_v11  ;;  %v502_v15 = vmul.f32 15.0, %v500_v12 }
  0x3e   : > { %v503_v18 = vfloor.f32 %v501_v14  ;;  %v504_v19 = vfloor.f32 %v502_v15 }
  0x40   : > { %v6465_v24 = vsub.f32 %v501_v14, %v503_v18  ;;  %v6467_v25 = vsub.f32 %v502_v15, %v504_v19  ;;  %v6172_v26 = vtrunc.f32 %v503_v18  ;;  %v6174_v27 = vtrunc.f32 %v504_v19 }
  0x42   : > { %v6173_v32 = vcvt.f32.s32 %v6172_v26  ;;  %v6175_v33 = vcvt.f32.s32 %v6174_v27  ;;  %v6482_v34 = vsub.f32 1.0, %v6465_v24  ;;  %v6485_v35 = vsub.f32 1.0, %v6467_v25 }
  0x43   : > { %v656_v36 = vrot.slane %v6465_v24, %v6454_v20  ;;  %v660_v37 = vrot.slane %v6465_v24, %v6457_v21  ;;  %v664_v38 = vrot.slane %v6467_v25, %v6454_v20  ;;  %v668_v39 = vrot.slane %v6467_v25, %v6457_v21 }
  0x44   : > { %vm509_vm0 = vcmp.gt.s32.totalorder %v6173_v32, 0  ;;  %vm511_vm1 = vcmp.gt.s32.totalorder %v6175_v33, 0  ;;  %v570_v40 = vrot.slane %v6482_v34, %v6454_v20  ;;  %v574_v41 = vrot.slane %v6482_v34, %v6457_v21 }
  0x45   : > { %v510_v42 = vsel %vm509_vm0, %v6173_v32, 0  ;;  %v512_v43 = vsel %vm511_vm1, %v6175_v33, 0  ;;  %v578_v44 = vrot.slane %v6485_v35, %v6454_v20  ;;  %v582_v45 = vrot.slane %v6485_v35, %v6457_v21 }
  0x46   : > { %vm513_vm2 = vcmp.lt.s32.totalorder %v510_v42, 15  ;;  %vm515_vm3 = vcmp.lt.s32.totalorder %v512_v43, 15  ;;  %v590_v46 = vrot.slane %v570_v40, %v6454_v20  ;;  %v594_v47 = vrot.slane %v574_v41, %v6454_v20  ;;  %v6228_v40 = vld [vmem:[%s6571_s18 + $0x4] ss:$24 sps:$4 sm:$0xff]  }
  0x47   : > { %v6505_v48 = vsel %vm513_vm2, %v510_v42, 15  ;;  %v6507_v49 = vsel %vm515_vm3, %v512_v43, 15  ;;  %v598_v50 = vrot.slane %v578_v44, %v6454_v20  ;;  %v602_v51 = vrot.slane %v582_v45, %v6454_v20  ;;  %2665 = vmatprep.mubr.bf16.mxu0 %v6228_v40  ;;  %2824 = vmatprep.mubr.bf16.mxu1 %v6228_v40 }
  0x48   : > { %v517_v52 = vadd.s32 1, %v6505_v48  ;;  %v518_v53 = vadd.s32 1, %v6507_v49  ;;  %v526_v54 = vrot.slane %v6505_v48, %v6454_v20  ;;  %v530_v55 = vrot.slane %v6505_v48, %v6457_v21 }
  0x49   : > { %v534_v56 = vrot.slane %v6507_v49, %v6454_v20  ;;  %v538_v57 = vrot.slane %v6507_v49, %v6457_v21  ;;  %v676_v58 = vrot.slane %v656_v36, %v6454_v20  ;;  %v680_v59 = vrot.slane %v660_v37, %v6454_v20 }
  0x4a   : > { %vm519_vm4 = vcmp.lt.s32.totalorder %v517_v52, 15  ;;  %vm521_vm5 = vcmp.lt.s32.totalorder %v518_v53, 15  ;;  %v542_v60 = vrot.slane %v526_v54, %v6454_v20  ;;  %v546_v61 = vrot.slane %v530_v55, %v6454_v20 }
  0x4b   : > { %v6525_v62 = vsel %vm519_vm4, %v517_v52, 15  ;;  %v6527_v63 = vsel %vm521_vm5, %v518_v53, 15  ;;  %v550_v0 = vrot.slane %v534_v56, %v6454_v20  ;;  %v554_v1 = vrot.slane %v538_v57, %v6454_v20 }
  0x4c   : > { %vm555_vm6 = vcmp.eq.s32.totalorder %v6448_v13, %v542_v60  ;;  %vm556_vm7 = vcmp.eq.s32.totalorder %v6448_v13, %v546_v61  ;;  %vm559_vm8 = vcmp.eq.s32.totalorder %v6451_v17, %v542_v60  ;;  %vm560_vm9 = vcmp.eq.s32.totalorder %v6451_v17, %v546_v61 }
  0x4d   : > { %vm557_vm10 = vcmp.eq.s32.totalorder %v6448_v13, %v550_v0  ;;  %vm558_vm11 = vcmp.eq.s32.totalorder %v6448_v13, %v554_v1  ;;  %vm561_vm12 = vcmp.eq.s32.totalorder %v6451_v17, %v550_v0  ;;  %vm562_vm13 = vcmp.eq.s32.totalorder %v6451_v17, %v554_v1 }
  0x4e   : > { %v603_v2 = vsel %vm555_vm6, %v590_v46, 0.0  ;;  %v604_v3 = vsel %vm556_vm7, %v594_v47, 0.0  ;;  %v605_v4 = vsel %vm557_vm10, %v598_v50, 0.0  ;;  %v606_v5 = vsel %vm558_vm11, %v602_v51, 0.0 }
  0x4f   : > { %v607_v6 = vsel %vm559_vm8, %v590_v46, 0.0  ;;  %v608_v7 = vsel %vm560_vm9, %v594_v47, 0.0  ;;  %v609_v8 = vsel %vm561_vm12, %v598_v50, 0.0  ;;  %v610_v9 = vsel %vm562_vm13, %v602_v51, 0.0 }
  0x50   : > { %v614_v10 = vrot.slane %v6525_v62, %v6454_v20  ;;  %v618_v11 = vrot.slane %v6525_v62, %v6457_v21  ;;  %v622_v12 = vrot.slane %v6527_v63, %v6454_v20  ;;  %v626_v14 = vrot.slane %v6527_v63, %v6457_v21 }
  0x51   : > { %v684_v15 = vrot.slane %v664_v38, %v6454_v20  ;;  %v688_v16 = vrot.slane %v668_v39, %v6454_v20  ;;  %v708_v18 = vrot.slane %v6505_v48, %v6460_v22  ;;  %v712_v19 = vrot.slane %v6505_v48, %v6463_v23 }
  0x52   : > { %v630_v26 = vrot.slane %v614_v10, %v6454_v20  ;;  %v634_v27 = vrot.slane %v618_v11, %v6454_v20  ;;  %v638_v32 = vrot.slane %v622_v12, %v6454_v20  ;;  %v642_v33 = vrot.slane %v626_v14, %v6454_v20 }
  0x53   : > { %v716_v36 = vrot.slane %v6507_v49, %v6460_v22  ;;  %v720_v37 = vrot.slane %v6507_v49, %v6463_v23  ;;  %v6563_v38 = vrot.slane %v708_v18, %v6460_v22  ;;  %v6566_v39 = vrot.slane %v712_v19, %v6460_v22 }
  0x54   : > { %vm643_vm14 = vcmp.eq.s32.totalorder %v6448_v13, %v630_v26  ;;  %vm644_vm15 = vcmp.eq.s32.totalorder %v6448_v13, %v634_v27  ;;  %vm645_vm0 = vcmp.eq.s32.totalorder %v6448_v13, %v638_v32  ;;  %vm646_vm1 = vcmp.eq.s32.totalorder %v6448_v13, %v642_v33 }
  0x55   : > { %vm647_vm2 = vcmp.eq.s32.totalorder %v6451_v17, %v630_v26  ;;  %vm648_vm3 = vcmp.eq.s32.totalorder %v6451_v17, %v634_v27  ;;  %vm649_vm4 = vcmp.eq.s32.totalorder %v6451_v17, %v638_v32  ;;  %vm650_vm5 = vcmp.eq.s32.totalorder %v6451_v17, %v642_v33 }
  0x56   : > { %v689_v41 = vsel %vm643_vm14, %v676_v58, 0.0  ;;  %v690_v42 = vsel %vm644_vm15, %v680_v59, 0.0  ;;  %v691_v43 = vsel %vm645_vm0, %v684_v15, 0.0  ;;  %v692_v44 = vsel %vm646_vm1, %v688_v16, 0.0 }
  0x57   : > { %v693_v45 = vsel %vm647_vm2, %v676_v58, 0.0  ;;  %v694_v46 = vsel %vm648_vm3, %v680_v59, 0.0  ;;  %v695_v47 = vsel %vm649_vm4, %v684_v15, 0.0  ;;  %v696_v50 = vsel %vm650_vm5, %v688_v16, 0.0 }
  0x58   : > { %v6582_v51 = vadd.f32 %v689_v41, %v603_v2  ;;  %v6584_v52 = vadd.f32 %v690_v42, %v604_v3  ;;  %v6586_v53 = vadd.f32 %v691_v43, %v605_v4  ;;  %v6588_v54 = vadd.f32 %v692_v44, %v606_v5 }
  0x59   : > { %v6590_v55 = vadd.f32 %v693_v45, %v607_v6  ;;  %v6592_v56 = vadd.f32 %v694_v46, %v608_v7  ;;  %v6594_v57 = vadd.f32 %v695_v47, %v609_v8  ;;  %v6596_v58 = vadd.f32 %v696_v50, %v610_v9 }
  0x5a   : > { %v6599_v59 = vrot.slane %v716_v36, %v6460_v22  ;;  %v6602_v60 = vrot.slane %v720_v37, %v6460_v22  ;;  %vm737_vm6 = vcmp.eq.s32.totalorder %v6448_v13, %v6563_v38  ;;  %vm738_vm7 = vcmp.eq.s32.totalorder %v6448_v13, %v6566_v39 }
  0x5b   : > { %v748_v61 = vrot.slane %v6482_v34, %v6460_v22  ;;  %v752_v0 = vrot.slane %v6482_v34, %v6463_v23  ;;  %v756_v1 = vrot.slane %v6485_v35, %v6460_v22  ;;  %v760_v2 = vrot.slane %v6485_v35, %v6463_v23 }
  0x5c   : > { %vm739_vm8 = vcmp.eq.s32.totalorder %v6448_v13, %v6599_v59  ;;  %vm740_vm9 = vcmp.eq.s32.totalorder %v6448_v13, %v6602_v60  ;;  %v792_v3 = vrot.slane %v6525_v62, %v6460_v22  ;;  %v796_v4 = vrot.slane %v6525_v62, %v6463_v23 }
  0x5d   : > { %v6625_v5 = vrot.slane %v748_v61, %v6460_v22  ;;  %v6628_v6 = vrot.slane %v752_v0, %v6460_v22  ;;  %v6631_v7 = vrot.slane %v756_v1, %v6460_v22  ;;  %v6634_v8 = vrot.slane %v760_v2, %v6460_v22 }
  0x5e   : > { %v800_v9 = vrot.slane %v6527_v63, %v6460_v22  ;;  %v804_v10 = vrot.slane %v6527_v63, %v6463_v23  ;;  %v6641_v11 = vrot.slane %v792_v3, %v6460_v22  ;;  %v6644_v12 = vrot.slane %v796_v4, %v6460_v22 }
  0x5f   : > { %v781_v14 = vsel %vm737_vm6, %v6625_v5, 0.0  ;;  %v782_v15 = vsel %vm738_vm7, %v6628_v6, 0.0  ;;  %v783_v16 = vsel %vm739_vm8, %v6631_v7, 0.0  ;;  %v784_v18 = vsel %vm740_vm9, %v6634_v8, 0.0 }
  0x60   : > { %v6657_v19 = vrot.slane %v800_v9, %v6460_v22  ;;  %v6660_v26 = vrot.slane %v804_v10, %v6460_v22  ;;  %vm821_vm10 = vcmp.eq.s32.totalorder %v6448_v13, %v6641_v11  ;;  %vm822_vm11 = vcmp.eq.s32.totalorder %v6448_v13, %v6644_v12 }
  0x61   : > { %v832_v27 = vrot.slane %v6465_v24, %v6460_v22  ;;  %v836_v32 = vrot.slane %v6465_v24, %v6463_v23  ;;  %v840_v33 = vrot.slane %v6467_v25, %v6460_v22  ;;  %v844_v36 = vrot.slane %v6467_v25, %v6463_v23 }
  0x62   : > { %vm823_vm12 = vcmp.eq.s32.totalorder %v6448_v13, %v6657_v19  ;;  %vm824_vm13 = vcmp.eq.s32.totalorder %v6448_v13, %v6660_v26  ;;  %v1476_v37 = vrot.slane %v6505_v48, %v6473_v29  ;;  %v1480_v40 = vrot.slane %v6505_v48, %v6476_v30 }
  0x63   : > { %v6683_v41 = vrot.slane %v832_v27, %v6460_v22  ;;  %v6686_v42 = vrot.slane %v836_v32, %v6460_v22  ;;  %v6689_v43 = vrot.slane %v840_v33, %v6460_v22  ;;  %v6692_v44 = vrot.slane %v844_v36, %v6460_v22 }
  0x64   : > { %v1484_v45 = vrot.slane %v6507_v49, %v6473_v29  ;;  %v1488_v46 = vrot.slane %v6507_v49, %v6476_v30  ;;  %v1492_v48 = vrot.slane %v1476_v37, %v6473_v29  ;;  %v1496_v47 = vrot.slane %v1480_v40, %v6473_v29 }
  0x65   : > { %8842 = vst [vmem:[#allocation8_spill] sm:$0xff] %v6686_v42  ;;  %8843 = vst [vmem:[#allocation9_spill] sm:$0xff] %v6689_v43  ;;  %v865_v50 = vsel %vm821_vm10, %v6683_v41, 0.0  ;;  %v866_v61 = vsel %vm822_vm11, %v6686_v42, 0.0  ;;  %v867_v0 = vsel %vm823_vm12, %v6689_v43, 0.0  ;;  %v868_v1 = vsel %vm824_vm13, %v6692_v44, 0.0 }
  0x66   : > { %8844 = vst [vmem:[#allocation10_spill] sm:$0xff] %v6692_v44  ;;  %v6710_v2 = vadd.f32 %v865_v50, %v781_v14  ;;  %v6712_v49 = vadd.f32 %v866_v61, %v782_v15  ;;  %v6714_v3 = vadd.f32 %v867_v0, %v783_v16  ;;  %v6716_v4 = vadd.f32 %v868_v1, %v784_v18 }
  0x67   : > { %v1500_v9 = vrot.slane %v1484_v45, %v6473_v29  ;;  %v1504_v10 = vrot.slane %v1488_v46, %v6473_v29  ;;  %vm1505_vm14 = vcmp.eq.s32.totalorder %v6448_v13, %v1492_v48  ;;  %vm1506_vm15 = vcmp.eq.s32.totalorder %v6448_v13, %v1496_v47 }
  0x68   : > { %v889_v27 = vcombine.low %v6710_v2, %v6712_v49  ;;  %v891_v14 = vcombine.low %v6714_v3, %v6716_v4  ;;  %vm1509_vm0 = vcmp.eq.s32.totalorder %v6451_v17, %v1492_v48  ;;  %vm1510_vm1 = vcmp.eq.s32.totalorder %v6451_v17, %v1496_v47 }
  0x69   : > { %vm1507_vm2 = vcmp.eq.s32.totalorder %v6448_v13, %v1500_v9  ;;  %vm1508_vm3 = vcmp.eq.s32.totalorder %v6448_v13, %v1504_v10  ;;  %vm1511_vm4 = vcmp.eq.s32.totalorder %v6451_v17, %v1500_v9  ;;  %vm1512_vm5 = vcmp.eq.s32.totalorder %v6451_v17, %v1504_v10 }
  0x6a   : > { %v6733_v15 = vrot.slane %v889_v27, %v6470_v28  ;;  %v6736_v16 = vrot.slane %v891_v14, %v6470_v28  ;;  %v1516_v18 = vrot.slane %v6482_v34, %v6473_v29  ;;  %v1520_v32 = vrot.slane %v6482_v34, %v6476_v30 }
  0x6b   : > { %v1524_v33 = vrot.slane %v6485_v35, %v6473_v29  ;;  %v1528_v36 = vrot.slane %v6485_v35, %v6476_v30  ;;  %v1560_v37 = vrot.slane %v6525_v62, %v6473_v29  ;;  %v1564_v40 = vrot.slane %v6525_v62, %v6476_v30 }
  0x6c   : > { %v921_v45 = vcombine.low %v6733_v15, %v6736_v16  ;;  %v1536_v46 = vrot.slane %v1516_v18, %v6473_v29  ;;  %v1540_v50 = vrot.slane %v1520_v32, %v6473_v29  ;;  %v1568_v34 = vrot.slane %v6527_v63, %v6473_v29 }
  0x6d   : > { %v1544_v61 = vrot.slane %v1524_v33, %v6473_v29  ;;  %v1548_v35 = vrot.slane %v1528_v36, %v6473_v29  ;;  %v1572_v0 = vrot.slane %v6527_v63, %v6476_v30  ;;  %v1576_v1 = vrot.slane %v1560_v37, %v6473_v29 }
  0x6e   : > { %v931_v62 = vrot.slane %v921_v45, %v6470_v28  ;;  %v1549_v27 = vsel %vm1505_vm14, %v1536_v46, 0.0  ;;  %v1550_v14 = vsel %vm1506_vm15, %v1540_v50, 0.0  ;;  %v1553_v18 = vsel %vm1509_vm0, %v1536_v46, 0.0 }
  0x6f   : > { %v1551_v32 = vsel %vm1507_vm2, %v1544_v61, 0.0  ;;  %v1552_v33 = vsel %vm1508_vm3, %v1548_v35, 0.0  ;;  %v1554_v63 = vsel %vm1510_vm1, %v1540_v50, 0.0  ;;  %v1555_v36 = vsel %vm1511_vm4, %v1544_v61, 0.0 }
  0x70   : > { %v6777_v37 = vrot.slane %v931_v62, %v6473_v29  ;;  %v1556_v45 = vsel %vm1512_vm5, %v1548_v35, 0.0  ;;  %v1580_v48 = vrot.slane %v1564_v40, %v6473_v29  ;;  %v1584_v46 = vrot.slane %v1568_v34, %v6473_v29 }
  0x71   : > { %v1588_v21 = vrot.slane %v1572_v0, %v6473_v29  ;;  %vm1589_vm6 = vcmp.eq.s32.totalorder %v6448_v13, %v1576_v1  ;;  %vm1593_vm7 = vcmp.eq.s32.totalorder %v6451_v17, %v1576_v1  ;;  %v1600_v47 = vrot.slane %v6465_v24, %v6473_v29 }
  0x72   : > { %8845 = vst [vmem:[#allocation11_spill] sm:$0xff] %v6777_v37  ;;  %v1346_v9 = vmul.f32 %v6777_v37, %v6584_v52  ;;  %v1350_v10 = vmul.f32 %v6777_v37, %v6592_v56  ;;  %vm1590_vm8 = vcmp.eq.s32.totalorder %v6448_v13, %v1580_v48  ;;  %vm1591_vm9 = vcmp.eq.s32.totalorder %v6448_v13, %v1584_v46 }
  0x73   : > { %vm1592_vm10 = vcmp.eq.s32.totalorder %v6448_v13, %v1588_v21  ;;  %vm1594_vm11 = vcmp.eq.s32.totalorder %v6451_v17, %v1580_v48  ;;  %vm1595_vm12 = vcmp.eq.s32.totalorder %v6451_v17, %v1584_v46  ;;  %vm1596_vm13 = vcmp.eq.s32.totalorder %v6451_v17, %v1588_v21 }
  0x74   : > { %v1604_v40 = vrot.slane %v6465_v24, %v6476_v30  ;;  %v1608_v50 = vrot.slane %v6467_v25, %v6473_v29  ;;  %v1612_v34 = vrot.slane %v6467_v25, %v6476_v30  ;;  %v1620_v61 = vrot.slane %v1600_v47, %v6473_v29 }
  0x75   : > { %v2370_v35 = vpack.c.bf16 %v1350_v10, %v1346_v9  ;;  %v6806_v0 = vrot.slane %v931_v62, %v6479_v31  ;;  %v6809_v23 = vrot.slane %v931_v62, %v6454_v20  ;;  %v6812_v37 = vrot.slane %v931_v62, %v6460_v22 }
  0x76   : > { %v1624_v24 = vrot.slane %v1604_v40, %v6473_v29  ;;  %v1628_v44 = vrot.slane %v1608_v50, %v6473_v29  ;;  %v1632_v43 = vrot.slane %v1612_v34, %v6473_v29  ;;  %v1633_v25 = vsel %vm1589_vm6, %v1620_v61, 0.0 }
  0x77   : > { %8846 = vst [vmem:[#allocation12_spill] sm:$0xff] %v6806_v0  ;;  %v1637_v47 = vsel %vm1593_vm7, %v1620_v61, 0.0  ;;  %v6821_v9 = vadd.f32 %v1633_v25, %v1549_v27  ;;  %2633 = vmatprep.subr.bf16.mxu0 %v2370_v35  ;;  %v1348_v10 = vmul.f32 %v6806_v0, %v6588_v54  ;;  %v1352_v30 = vmul.f32 %v6806_v0, %v6596_v58 }
  0x78   : > { %v1634_v40 = vsel %vm1590_vm8, %v1624_v24, 0.0  ;;  %v1635_v50 = vsel %vm1591_vm9, %v1628_v44, 0.0  ;;  %v1636_v34 = vsel %vm1592_vm10, %v1632_v43, 0.0  ;;  %v1638_v1 = vsel %vm1594_vm11, %v1624_v24, 0.0 }
  0x79   : > { %8847 = vst [vmem:[#allocation13_spill] sm:$0xff] %v6821_v9  ;;  %v1639_v27 = vsel %vm1595_vm12, %v1628_v44, 0.0  ;;  %v1640_v61 = vsel %vm1596_vm13, %v1632_v43, 0.0  ;;  %v6839_v35 = vadd.f32 %v1634_v40, %v1550_v14  ;;  %v6841_v25 = vadd.f32 %v1635_v50, %v1551_v32 }
  0x7a   : > { %v6843_v0 = vadd.f32 %v1636_v34, %v1552_v33  ;;  %v6845_v9 = vadd.f32 %v1637_v47, %v1553_v18  ;;  %v6847_v42 = vadd.f32 %v1638_v1, %v1554_v63  ;;  %v6849_v13 = vadd.f32 %v1639_v27, %v1555_v36 }
  0x7b   : > { %v6851_v48 = vadd.f32 %v1640_v61, %v1556_v45  ;;  %v2372_v24 = vpack.c.bf16 %v1352_v30, %v1348_v10  ;;  %v1345_v44 = vmul.f32 %v6809_v23, %v6582_v51  ;;  %v1349_v21 = vmul.f32 %v6809_v23, %v6590_v55 }
  0x7c   : > { %v1347_v43 = vmul.f32 %v6812_v37, %v6586_v53  ;;  %v1351_v14 = vmul.f32 %v6812_v37, %v6594_v57  ;;  %v922_v18 = vcombine.high %v6733_v15, %v6736_v16  ;;  %v953_v32 = vcombine.high %v931_v62, %v931_v62 }
  0x7d   : > { %2792 = vmatprep.subr.bf16.mxu1 %v2372_v24  ;;  %v2369_v33 = vpack.c.bf16 %v1349_v21, %v1345_v44  ;;  %v890_v30 = vcombine.high %v6710_v2, %v6712_v49  ;;  %v892_v63 = vcombine.high %v6714_v3, %v6716_v4  ;;  %vm741_vm14 = vcmp.eq.s32.totalorder %v6451_v17, %v6563_v38 }
  0x7e   : > { %v2371_v36 = vpack.c.bf16 %v1351_v14, %v1347_v43  ;;  %v945_v45 = vrot.slane %v922_v18, %v6470_v28  ;;  %v6869_v46 = vrot.slane %v953_v32, %v6473_v29  ;;  %v6872_v47 = vrot.slane %v953_v32, %v6479_v31 }
  0x7f   : > { %2634 = vmatpush1.bf16.msra.mxu0 %v2369_v33  ;;  %v6875_v15 = vrot.slane %v953_v32, %v6454_v20  ;;  %v6878_v16 = vrot.slane %v953_v32, %v6460_v22  ;;  %v906_v2 = vrot.slane %v890_v30, %v6470_v28  ;;  %v920_v49 = vrot.slane %v892_v63, %v6470_v28 }
  0x80   : > { %8848 = vst [vmem:[#allocation14_spill] sm:$0xff] %v6869_v46  ;;  %8849 = vst [vmem:[#allocation15_spill] sm:$0xff] %v6872_v47  ;;  %2793 = vmatpush1.bf16.msra.mxu1 %v2371_v36  ;;  %v6883_v3 = vrot.slane %v945_v45, %v6473_v29  ;;  %v6886_v4 = vrot.slane %v945_v45, %v6479_v31  ;;  %v6889_v62 = vrot.slane %v945_v45, %v6454_v20  ;;  %vm3241_vm6 = vcmask 261120  }
  0x81   : > { %v6892_v10 = vrot.slane %v945_v45, %v6460_v22  ;;  %v1362_v40 = vmul.f32 %v6869_v46, %v6584_v52  ;;  %v1366_v50 = vmul.f32 %v6869_v46, %v6592_v56  ;;  %v1364_v34 = vmul.f32 %v6872_v47, %v6588_v54 }
  0x82   : > { %8850 = vst [vmem:[#allocation16_spill] sm:$0xff] %v6886_v4  ;;  %8851 = vst [vmem:[#allocation17_spill] sm:$0xff] %v6889_v62  ;;  %v1368_v1 = vmul.f32 %v6872_v47, %v6596_v58  ;;  %v1354_v27 = vmul.f32 %v6883_v3, %v6584_v52  ;;  %v1358_v61 = vmul.f32 %v6883_v3, %v6592_v56 }
  0x83   : > { %8852 = vst [vmem:[#allocation18_spill] sm:$0xff] %v6892_v10  ;;  %v1356_v24 = vmul.f32 %v6886_v4, %v6588_v54  ;;  %v1360_v44 = vmul.f32 %v6886_v4, %v6596_v58  ;;  %v1353_v21 = vmul.f32 %v6889_v62, %v6582_v51  ;;  %v1357_v43 = vmul.f32 %v6889_v62, %v6590_v55 }
  0x84   : > { %v1355_v14 = vmul.f32 %v6892_v10, %v6586_v53  ;;  %v1359_v18 = vmul.f32 %v6892_v10, %v6594_v57  ;;  %v2374_v32 = vpack.c.bf16 %v1358_v61, %v1354_v27  ;;  %v2378_v30 = vpack.c.bf16 %v1366_v50, %v1362_v40 }
  0x85   : > { %v2376_v33 = vpack.c.bf16 %v1360_v44, %v1356_v24  ;;  %v2380_v63 = vpack.c.bf16 %v1368_v1, %v1364_v34  ;;  %v2373_v36 = vpack.c.bf16 %v1357_v43, %v1353_v21  ;;  %v1361_v46 = vmul.f32 %v6875_v15, %v6582_v51 }
  0x86   : > { %v2375_v47 = vpack.c.bf16 %v1359_v18, %v1355_v14  ;;  %v1365_v4 = vmul.f32 %v6875_v15, %v6590_v55  ;;  %2635 = vmatprep.subr.bf16.mxu0 %v2374_v32  ;;  %v1363_v62 = vmul.f32 %v6878_v16, %v6586_v53  ;;  %v1367_v10 = vmul.f32 %v6878_v16, %v6594_v57 }
  0x87   : > { %2794 = vmatprep.subr.bf16.mxu1 %v2376_v33  ;;  %v955_v27 = vcombine.high %v945_v45, %v945_v45  ;;  %2636 = vmatpush1.bf16.msra.mxu0 %v2373_v36  ;;  %v923_v50 = vcombine.low %v906_v2, %v920_v49  ;;  %v924_v34 = vcombine.high %v906_v2, %v920_v49 }
  0x88   : > { %2795 = vmatpush1.bf16.msra.mxu1 %v2375_v47  ;;  %v2377_v40 = vpack.c.bf16 %v1365_v4, %v1361_v46  ;;  %2637 = vmatprep.subr.bf16.mxu0 %v2378_v30  ;;  %v2379_v1 = vpack.c.bf16 %v1367_v10, %v1363_v62  ;;  %vm742_vm15 = vcmp.eq.s32.totalorder %v6451_v17, %v6566_v39 }
  0x89   : > { %2796 = vmatprep.subr.bf16.mxu1 %v2380_v63  ;;  %v6927_v61 = vrot.slane %v955_v27, %v6473_v29  ;;  %v6930_v24 = vrot.slane %v955_v27, %v6479_v31  ;;  %v6935_v44 = vrot.slane %v955_v27, %v6454_v20  ;;  %v6938_v45 = vrot.slane %v955_v27, %v6460_v22 }
  0x8a   : > { %v938_v46 = vrot.slane %v923_v50, %v6470_v28  ;;  %v952_v47 = vrot.slane %v924_v34, %v6470_v28  ;;  %vm743_vm0 = vcmp.eq.s32.totalorder %v6451_v17, %v6599_v59  ;;  %vm744_vm1 = vcmp.eq.s32.totalorder %v6451_v17, %v6602_v60 }
  0x8b   : > { %8853 = vst [vmem:[#allocation19_spill] sm:$0xff] %v6935_v44  ;;  %8854 = vst [vmem:[#allocation20_spill] sm:$0xff] %v6938_v45  ;;  %v1370_v2 = vmul.f32 %v6927_v61, %v6584_v52  ;;  %v1374_v49 = vmul.f32 %v6927_v61, %v6592_v56  ;;  %v1372_v4 = vmul.f32 %v6930_v24, %v6588_v54  ;;  %2638 = vmatpush1.bf16.msra.mxu0 %v2377_v40 }
  0x8c   : > { %v1376_v62 = vmul.f32 %v6930_v24, %v6596_v58  ;;  %2797 = vmatpush1.bf16.msra.mxu1 %v2379_v1  ;;  %v1369_v10 = vmul.f32 %v6935_v44, %v6582_v51  ;;  %v1373_v21 = vmul.f32 %v6935_v44, %v6590_v55  ;;  %v1371_v43 = vmul.f32 %v6938_v45, %v6586_v53 }
  0x8d   : > { %v2382_v14 = vpack.c.bf16 %v1374_v49, %v1370_v2  ;;  %v1375_v32 = vmul.f32 %v6938_v45, %v6594_v57  ;;  %v6959_v33 = vrot.slane %v938_v46, %v6473_v29  ;;  %v6962_v63 = vrot.slane %v938_v46, %v6479_v31 }
  0x8e   : > { %v2384_v18 = vpack.c.bf16 %v1376_v62, %v1372_v4  ;;  %v2381_v30 = vpack.c.bf16 %v1373_v21, %v1369_v10  ;;  %v6965_v36 = vrot.slane %v938_v46, %v6454_v20  ;;  %v6968_v27 = vrot.slane %v938_v46, %v6460_v22 }
  0x8f   : > { %8855 = vst [vmem:[#allocation21_spill] sm:$0xff] %v6959_v33  ;;  %8856 = vst [vmem:[#allocation22_spill] sm:$0xff] %v6962_v63  ;;  %2639 = vmatprep.subr.bf16.mxu0 %v2382_v14  ;;  %v2383_v40 = vpack.c.bf16 %v1375_v32, %v1371_v43  ;;  %v1378_v50 = vmul.f32 %v6959_v33, %v6584_v52  ;;  %v1382_v34 = vmul.f32 %v6959_v33, %v6592_v56 }
  0x90   : > { %8857 = vst [vmem:[#allocation23_spill] sm:$0xff] %v6965_v36  ;;  %8858 = vst [vmem:[#allocation24_spill] sm:$0xff] %v6968_v27  ;;  %2798 = vmatprep.subr.bf16.mxu1 %v2384_v18  ;;  %2640 = vmatpush1.bf16.msra.mxu0 %v2381_v30  ;;  %v1380_v1 = vmul.f32 %v6962_v63, %v6588_v54  ;;  %v1384_v2 = vmul.f32 %v6962_v63, %v6596_v58 }
  0x91   : > { %v1377_v49 = vmul.f32 %v6965_v36, %v6582_v51  ;;  %v1381_v4 = vmul.f32 %v6965_v36, %v6590_v55  ;;  %2799 = vmatpush1.bf16.msra.mxu1 %v2383_v40  ;;  %v2386_v62 = vpack.c.bf16 %v1382_v34, %v1378_v50  ;;  %v1379_v10 = vmul.f32 %v6968_v27, %v6586_v53 }
  0x92   : > { %v1383_v21 = vmul.f32 %v6968_v27, %v6594_v57  ;;  %v6987_v43 = vrot.slane %v952_v47, %v6473_v29  ;;  %v2388_v14 = vpack.c.bf16 %v1384_v2, %v1380_v1  ;;  %v6990_v32 = vrot.slane %v952_v47, %v6479_v31 }
  0x93   : > { %v2385_v18 = vpack.c.bf16 %v1381_v4, %v1377_v49  ;;  %v6993_v30 = vrot.slane %v952_v47, %v6454_v20  ;;  %2641 = vmatprep.subr.bf16.mxu0 %v2386_v62  ;;  %v7000_v27 = vrot.slane %v952_v47, %v6460_v22  ;;  %v7012_v4 = vsel %vm741_vm14, %v6625_v5, 0.0 }
  0x94   : > { %8859 = vst [vmem:[#allocation25_spill] sm:$0xff] %v6987_v43  ;;  %8860 = vst [vmem:[#allocation26_spill] sm:$0xff] %v6990_v32  ;;  %v2387_v40 = vpack.c.bf16 %v1383_v21, %v1379_v10  ;;  %v1386_v50 = vmul.f32 %v6987_v43, %v6584_v52  ;;  %v1390_v34 = vmul.f32 %v6987_v43, %v6592_v56  ;;  %2800 = vmatprep.subr.bf16.mxu1 %v2388_v14 }
  0x95   : > { %8861 = vst [vmem:[#allocation27_spill] sm:$0xff] %v6993_v30  ;;  %8862 = vst [vmem:[#allocation28_spill] sm:$0xff] %v7000_v27  ;;  %2642 = vmatpush1.bf16.msra.mxu0 %v2385_v18  ;;  %v1388_v1 = vmul.f32 %v6990_v32, %v6588_v54  ;;  %v1392_v2 = vmul.f32 %v6990_v32, %v6596_v58  ;;  %v1385_v49 = vmul.f32 %v6993_v30, %v6582_v51 }
  0x96   : > { %2801 = vmatpush1.bf16.msra.mxu1 %v2387_v40  ;;  %v2390_v62 = vpack.c.bf16 %v1390_v34, %v1386_v50  ;;  %v1389_v10 = vmul.f32 %v6993_v30, %v6590_v55  ;;  %v1387_v21 = vmul.f32 %v7000_v27, %v6586_v53  ;;  %v1391_v14 = vmul.f32 %v7000_v27, %v6594_v57 }
  0x97   : > { %v2392_v18 = vpack.c.bf16 %v1392_v2, %v1388_v1  ;;  %v954_v32 = vcombine.high %v938_v46, %v938_v46  ;;  %v956_v43 = vcombine.high %v952_v47, %v952_v47  ;;  %vm825_vm2 = vcmp.eq.s32.totalorder %v6451_v17, %v6641_v11 }
  0x98   : > { %2643 = vmatprep.subr.bf16.mxu0 %v2390_v62  ;;  %v2389_v38 = vpack.c.bf16 %v1389_v10, %v1385_v49  ;;  %v2391_v5 = vpack.c.bf16 %v1391_v14, %v1387_v21  ;;  %v786_v49 = vsel %vm742_vm15, %v6628_v6, 0.0  ;;  %vm826_vm3 = vcmp.eq.s32.totalorder %v6451_v17, %v6644_v12  ;;  %v8873_v12 = vld [vmem:[#allocation10_spill] sm:$0xff] }
  0x99   : > { %2802 = vmatprep.subr.bf16.mxu1 %v2392_v18  ;;  %v7027_v40 = vrot.slane %v954_v32, %v6473_v29  ;;  %v7030_v50 = vrot.slane %v954_v32, %v6479_v31  ;;  %v7033_v46 = vrot.slane %v954_v32, %v6454_v20  ;;  %v7036_v47 = vrot.slane %v954_v32, %v6460_v22 }
  0x9a   : > { %2644 = vmatpush1.bf16.msra.mxu0 %v2389_v38  ;;  %2803 = vmatpush1.bf16.msra.mxu1 %v2391_v5  ;;  %v7039_v34 = vrot.slane %v956_v43, %v6473_v29  ;;  %v7042_v1 = vrot.slane %v956_v43, %v6479_v31  ;;  %v7045_v2 = vrot.slane %v956_v43, %v6454_v20 }
  0x9b   : > { %8863 = vst [vmem:[#allocation29_spill] sm:$0xff] %v7027_v40  ;;  %8864 = vst [vmem:[#allocation30_spill] sm:$0xff] %v7030_v50  ;;  %v1394_v32 = vmul.f32 %v7027_v40, %v6584_v52  ;;  %v1398_v62 = vmul.f32 %v7027_v40, %v6592_v56  ;;  %v1396_v10 = vmul.f32 %v7030_v50, %v6588_v54 }
  0x9c   : > { %8865 = vst [vmem:[#allocation31_spill] sm:$0xff] %v7033_v46  ;;  %8866 = vst [vmem:[#allocation32_spill] sm:$0xff] %v7036_v47  ;;  %v1400_v21 = vmul.f32 %v7030_v50, %v6596_v58  ;;  %v1393_v14 = vmul.f32 %v7033_v46, %v6582_v51  ;;  %v1397_v18 = vmul.f32 %v7033_v46, %v6590_v55 }
  0x9d   : > { %8867 = vst [vmem:[#allocation33_spill] sm:$0xff] %v7039_v34  ;;  %8868 = vst [vmem:[#allocation34_spill] sm:$0xff] %v7042_v1  ;;  %v1395_v39 = vmul.f32 %v7036_v47, %v6586_v53  ;;  %v1399_v6 = vmul.f32 %v7036_v47, %v6594_v57  ;;  %v2394_v38 = vpack.c.bf16 %v1398_v62, %v1394_v32 }
  0x9e   : > { %8869 = vst [vmem:[#allocation35_spill] sm:$0xff] %v7045_v2  ;;  %v2396_v5 = vpack.c.bf16 %v1400_v21, %v1396_v10  ;;  %v1402_v27 = vmul.f32 %v7039_v34, %v6584_v52  ;;  %v1406_v50 = vmul.f32 %v7039_v34, %v6592_v56  ;;  %v2393_v40 = vpack.c.bf16 %v1397_v18, %v1393_v14 }
  0x9f   : > { %v2395_v30 = vpack.c.bf16 %v1399_v6, %v1395_v39  ;;  %v1404_v36 = vmul.f32 %v7042_v1, %v6588_v54  ;;  %v1408_v46 = vmul.f32 %v7042_v1, %v6596_v58  ;;  %2645 = vmatprep.subr.bf16.mxu0 %v2394_v38  ;;  %v1401_v32 = vmul.f32 %v7045_v2, %v6582_v51 }
  0xa0   : > { %2804 = vmatprep.subr.bf16.mxu1 %v2396_v5  ;;  %v2398_v63 = vpack.c.bf16 %v1406_v50, %v1402_v27  ;;  %v1405_v62 = vmul.f32 %v7045_v2, %v6590_v55  ;;  %v787_v10 = vsel %vm743_vm0, %v6631_v7, 0.0  ;;  %2646 = vmatpush1.bf16.msra.mxu0 %v2393_v40  ;;  %v7084_v14 = vrot.slane %v956_v43, %v6460_v22 }
  0xa1   : > { %2805 = vmatpush1.bf16.msra.mxu1 %v2395_v30  ;;  %v2400_v21 = vpack.c.bf16 %v1408_v46, %v1404_v36  ;;  %v788_v27 = vsel %vm744_vm1, %v6634_v8, 0.0  ;;  %vm827_vm4 = vcmp.eq.s32.totalorder %v6451_v17, %v6657_v19  ;;  %vm828_vm5 = vcmp.eq.s32.totalorder %v6451_v17, %v6660_v26  ;;  %v8871_v8 = vld [vmem:[#allocation8_spill] sm:$0xff]  ;;  %v8874_v46 = vld [vmem:[#allocation13_spill] sm:$0xff] }
  0xa2   : > { %8870 = vst [vmem:[#allocation36_spill] sm:$0xff] %v7084_v14  ;;  %2647 = vmatprep.subr.bf16.mxu0 %v2398_v63  ;;  %v2397_v50 = vpack.c.bf16 %v1405_v62, %v1401_v32  ;;  %v1403_v59 = vmul.f32 %v7084_v14, %v6586_v53  ;;  %v1407_v60 = vmul.f32 %v7084_v14, %v6594_v57  ;;  %v869_v7 = vsel %vm825_vm2, %v6683_v41, 0.0  ;;  %v8872_v63 = vld [vmem:[#allocation9_spill] sm:$0xff] }
  0xa3   : > { %2806 = vmatprep.subr.bf16.mxu1 %v2400_v21  ;;  %v870_v11 = vsel %vm826_vm3, %v8871_v8, 0.0  ;;  %v871_v36 = vsel %vm827_vm4, %v8872_v63, 0.0  ;;  %v872_v43 = vsel %vm828_vm5, %v8873_v12, 0.0  ;;  %v877_v19 = vadd.f32 %v869_v7, %v7012_v4 }
  0xa4   : > { %v878_v30 = vadd.f32 %v870_v11, %v786_v49  ;;  %2648 = vmatpush1.bf16.msra.mxu0 %v2397_v50  ;;  %v2399_v17 = vpack.c.bf16 %v1407_v60, %v1403_v59  ;;  %v879_v26 = vadd.f32 %v871_v36, %v787_v10  ;;  %v880_v40 = vadd.f32 %v872_v43, %v788_v27 }
  0xa5   : > { %v1657_v18 = vcombine.low %v8874_v46, %v6839_v35  ;;  %v1659_v41 = vcombine.low %v6841_v25, %v6843_v0  ;;  %v1658_v38 = vcombine.high %v8874_v46, %v6839_v35  ;;  %v1660_v49 = vcombine.high %v6841_v25, %v6843_v0 }
  0xa6   : > { %v957_v39 = vcombine.low %v877_v19, %v878_v30  ;;  %v958_v6 = vcombine.high %v877_v19, %v878_v30  ;;  %2807 = vmatpush1.bf16.msra.mxu1 %v2399_v17  ;;  %v959_v5 = vcombine.low %v879_v26, %v880_v40  ;;  %v960_v32 = vcombine.high %v879_v26, %v880_v40 }
  0xa7   : > { %v1667_v4 = vrot.slane %v1657_v18, %v6470_v28  ;;  %v1681_v21 = vrot.slane %v1659_v41, %v6470_v28  ;;  %v7120_v27 = vrot.slane %v1658_v38, %v6470_v28  ;;  %v7125_v60 = vrot.slane %v1660_v49, %v6470_v28 }
  0xa8   : > { %v967_v62 = vrot.slane %v957_v39, %v6470_v28  ;;  %v974_v10 = vrot.slane %v958_v6, %v6470_v28  ;;  %v981_v50 = vrot.slane %v959_v5, %v6470_v28  ;;  %v988_v59 = vrot.slane %v960_v32, %v6470_v28 }
  0xa9   : > { %v1689_v8 = vcombine.low %v1667_v4, %v1681_v21  ;;  %v1690_v11 = vcombine.high %v1667_v4, %v1681_v21 }
  0xaa   : > { %v989_v12 = vcombine.low %v967_v62, %v981_v50  ;;  %v990_v43 = vcombine.high %v967_v62, %v981_v50  ;;  %v991_v19 = vcombine.low %v974_v10, %v988_v59  ;;  %v992_v30 = vcombine.high %v974_v10, %v988_v59 }
  0xab   : > { %v7134_v17 = vrot.slane %v1689_v8, %v6470_v28  ;;  %v7137_v26 = vrot.slane %v1690_v11, %v6470_v28 }
  0xac   : > { %v999_v39 = vrot.slane %v989_v12, %v6470_v28  ;;  %v1013_v6 = vrot.slane %v990_v43, %v6470_v28  ;;  %v7146_v41 = vrot.slane %v991_v19, %v6470_v28  ;;  %v7149_v38 = vrot.slane %v992_v30, %v6470_v28 }
  0xad   : > { %v7153_v5 = vrot.slane %v7134_v17, %v6473_v29  ;;  %v7157_v32 = vrot.slane %v7134_v17, %v6479_v31  ;;  %v7161_v4 = vrot.slane %v7134_v17, %v6454_v20  ;;  %v7165_v49 = vrot.slane %v7134_v17, %v6460_v22 }
  0xae   : > { %v7168_v62 = vrot.slane %v999_v39, %v6473_v29  ;;  %v7171_v10 = vrot.slane %v999_v39, %v6479_v31  ;;  %v7174_v21 = vrot.slane %v999_v39, %v6454_v20  ;;  %v7177_v50 = vrot.slane %v999_v39, %v6460_v22 }
  0xaf   : > { %v7180_v59 = vrot.slane %v1013_v6, %v6473_v29  ;;  %v7183_v8 = vrot.slane %v1013_v6, %v6479_v31  ;;  %v7186_v11 = vrot.slane %v1013_v6, %v6454_v20  ;;  %v7189_v12 = vrot.slane %v1013_v6, %v6460_v22 }
  0xb0   : > { %8875 = vst [vmem:[#allocation8_spill] sm:$0xff] %v7168_v62  ;;  %8876 = vst [vmem:[#allocation9_spill] sm:$0xff] %v7171_v10  ;;  %v1410_v43 = vmul.f32 %v7168_v62, %v6584_v52  ;;  %v1414_v19 = vmul.f32 %v7168_v62, %v6592_v56  ;;  %v1412_v30 = vmul.f32 %v7171_v10, %v6588_v54 }
  0xb1   : > { %8877 = vst [vmem:[#allocation10_spill] sm:$0xff] %v7174_v21  ;;  %8878 = vst [vmem:[#allocation13_spill] sm:$0xff] %v7177_v50  ;;  %v1416_v36 = vmul.f32 %v7171_v10, %v6596_v58  ;;  %v1409_v63 = vmul.f32 %v7174_v21, %v6582_v51  ;;  %v1413_v7 = vmul.f32 %v7174_v21, %v6590_v55 }
  0xb2   : > { %8879 = vst [vmem:[#allocation37_spill] sm:$0xff] %v7180_v59  ;;  %8880 = vst [vmem:[#allocation38_spill] sm:$0xff] %v7183_v8  ;;  %v1411_v18 = vmul.f32 %v7177_v50, %v6586_v53  ;;  %v1415_v40 = vmul.f32 %v7177_v50, %v6594_v57  ;;  %v2402_v14 = vpack.c.bf16 %v1414_v19, %v1410_v43 }
  0xb3   : > { %8881 = vst [vmem:[#allocation39_spill] sm:$0xff] %v7186_v11  ;;  %8882 = vst [vmem:[#allocation40_spill] sm:$0xff] %v7189_v12  ;;  %v2404_v62 = vpack.c.bf16 %v1416_v36, %v1412_v30  ;;  %v1418_v2 = vmul.f32 %v7180_v59, %v6584_v52  ;;  %v1422_v10 = vmul.f32 %v7180_v59, %v6592_v56 }
  0xb4   : > { %v2401_v1 = vpack.c.bf16 %v1413_v7, %v1409_v63  ;;  %v2403_v47 = vpack.c.bf16 %v1415_v40, %v1411_v18  ;;  %v1420_v34 = vmul.f32 %v7183_v8, %v6588_v54  ;;  %v1424_v21 = vmul.f32 %v7183_v8, %v6596_v58  ;;  %2649 = vmatprep.subr.bf16.mxu0 %v2402_v14 }
  0xb5   : > { %2808 = vmatprep.subr.bf16.mxu1 %v2404_v62  ;;  %v2406_v45 = vpack.c.bf16 %v1422_v10, %v1418_v2  ;;  %v1417_v36 = vmul.f32 %v7186_v11, %v6582_v51  ;;  %v1421_v43 = vmul.f32 %v7186_v11, %v6590_v55  ;;  %v1419_v7 = vmul.f32 %v7189_v12, %v6586_v53 }
  0xb6   : > { %2650 = vmatpush1.bf16.msra.mxu0 %v2401_v1  ;;  %2809 = vmatpush1.bf16.msra.mxu1 %v2403_v47  ;;  %v2408_v19 = vpack.c.bf16 %v1424_v21, %v1420_v34  ;;  %v1423_v63 = vmul.f32 %v7189_v12, %v6594_v57  ;;  %v1021_v14 = vcombine.high %v999_v39, %v999_v39 }
  0xb7   : > { %2651 = vmatprep.subr.bf16.mxu0 %v2406_v45  ;;  %v2405_v40 = vpack.c.bf16 %v1421_v43, %v1417_v36  ;;  %v1023_v18 = vcombine.high %v1013_v6, %v1013_v6  ;;  %v7225_v2 = vrot.slane %v7146_v41, %v6473_v29  ;;  %v7229_v47 = vrot.slane %v7146_v41, %v6479_v31 }
  0xb8   : > { %2810 = vmatprep.subr.bf16.mxu1 %v2408_v19  ;;  %v2407_v62 = vpack.c.bf16 %v1423_v63, %v1419_v7  ;;  %v7233_v34 = vrot.slane %v7146_v41, %v6454_v20  ;;  %v7237_v45 = vrot.slane %v7146_v41, %v6460_v22  ;;  %v7240_v1 = vrot.slane %v1021_v14, %v6473_v29 }
  0xb9   : > { %8883 = vst [vmem:[#allocation41_spill] sm:$0xff] %v7229_v47  ;;  %v7243_v39 = vrot.slane %v1021_v14, %v6479_v31  ;;  %v7246_v6 = vrot.slane %v1021_v14, %v6454_v20  ;;  %v7249_v10 = vrot.slane %v1021_v14, %v6460_v22  ;;  %v7252_v21 = vrot.slane %v1023_v18, %v6473_v29 }
  0xba   : > { %8884 = vst [vmem:[#allocation42_spill] sm:$0xff] %v7233_v34  ;;  %8885 = vst [vmem:[#allocation43_spill] sm:$0xff] %v7237_v45  ;;  %2652 = vmatpush1.bf16.msra.mxu0 %v2405_v40  ;;  %2811 = vmatpush1.bf16.msra.mxu1 %v2407_v62  ;;  %v7255_v30 = vrot.slane %v1023_v18, %v6479_v31  ;;  %v7258_v36 = vrot.slane %v1023_v18, %v6454_v20 }
  0xbb   : > { %8886 = vst [vmem:[#allocation44_spill] sm:$0xff] %v7240_v1  ;;  %8887 = vst [vmem:[#allocation45_spill] sm:$0xff] %v7243_v39  ;;  %v1426_v43 = vmul.f32 %v7240_v1, %v6584_v52  ;;  %v1430_v19 = vmul.f32 %v7240_v1, %v6592_v56  ;;  %v1428_v7 = vmul.f32 %v7243_v39, %v6588_v54 }
  0xbc   : > { %8888 = vst [vmem:[#allocation46_spill] sm:$0xff] %v7246_v6  ;;  %v1432_v63 = vmul.f32 %v7243_v39, %v6596_v58  ;;  %v1425_v40 = vmul.f32 %v7246_v6, %v6582_v51  ;;  %v1429_v14 = vmul.f32 %v7246_v6, %v6590_v55  ;;  %v1427_v62 = vmul.f32 %v7249_v10, %v6586_v53 }
  0xbd   : > { %v1431_v12 = vmul.f32 %v7249_v10, %v6594_v57  ;;  %v2410_v11 = vpack.c.bf16 %v1430_v19, %v1426_v43  ;;  %v1434_v8 = vmul.f32 %v7252_v21, %v6584_v52  ;;  %v1438_v39 = vmul.f32 %v7252_v21, %v6592_v56 }
  0xbe   : > { %v2412_v1 = vpack.c.bf16 %v1432_v63, %v1428_v7  ;;  %v2409_v50 = vpack.c.bf16 %v1429_v14, %v1425_v40  ;;  %v1436_v33 = vmul.f32 %v7255_v30, %v6588_v54  ;;  %v1440_v6 = vmul.f32 %v7255_v30, %v6596_v58 }
  0xbf   : > { %v2411_v59 = vpack.c.bf16 %v1431_v12, %v1427_v62  ;;  %2653 = vmatprep.subr.bf16.mxu0 %v2410_v11  ;;  %v2414_v44 = vpack.c.bf16 %v1438_v39, %v1434_v8  ;;  %v1433_v43 = vmul.f32 %v7258_v36, %v6582_v51  ;;  %v1437_v19 = vmul.f32 %v7258_v36, %v6590_v55 }
  0xc0   : > { %2812 = vmatprep.subr.bf16.mxu1 %v2412_v1  ;;  %2654 = vmatpush1.bf16.msra.mxu0 %v2409_v50  ;;  %v2416_v7 = vpack.c.bf16 %v1440_v6, %v1436_v33  ;;  %v7289_v12 = vrot.slane %v1023_v18, %v6460_v22  ;;  %v1442_v63 = vmul.f32 %v7225_v2, %v6584_v52 }
  0xc1   : > { %2813 = vmatpush1.bf16.msra.mxu1 %v2411_v59  ;;  %2655 = vmatprep.subr.bf16.mxu0 %v2414_v44  ;;  %v2413_v40 = vpack.c.bf16 %v1437_v19, %v1433_v43  ;;  %v1446_v8 = vmul.f32 %v7225_v2, %v6592_v56  ;;  %v1444_v11 = vmul.f32 %v7229_v47, %v6588_v54 }
  0xc2   : > { %8889 = vst [vmem:[#allocation47_spill] sm:$0xff] %v7289_v12  ;;  %v1448_v1 = vmul.f32 %v7229_v47, %v6596_v58  ;;  %2814 = vmatprep.subr.bf16.mxu1 %v2416_v7  ;;  %v1435_v33 = vmul.f32 %v7289_v12, %v6586_v53  ;;  %v1439_v50 = vmul.f32 %v7289_v12, %v6594_v57 }
  0xc3   : > { %v1441_v44 = vmul.f32 %v7233_v34, %v6582_v51  ;;  %v1445_v59 = vmul.f32 %v7233_v34, %v6590_v55  ;;  %v2418_v18 = vpack.c.bf16 %v1446_v8, %v1442_v63  ;;  %v1443_v6 = vmul.f32 %v7237_v45, %v6586_v53 }
  0xc4   : > { %v2420_v39 = vpack.c.bf16 %v1448_v1, %v1444_v11  ;;  %v1447_v14 = vmul.f32 %v7237_v45, %v6594_v57  ;;  %2656 = vmatpush1.bf16.msra.mxu0 %v2413_v40  ;;  %v2415_v62 = vpack.c.bf16 %v1439_v50, %v1435_v33  ;;  %v7313_v19 = vrot.slane %v7149_v38, %v6473_v29 }
  0xc5   : > { %v2417_v43 = vpack.c.bf16 %v1445_v59, %v1441_v44  ;;  %v7317_v7 = vrot.slane %v7149_v38, %v6479_v31  ;;  %2657 = vmatprep.subr.bf16.mxu0 %v2418_v18  ;;  %v7321_v8 = vrot.slane %v7149_v38, %v6454_v20  ;;  %v7325_v11 = vrot.slane %v7149_v38, %v6460_v22 }
  0xc6   : > { %8890 = vst [vmem:[#allocation48_spill] sm:$0xff] %v7313_v19  ;;  %v2419_v63 = vpack.c.bf16 %v1447_v14, %v1443_v6  ;;  %v1022_v40 = vcombine.high %v7146_v41, %v7146_v41  ;;  %2815 = vmatpush1.bf16.msra.mxu1 %v2415_v62  ;;  %v1450_v1 = vmul.f32 %v7313_v19, %v6584_v52 }
  0xc7   : > { %8891 = vst [vmem:[#allocation49_spill] sm:$0xff] %v7317_v7  ;;  %8892 = vst [vmem:[#allocation50_spill] sm:$0xff] %v7321_v8  ;;  %v1454_v33 = vmul.f32 %v7313_v19, %v6592_v56  ;;  %v1452_v50 = vmul.f32 %v7317_v7, %v6588_v54  ;;  %v1456_v44 = vmul.f32 %v7317_v7, %v6596_v58  ;;  %2816 = vmatprep.subr.bf16.mxu1 %v2420_v39 }
  0xc8   : > { %8893 = vst [vmem:[#allocation51_spill] sm:$0xff] %v7325_v11  ;;  %v1449_v59 = vmul.f32 %v7321_v8, %v6582_v51  ;;  %v1453_v41 = vmul.f32 %v7321_v8, %v6590_v55  ;;  %v1451_v18 = vmul.f32 %v7325_v11, %v6586_v53  ;;  %v1455_v6 = vmul.f32 %v7325_v11, %v6594_v57  ;;  %v6226_v11 = vld [vmem:[%s6571_s18] ss:$24 sps:$4 sm:$0xff]  }
  0xc9   : > { %2658 = vmatpush1.bf16.msra.mxu0 %v2417_v43  ;;  %v2422_v14 = vpack.c.bf16 %v1454_v33, %v1450_v1  ;;  %v2424_v62 = vpack.c.bf16 %v1456_v44, %v1452_v50  ;;  %v7346_v45 = vrot.slane %v1022_v40, %v6473_v29  ;;  %v7349_v39 = vrot.slane %v1022_v40, %v6479_v31 }
  0xca   : > { %v2421_v7 = vpack.c.bf16 %v1453_v41, %v1449_v59  ;;  %v2423_v19 = vpack.c.bf16 %v1455_v6, %v1451_v18  ;;  %v7352_v34 = vrot.slane %v1022_v40, %v6454_v20  ;;  %v7355_v8 = vrot.slane %v1022_v40, %v6460_v22  ;;  %2817 = vmatpush1.bf16.msra.mxu1 %v2419_v63 }
  0xcb   : > { %8894 = vst [vmem:[#allocation52_spill] sm:$0xff] %v7346_v45  ;;  %8895 = vst [vmem:[#allocation53_spill] sm:$0xff] %v7349_v39  ;;  %2659 = vmatprep.subr.bf16.mxu0 %v2422_v14  ;;  %v1458_v43 = vmul.f32 %v7346_v45, %v6584_v52  ;;  %v1462_v1 = vmul.f32 %v7346_v45, %v6592_v56  ;;  %v1460_v33 = vmul.f32 %v7349_v39, %v6588_v54 }
  0xcc   : > { %8896 = vst [vmem:[#allocation54_spill] sm:$0xff] %v7352_v34  ;;  %8897 = vst [vmem:[#allocation55_spill] sm:$0xff] %v7355_v8  ;;  %2818 = vmatprep.subr.bf16.mxu1 %v2424_v62  ;;  %v1464_v50 = vmul.f32 %v7349_v39, %v6596_v58  ;;  %v1457_v44 = vmul.f32 %v7352_v34, %v6582_v51  ;;  %v1461_v63 = vmul.f32 %v7352_v34, %v6590_v55 }
  0xcd   : > { %v1459_v40 = vmul.f32 %v7355_v8, %v6586_v53  ;;  %2660 = vmatpush1.bf16.msra.mxu0 %v2421_v7  ;;  %v2426_v59 = vpack.c.bf16 %v1462_v1, %v1458_v43  ;;  %v1463_v41 = vmul.f32 %v7355_v8, %v6594_v57  ;;  %v1024_v18 = vcombine.high %v7149_v38, %v7149_v38 }
  0xce   : > { %v2114_v6 = vmul.f32 %v7153_v5, %v6584_v52  ;;  %v2428_v14 = vpack.c.bf16 %v1464_v50, %v1460_v33  ;;  %v2425_v62 = vpack.c.bf16 %v1461_v63, %v1457_v44  ;;  %v2118_v39 = vmul.f32 %v7153_v5, %v6592_v56  ;;  %2819 = vmatpush1.bf16.msra.mxu1 %v2423_v19 }
  0xcf   : > { %v2116_v34 = vmul.f32 %v7157_v32, %v6588_v54  ;;  %2661 = vmatprep.subr.bf16.mxu0 %v2426_v59  ;;  %v2427_v7 = vpack.c.bf16 %v1463_v41, %v1459_v40  ;;  %v7382_v43 = vrot.slane %v1024_v18, %v6473_v29  ;;  %v7385_v1 = vrot.slane %v1024_v18, %v6479_v31 }
  0xd0   : > { %2820 = vmatprep.subr.bf16.mxu1 %v2428_v14  ;;  %v7388_v38 = vrot.slane %v1024_v18, %v6454_v20  ;;  %v7391_v33 = vrot.slane %v1024_v18, %v6460_v22  ;;  %v2434_v5 = vpack.c.bf16 %v2118_v39, %v2114_v6  ;;  %v2120_v50 = vmul.f32 %v7157_v32, %v6596_v58 }
  0xd1   : > { %8898 = vst [vmem:[#allocation56_spill] sm:$0xff] %v7382_v43  ;;  %8899 = vst [vmem:[#allocation57_spill] sm:$0xff] %v7385_v1  ;;  %2662 = vmatpush1.bf16.msra.mxu0 %v2425_v62  ;;  %v1466_v19 = vmul.f32 %v7382_v43, %v6584_v52  ;;  %v1470_v44 = vmul.f32 %v7382_v43, %v6592_v56  ;;  %v1468_v63 = vmul.f32 %v7385_v1, %v6588_v54 }
  0xd2   : > { %8900 = vst [vmem:[#allocation58_spill] sm:$0xff] %v7388_v38  ;;  %8901 = vst [vmem:[#allocation59_spill] sm:$0xff] %v7391_v33  ;;  %v1472_v40 = vmul.f32 %v7385_v1, %v6596_v58  ;;  %v1465_v39 = vmul.f32 %v7388_v38, %v6582_v51  ;;  %v1469_v32 = vmul.f32 %v7388_v38, %v6590_v55  ;;  %2821 = vmatpush1.bf16.msra.mxu1 %v2427_v7 }
  0xd3   : > { %v1467_v59 = vmul.f32 %v7391_v33, %v6586_v53  ;;  %v1471_v41 = vmul.f32 %v7391_v33, %v6594_v57  ;;  %v2430_v18 = vpack.c.bf16 %v1470_v44, %v1466_v19  ;;  %v2436_v14 = vpack.c.bf16 %v2120_v50, %v2116_v34 }
  0xd4   : > { %v2432_v6 = vpack.c.bf16 %v1472_v40, %v1468_v63  ;;  %v2113_v62 = vmul.f32 %v7161_v4, %v6582_v51  ;;  %v2429_v1 = vpack.c.bf16 %v1469_v32, %v1465_v39  ;;  %v2117_v43 = vmul.f32 %v7161_v4, %v6590_v55 }
  0xd5   : > { %v2431_v8 = vpack.c.bf16 %v1471_v41, %v1467_v59  ;;  %v2115_v38 = vmul.f32 %v7165_v49, %v6586_v53  ;;  %2663 = vmatprep.subr.bf16.mxu0 %v2430_v18  ;;  %v2119_v7 = vmul.f32 %v7165_v49, %v6594_v57  ;;  %v1816_v34 = vrot.slane %v7137_v26, %v6473_v29 }
  0xd6   : > { %2822 = vmatprep.subr.bf16.mxu1 %v2432_v6  ;;  %v1824_v50 = vrot.slane %v7137_v26, %v6479_v31  ;;  %2664 = vmatpush1.bf16.msra.mxu0 %v2429_v1  ;;  %v2433_v19 = vpack.c.bf16 %v2117_v43, %v2113_v62  ;;  %v1812_v4 = vrot.slane %v7137_v26, %v6454_v20 }
  0xd7   : > { %v1820_v44 = vrot.slane %v7137_v26, %v6460_v22  ;;  %v1721_v63 = vcombine.high %v7134_v17, %v7134_v17  ;;  %2823 = vmatpush1.bf16.msra.mxu1 %v2431_v8  ;;  %2686 = vmatprep.subr.bf16.mxu0 %v2434_v5  ;;  %v2435_v49 = vpack.c.bf16 %v2119_v7, %v2115_v38  ;;  %v6229_v5 = vld [vmem:[%s6571_s18 + $0x34] ss:$24 sps:$4 sm:$0xff]  }
  0xd8   : > { %v2122_v40 = vmul.f32 %v1816_v34, %v6584_v52  ;;  %v2126_v39 = vmul.f32 %v1816_v34, %v6592_v56  ;;  %2845 = vmatprep.subr.bf16.mxu1 %v2436_v14  ;;  %v2124_v43 = vmul.f32 %v1824_v50, %v6588_v54  ;;  %v2128_v1 = vmul.f32 %v1824_v50, %v6596_v58 }
  0xd9   : > { %v2121_v32 = vmul.f32 %v1812_v4, %v6582_v51  ;;  %v2125_v59 = vmul.f32 %v1812_v4, %v6590_v55  ;;  %2666 = vmatmul.mubr.bf16.vlgmr.msra.gmra.mrb[0].mxu0 %v6226_v11  ;;  %v2123_v17 = vmul.f32 %v1820_v44, %v6586_v53  ;;  %v2127_v8 = vmul.f32 %v1820_v44, %v6594_v57 }
  0xda   : > { %v2438_v41 = vpack.c.bf16 %v2126_v39, %v2122_v40  ;;  %v1832_v38 = vrot.slane %v1721_v63, %v6473_v29  ;;  %2687 = vmatpush1.bf16.msra.mxu0 %v2433_v19  ;;  %2825 = vmatmul.mubr.bf16.vlgmr.msra.gmra.mrb[0].mxu1 %v6226_v11  ;;  %v2440_v18 = vpack.c.bf16 %v2128_v1, %v2124_v43 }
  0xdb   : > { %v2437_v6 = vpack.c.bf16 %v2125_v59, %v2121_v32  ;;  %v1840_v14 = vrot.slane %v1721_v63, %v6479_v31  ;;  %2846 = vmatpush1.bf16.msra.mxu1 %v2435_v49  ;;  %v2439_v62 = vpack.c.bf16 %v2127_v8, %v2123_v17  ;;  %v1828_v44 = vrot.slane %v1721_v63, %v6454_v20 }
  0xdc   : > { %2688 = vmatprep.subr.bf16.mxu0 %v2438_v41  ;;  %v2130_v7 = vmul.f32 %v1832_v38, %v6584_v52  ;;  %v2134_v34 = vmul.f32 %v1832_v38, %v6592_v56  ;;  %2847 = vmatprep.subr.bf16.mxu1 %v2440_v18  ;;  %v1836_v11 = vrot.slane %v1721_v63, %v6460_v22 }
  0xdd   : > { %v2132_v50 = vmul.f32 %v1840_v14, %v6588_v54  ;;  %v2136_v4 = vmul.f32 %v1840_v14, %v6596_v58  ;;  %v1723_v40 = vcombine.high %v7137_v26, %v7137_v26  ;;  %v8902_v49 = vcombine.low %v7120_v27, %v7125_v60  ;;  %2675 = vmatprep.mubr.bf16.mxu0 %v6229_v5 }
  0xde   : > { %v2442_v19 = vpack.c.bf16 %v2134_v34, %v2130_v7  ;;  %v8903_v43 = vcombine.high %v7120_v27, %v7125_v60  ;;  %2689 = vmatpush1.bf16.msra.mxu0 %v2437_v6  ;;  %v2129_v32 = vmul.f32 %v1828_v44, %v6582_v51  ;;  %v2133_v26 = vmul.f32 %v1828_v44, %v6590_v55  ;;  %v6231_v6 = vld [vmem:[%s6571_s18 + $0x30] ss:$24 sps:$4 sm:$0xff]  }
  0xdf   : > { %v7453_v39 = vrot.slane %v8902_v49, %v6470_v28  ;;  %v2444_v63 = vpack.c.bf16 %v2136_v4, %v2132_v50  ;;  %v2131_v59 = vmul.f32 %v1836_v11, %v6586_v53  ;;  %2848 = vmatpush1.bf16.msra.mxu1 %v2439_v62  ;;  %v2135_v41 = vmul.f32 %v1836_v11, %v6594_v57 }
  0xe0   : > { %v7459_v1 = vrot.slane %v8903_v43, %v6470_v28  ;;  %2690 = vmatprep.subr.bf16.mxu0 %v2442_v19  ;;  %v1848_v17 = vrot.slane %v1723_v40, %v6473_v29  ;;  %v1856_v27 = vrot.slane %v1723_v40, %v6479_v31  ;;  %v2441_v60 = vpack.c.bf16 %v2133_v26, %v2129_v32 }
  0xe1   : > { %2849 = vmatprep.subr.bf16.mxu1 %v2444_v63  ;;  %v1844_v8 = vrot.slane %v1723_v40, %v6454_v20  ;;  %v1852_v38 = vrot.slane %v1723_v40, %v6460_v22  ;;  %v1864_v18 = vrot.slane %v7453_v39, %v6473_v29  ;;  %v2443_v14 = vpack.c.bf16 %v2135_v41, %v2131_v59 }
  0xe2   : > { %v2138_v62 = vmul.f32 %v1848_v17, %v6584_v52  ;;  %v2142_v7 = vmul.f32 %v1848_v17, %v6592_v56  ;;  %v2140_v34 = vmul.f32 %v1856_v27, %v6588_v54  ;;  %2834 = vmatprep.mubr.bf16.mxu1 %v6229_v5  ;;  %2691 = vmatpush1.bf16.msra.mxu0 %v2441_v60  ;;  %v6234_v60 = vld [vmem:[%s6571_s18 + $0xc] ss:$24 sps:$4 sm:$0xff]  }
  0xe3   : > { %v2144_v50 = vmul.f32 %v1856_v27, %v6596_v58  ;;  %v2137_v4 = vmul.f32 %v1844_v8, %v6582_v51  ;;  %v2141_v44 = vmul.f32 %v1844_v8, %v6590_v55  ;;  %v2139_v11 = vmul.f32 %v1852_v38, %v6586_v53  ;;  %2850 = vmatpush1.bf16.msra.mxu1 %v2443_v14 }
  0xe4   : > { %v2446_v19 = vpack.c.bf16 %v2142_v7, %v2138_v62  ;;  %v2143_v40 = vmul.f32 %v1852_v38, %v6594_v57  ;;  %v2146_v49 = vmul.f32 %v1864_v18, %v6584_v52  ;;  %v2150_v43 = vmul.f32 %v1864_v18, %v6592_v56  ;;  %2676 = vmatmul.mubr.bf16.gmra.mrb[4].mxu0 %v6231_v6 }
  0xe5   : > { %v2448_v63 = vpack.c.bf16 %v2144_v50, %v2140_v34  ;;  %v2445_v5 = vpack.c.bf16 %v2141_v44, %v2137_v4  ;;  %v1872_v32 = vrot.slane %v7453_v39, %v6479_v31  ;;  %v1860_v26 = vrot.slane %v7453_v39, %v6454_v20  ;;  %2835 = vmatmul.mubr.bf16.gmra.mrb[4].mxu1 %v6231_v6 }
  0xe6   : > { %2692 = vmatprep.subr.bf16.mxu0 %v2446_v19  ;;  %v2447_v59 = vpack.c.bf16 %v2143_v40, %v2139_v11  ;;  %v2450_v41 = vpack.c.bf16 %v2150_v43, %v2146_v49  ;;  %v1868_v17 = vrot.slane %v7453_v39, %v6460_v22  ;;  %v1880_v27 = vrot.slane %v7459_v1, %v6473_v29 }
  0xe7   : > { %2851 = vmatprep.subr.bf16.mxu1 %v2448_v63  ;;  %2693 = vmatpush1.bf16.msra.mxu0 %v2445_v5  ;;  %v2148_v8 = vmul.f32 %v1872_v32, %v6588_v54  ;;  %v2152_v38 = vmul.f32 %v1872_v32, %v6596_v58  ;;  %v2145_v18 = vmul.f32 %v1860_v26, %v6582_v51 }
  0xe8   : > { %2852 = vmatpush1.bf16.msra.mxu1 %v2447_v59  ;;  %2694 = vmatprep.subr.bf16.mxu0 %v2450_v41  ;;  %v2149_v14 = vmul.f32 %v1860_v26, %v6590_v55  ;;  %v2147_v62 = vmul.f32 %v1868_v17, %v6586_v53  ;;  %v2151_v7 = vmul.f32 %v1868_v17, %v6594_v57 }
  0xe9   : > { %v2452_v34 = vpack.c.bf16 %v2152_v38, %v2148_v8  ;;  %v2154_v50 = vmul.f32 %v1880_v27, %v6584_v52  ;;  %v2158_v4 = vmul.f32 %v1880_v27, %v6592_v56  ;;  %v1888_v44 = vrot.slane %v7459_v1, %v6479_v31  ;;  %2718 = vmatprep.mubr.bf16.mxu0 %v6234_v60 }
  0xea   : > { %v2449_v11 = vpack.c.bf16 %v2149_v14, %v2145_v18  ;;  %v2451_v19 = vpack.c.bf16 %v2151_v7, %v2147_v62  ;;  %v1876_v40 = vrot.slane %v7459_v1, %v6454_v20  ;;  %v1884_v49 = vrot.slane %v7459_v1, %v6460_v22  ;;  %2877 = vmatprep.mubr.bf16.mxu1 %v6234_v60 }
  0xeb   : > { %2853 = vmatprep.subr.bf16.mxu1 %v2452_v34  ;;  %v2454_v43 = vpack.c.bf16 %v2158_v4, %v2154_v50  ;;  %v2156_v63 = vmul.f32 %v1888_v44, %v6588_v54  ;;  %v2160_v5 = vmul.f32 %v1888_v44, %v6596_v58  ;;  %v1722_v32 = vcombine.high %v7453_v39, %v7453_v39 }
  0xec   : > { %2695 = vmatpush1.bf16.msra.mxu0 %v2449_v11  ;;  %2854 = vmatpush1.bf16.msra.mxu1 %v2451_v19  ;;  %v2153_v6 = vmul.f32 %v1876_v40, %v6582_v51  ;;  %v2157_v26 = vmul.f32 %v1876_v40, %v6590_v55  ;;  %v2155_v59 = vmul.f32 %v1884_v49, %v6586_v53 }
  0xed   : > { %2696 = vmatprep.subr.bf16.mxu0 %v2454_v43  ;;  %v2456_v41 = vpack.c.bf16 %v2160_v5, %v2156_v63  ;;  %v2159_v17 = vmul.f32 %v1884_v49, %v6594_v57  ;;  %v1896_v27 = vrot.slane %v1722_v32, %v6473_v29  ;;  %v1904_v8 = vrot.slane %v1722_v32, %v6479_v31 }
  0xee   : > { %v2453_v38 = vpack.c.bf16 %v2157_v26, %v2153_v6  ;;  %v1892_v18 = vrot.slane %v1722_v32, %v6454_v20  ;;  %v1900_v39 = vrot.slane %v1722_v32, %v6460_v22  ;;  %v1724_v14 = vcombine.high %v7459_v1, %v7459_v1 }
  0xef   : > { %2855 = vmatprep.subr.bf16.mxu1 %v2456_v41  ;;  %v2455_v62 = vpack.c.bf16 %v2159_v17, %v2155_v59  ;;  %v2162_v7 = vmul.f32 %v1896_v27, %v6584_v52  ;;  %v2166_v34 = vmul.f32 %v1896_v27, %v6592_v56  ;;  %v2164_v50 = vmul.f32 %v1904_v8, %v6588_v54 }
  0xf0   : > { %2697 = vmatpush1.bf16.msra.mxu0 %v2453_v38  ;;  %v2168_v4 = vmul.f32 %v1904_v8, %v6596_v58  ;;  %v2161_v44 = vmul.f32 %v1892_v18, %v6582_v51  ;;  %v2165_v11 = vmul.f32 %v1892_v18, %v6590_v55  ;;  %v2163_v19 = vmul.f32 %v1900_v39, %v6586_v53 }
  0xf1   : > { %2856 = vmatpush1.bf16.msra.mxu1 %v2455_v62  ;;  %v2458_v1 = vpack.c.bf16 %v2166_v34, %v2162_v7  ;;  %v2167_v60 = vmul.f32 %v1900_v39, %v6594_v57  ;;  %v1912_v40 = vrot.slane %v1724_v14, %v6473_v29  ;;  %v1920_v49 = vrot.slane %v1724_v14, %v6479_v31 }
  0xf2   : > { %v2460_v43 = vpack.c.bf16 %v2168_v4, %v2164_v50  ;;  %v2457_v63 = vpack.c.bf16 %v2165_v11, %v2161_v44  ;;  %v1908_v5 = vrot.slane %v1724_v14, %v6454_v20  ;;  %v1916_v32 = vrot.slane %v1724_v14, %v6460_v22 }
  0xf3   : > { %2698 = vmatprep.subr.bf16.mxu0 %v2458_v1  ;;  %v2459_v6 = vpack.c.bf16 %v2167_v60, %v2163_v19  ;;  %v2170_v26 = vmul.f32 %v1912_v40, %v6584_v52  ;;  %v2174_v59 = vmul.f32 %v1912_v40, %v6592_v56  ;;  %v2172_v41 = vmul.f32 %v1920_v49, %v6588_v54  ;;  %v7559_v40 = vld [vmem:[%s8685_s2] sm:$0xff] }
  0xf4   : > { %2857 = vmatprep.subr.bf16.mxu1 %v2460_v43  ;;  %2699 = vmatpush1.bf16.msra.mxu0 %v2457_v63  ;;  %v2176_v17 = vmul.f32 %v1920_v49, %v6596_v58  ;;  %v2169_v27 = vmul.f32 %v1908_v5, %v6582_v51  ;;  %v2173_v8 = vmul.f32 %v1908_v5, %v6590_v55  ;;  %v8805_v11 = vmov 1  }
  0xf5   : > { %2858 = vmatpush1.bf16.msra.mxu1 %v2459_v6  ;;  %v2462_v38 = vpack.c.bf16 %v2174_v59, %v2170_v26  ;;  %v2171_v18 = vmul.f32 %v1916_v32, %v6586_v53  ;;  %v2175_v39 = vmul.f32 %v1916_v32, %v6594_v57  ;;  %v8904_v14 = vcombine.low %v6845_v9, %v6847_v42  ;;  %v8907_v59 = vld [vmem:[#allocation11_spill] sm:$0xff] }
  0xf6   : > { %v2464_v7 = vpack.c.bf16 %v2176_v17, %v2172_v41  ;;  %v2461_v34 = vpack.c.bf16 %v2173_v8, %v2169_v27  ;;  %v8905_v50 = vcombine.low %v6849_v13, %v6851_v48  ;;  %v1728_v44 = vcombine.high %v6849_v13, %v6851_v48  ;;  %6218 = vset.pattern.permute.xlu1 %v8805_v11  ;;  %v7574_v17 = vld [vmem:[%s8685_s2 + $0x8] sm:$0xff] }
  0xf7   : > { %v1735_v62 = vrot.slane %v8904_v14, %v6470_v28  ;;  %2700 = vmatprep.subr.bf16.mxu0 %v2462_v38  ;;  %v2463_v19 = vpack.c.bf16 %v2175_v39, %v2171_v18  ;;  %v8906_v1 = vcombine.high %v6845_v9, %v6847_v42  ;;  %3030 = vperm.xlu1 %6218, %v7559_v40   ;;  %v8806_v27 = vmov 2  }
  0xf8   : > { %v1749_v4 = vrot.slane %v8905_v50, %v6470_v28  ;;  %2859 = vmatprep.subr.bf16.mxu1 %v2464_v7  ;;  %2701 = vmatpush1.bf16.msra.mxu0 %v2461_v34  ;;  %v1756_v63 = vrot.slane %v1728_v44, %v6470_v28  ;;  %v7569_v41 = vmul.f32 %v6839_v35, %v8907_v59 }
  0xf9   : > { %v7554_v60 = vrot.slane %v8906_v1, %v6470_v28  ;;  %2860 = vmatpush1.bf16.msra.mxu1 %v2463_v19  ;;  %6219 = vset.pattern.permute.xlu0 %v8806_v27 }
  0xfa   : > { %v1757_v49 = vcombine.low %v1735_v62, %v1749_v4  ;;  %v1758_v43 = vcombine.high %v1735_v62, %v1749_v4  ;;  %3114 = vperm.xlu0 %6219, %v7559_v40  }
  0xfb   : > { %v1759_v6 = vcombine.low %v7554_v60, %v1756_v63  ;;  %v1760_v26 = vcombine.high %v7554_v60, %v1756_v63  ;;  %3034 = vperm.xlu1 %6218, %v7574_v17   ;;  %v7598_v63 = vld [vmem:[%s8685_s2 + $0x10] sm:$0xff] }
  0xfc   : > { %v1767_v5 = vrot.slane %v1757_v49, %v6470_v28  ;;  %v1781_v32 = vrot.slane %v1758_v43, %v6470_v28 }
  0xfe   : > { %v1928_v8 = vrot.slane %v1767_v5, %v6473_v29  ;;  %v1936_v38 = vrot.slane %v1767_v5, %v6479_v31  ;;  %v1924_v18 = vrot.slane %v1767_v5, %v6454_v20  ;;  %v1932_v39 = vrot.slane %v1767_v5, %v6460_v22  ;;  %3122 = vperm.xlu0 %6219, %v7598_v63  }
  0xff   : > { %v1944_v14 = vrot.slane %v1781_v32, %v6473_v29  ;;  %v1952_v62 = vrot.slane %v1781_v32, %v6479_v31  ;;  %v1940_v7 = vrot.slane %v1781_v32, %v6454_v20  ;;  %v1948_v34 = vrot.slane %v1781_v32, %v6460_v22 }
 0x100   : > { %v2178_v50 = vmul.f32 %v1928_v8, %v6584_v52  ;;  %v2182_v4 = vmul.f32 %v1928_v8, %v6592_v56  ;;  %v2180_v44 = vmul.f32 %v1936_v38, %v6588_v54  ;;  %v2184_v19 = vmul.f32 %v1936_v38, %v6596_v58 }
 0x101   : > { %v2177_v1 = vmul.f32 %v1924_v18, %v6582_v51  ;;  %v2181_v60 = vmul.f32 %v1924_v18, %v6590_v55  ;;  %v2179_v49 = vmul.f32 %v1932_v39, %v6586_v53  ;;  %v2183_v43 = vmul.f32 %v1932_v39, %v6594_v57 }
 0x102   : > { %v2466_v8 = vpack.c.bf16 %v2182_v4, %v2178_v50  ;;  %v2468_v11 = vpack.c.bf16 %v2184_v19, %v2180_v44  ;;  %v2186_v27 = vmul.f32 %v1944_v14, %v6584_v52  ;;  %v2190_v38 = vmul.f32 %v1944_v14, %v6592_v56 }
 0x103   : > { %v2465_v33 = vpack.c.bf16 %v2181_v60, %v2177_v1  ;;  %v2467_v45 = vpack.c.bf16 %v2183_v43, %v2179_v49  ;;  %v2188_v18 = vmul.f32 %v1952_v62, %v6588_v54  ;;  %v2192_v47 = vmul.f32 %v1952_v62, %v6596_v58 }
 0x104   : > { %2702 = vmatprep.subr.bf16.mxu0 %v2466_v8  ;;  %2861 = vmatprep.subr.bf16.mxu1 %v2468_v11  ;;  %v2470_v39 = vpack.c.bf16 %v2190_v38, %v2186_v27  ;;  %v2185_v12 = vmul.f32 %v1940_v7, %v6582_v51  ;;  %v2189_v50 = vmul.f32 %v1940_v7, %v6590_v55  ;;  %v8909_v7 = vmov 2  }
 0x105   : > { %2703 = vmatpush1.bf16.msra.mxu0 %v2465_v33  ;;  %2862 = vmatpush1.bf16.msra.mxu1 %v2467_v45  ;;  %v2472_v4 = vpack.c.bf16 %v2192_v47, %v2188_v18  ;;  %v2187_v14 = vmul.f32 %v1948_v34, %v6586_v53  ;;  %v2191_v44 = vmul.f32 %v1948_v34, %v6594_v57  ;;  %v8908_v47 = vld [vmem:[#allocation12_spill] sm:$0xff] }
 0x106   : > { %2704 = vmatprep.subr.bf16.mxu0 %v2470_v39  ;;  %v2469_v19 = vpack.c.bf16 %v2189_v50, %v2185_v12  ;;  %v1789_v1 = vcombine.high %v1767_v5, %v1767_v5  ;;  %v1791_v60 = vcombine.high %v1781_v32, %v1781_v32  ;;  %v7611_v62 = vmul.f32 %v6847_v42, %v8907_v59 }
 0x107   : > { %2863 = vmatprep.subr.bf16.mxu1 %v2472_v4  ;;  %v2471_v11 = vpack.c.bf16 %v2191_v44, %v2187_v14  ;;  %v7614_v27 = vrot.slane %v1759_v6, %v6470_v28  ;;  %v7617_v45 = vrot.slane %v1760_v26, %v6470_v28  ;;  %v7621_v33 = vmul.f32 %v6843_v0, %v8908_v47 }
 0x108   : > { %v1960_v12 = vrot.slane %v1789_v1, %v6473_v29  ;;  %v1968_v5 = vrot.slane %v1789_v1, %v6479_v31  ;;  %v1956_v32 = vrot.slane %v1789_v1, %v6454_v20  ;;  %v1964_v59 = vrot.slane %v1789_v1, %v6460_v22  ;;  %6220 = vset.pattern.permute.xlu1 %v8909_v7 }
 0x109   : > { %2705 = vmatpush1.bf16.msra.mxu0 %v2469_v19  ;;  %2864 = vmatpush1.bf16.msra.mxu1 %v2471_v11  ;;  %v1976_v6 = vrot.slane %v1791_v60, %v6473_v29  ;;  %v1984_v28 = vrot.slane %v1791_v60, %v6479_v31  ;;  %v1972_v26 = vrot.slane %v1791_v60, %v6454_v20  ;;  %v6308_v4 = vmov 0  }
 0x10a   : > { %v2194_v34 = vmul.f32 %v1960_v12, %v6584_v52  ;;  %v2198_v49 = vmul.f32 %v1960_v12, %v6592_v56  ;;  %v2196_v43 = vmul.f32 %v1968_v5, %v6588_v54  ;;  %v2200_v8 = vmul.f32 %v1968_v5, %v6596_v58  ;;  %3118 = vperm.xlu1 %6220, %v7574_v17  }
 0x10b   : > { %v2193_v38 = vmul.f32 %v1956_v32, %v6582_v51  ;;  %v2197_v18 = vmul.f32 %v1956_v32, %v6590_v55  ;;  %v2195_v39 = vmul.f32 %v1964_v59, %v6586_v53  ;;  %v2199_v50 = vmul.f32 %v1964_v59, %v6594_v57  ;;  %6223 = vset.pattern.permute.xlu0 %v6308_v4 }
 0x10c   : > { %v2474_v14 = vpack.c.bf16 %v2198_v49, %v2194_v34  ;;  %v2476_v44 = vpack.c.bf16 %v2200_v8, %v2196_v43  ;;  %v2202_v19 = vmul.f32 %v1976_v6, %v6584_v52  ;;  %v2206_v1 = vmul.f32 %v1976_v6, %v6592_v56  ;;  %2957 = vperm.xlu0 %6223, %v7559_v40  }
 0x10d   : > { %v2473_v11 = vpack.c.bf16 %v2197_v18, %v2193_v38  ;;  %v2475_v12 = vpack.c.bf16 %v2199_v50, %v2195_v39  ;;  %v2204_v5 = vmul.f32 %v1984_v28, %v6588_v54  ;;  %v2208_v32 = vmul.f32 %v1984_v28, %v6596_v58 }
 0x10e   : > { %2706 = vmatprep.subr.bf16.mxu0 %v2474_v14  ;;  %2865 = vmatprep.subr.bf16.mxu1 %v2476_v44  ;;  %v2478_v59 = vpack.c.bf16 %v2206_v1, %v2202_v19  ;;  %v2201_v7 = vmul.f32 %v1972_v26, %v6582_v51  ;;  %v2205_v34 = vmul.f32 %v1972_v26, %v6590_v55 }
 0x10f   : > { %2707 = vmatpush1.bf16.msra.mxu0 %v2473_v11  ;;  %2866 = vmatpush1.bf16.msra.mxu1 %v2475_v12  ;;  %v2480_v49 = vpack.c.bf16 %v2208_v32, %v2204_v5  ;;  %v1980_v6 = vrot.slane %v1791_v60, %v6460_v22  ;;  %v1992_v40 = vrot.slane %v7614_v27, %v6473_v29 }
 0x110   : > { %2708 = vmatprep.subr.bf16.mxu0 %v2478_v59  ;;  %v2477_v43 = vpack.c.bf16 %v2205_v34, %v2201_v7  ;;  %v2000_v28 = vrot.slane %v7614_v27, %v6479_v31  ;;  %v1988_v8 = vrot.slane %v7614_v27, %v6454_v20  ;;  %v1996_v38 = vrot.slane %v7614_v27, %v6460_v22 }
 0x111   : > { %2867 = vmatprep.subr.bf16.mxu1 %v2480_v49  ;;  %v2203_v26 = vmul.f32 %v1980_v6, %v6586_v53  ;;  %v2207_v18 = vmul.f32 %v1980_v6, %v6594_v57  ;;  %v2210_v60 = vmul.f32 %v1992_v40, %v6584_v52  ;;  %v2214_v39 = vmul.f32 %v1992_v40, %v6592_v56 }
 0x112   : > { %v2212_v7 = vmul.f32 %v2000_v28, %v6588_v54  ;;  %v2216_v50 = vmul.f32 %v2000_v28, %v6596_v58  ;;  %v2209_v14 = vmul.f32 %v1988_v8, %v6582_v51  ;;  %v2213_v44 = vmul.f32 %v1988_v8, %v6590_v55  ;;  %6221 = vset.pattern.permute.xlu1 %v6308_v4 }
 0x113   : > { %2709 = vmatpush1.bf16.msra.mxu0 %v2477_v43  ;;  %v2479_v19 = vpack.c.bf16 %v2207_v18, %v2203_v26  ;;  %v2482_v1 = vpack.c.bf16 %v2214_v39, %v2210_v60  ;;  %v2211_v11 = vmul.f32 %v1996_v38, %v6586_v53  ;;  %v2215_v12 = vmul.f32 %v1996_v38, %v6594_v57 }
 0x114   : > { %v2484_v5 = vpack.c.bf16 %v2216_v50, %v2212_v7  ;;  %v2481_v32 = vpack.c.bf16 %v2213_v44, %v2209_v14  ;;  %v2008_v59 = vrot.slane %v7617_v45, %v6473_v29  ;;  %v2016_v34 = vrot.slane %v7617_v45, %v6479_v31  ;;  %2967 = vperm.xlu1 %6221, %v7598_v63  }
 0x115   : > { %2868 = vmatpush1.bf16.msra.mxu1 %v2479_v19  ;;  %2710 = vmatprep.subr.bf16.mxu0 %v2482_v1  ;;  %v2483_v49 = vpack.c.bf16 %v2215_v12, %v2211_v11  ;;  %v2004_v6 = vrot.slane %v7617_v45, %v6454_v20  ;;  %v2012_v40 = vrot.slane %v7617_v45, %v6460_v22  ;;  %v8910_v19 = vmov 1  }
 0x116   : > { %2869 = vmatprep.subr.bf16.mxu1 %v2484_v5  ;;  %v2218_v43 = vmul.f32 %v2008_v59, %v6584_v52  ;;  %v2222_v28 = vmul.f32 %v2008_v59, %v6592_v56  ;;  %v2220_v8 = vmul.f32 %v2016_v34, %v6588_v54  ;;  %v2224_v38 = vmul.f32 %v2016_v34, %v6596_v58 }
 0x117   : > { %2711 = vmatpush1.bf16.msra.mxu0 %v2481_v32  ;;  %v2217_v26 = vmul.f32 %v2004_v6, %v6582_v51  ;;  %v2221_v18 = vmul.f32 %v2004_v6, %v6590_v55  ;;  %v2219_v60 = vmul.f32 %v2012_v40, %v6586_v53  ;;  %v2223_v39 = vmul.f32 %v2012_v40, %v6594_v57 }
 0x118   : > { %v2486_v7 = vpack.c.bf16 %v2222_v28, %v2218_v43  ;;  %v2488_v50 = vpack.c.bf16 %v2224_v38, %v2220_v8  ;;  %v1790_v14 = vcombine.high %v7614_v27, %v7614_v27  ;;  %v1792_v44 = vcombine.high %v7617_v45, %v7617_v45  ;;  %6222 = vset.pattern.permute.xlu1 %v8910_v19 }
 0x119   : > { %2870 = vmatpush1.bf16.msra.mxu1 %v2483_v49  ;;  %v2485_v1 = vpack.c.bf16 %v2221_v18, %v2217_v26  ;;  %v2487_v11 = vpack.c.bf16 %v2223_v39, %v2219_v60  ;;  %v7692_v12 = vmul.f32 %v6851_v48, %v8908_v47  ;;  %v7696_v5 = vmul.f32 %v8874_v46, %v6809_v23 }
 0x11a   : > { %2712 = vmatprep.subr.bf16.mxu0 %v2486_v7  ;;  %2871 = vmatprep.subr.bf16.mxu1 %v2488_v50  ;;  %v2024_v27 = vrot.slane %v1790_v14, %v6473_v29  ;;  %v2032_v32 = vrot.slane %v1790_v14, %v6479_v31  ;;  %v2020_v45 = vrot.slane %v1790_v14, %v6454_v20 }
 0x11b   : > { %2713 = vmatpush1.bf16.msra.mxu0 %v2485_v1  ;;  %v2028_v59 = vrot.slane %v1790_v14, %v6460_v22  ;;  %v2040_v34 = vrot.slane %v1792_v44, %v6473_v29  ;;  %v2048_v47 = vrot.slane %v1792_v44, %v6479_v31  ;;  %v2036_v49 = vrot.slane %v1792_v44, %v6454_v20 }
 0x11c   : > { %v2226_v6 = vmul.f32 %v2024_v27, %v6584_v52  ;;  %v2230_v40 = vmul.f32 %v2024_v27, %v6592_v56  ;;  %v2228_v43 = vmul.f32 %v2032_v32, %v6588_v54  ;;  %v2232_v28 = vmul.f32 %v2032_v32, %v6596_v58  ;;  %3038 = vperm.xlu1 %6222, %v7598_v63  }
 0x11d   : > { %2872 = vmatpush1.bf16.msra.mxu1 %v2487_v11  ;;  %v2225_v8 = vmul.f32 %v2020_v45, %v6582_v51  ;;  %v2229_v38 = vmul.f32 %v2020_v45, %v6590_v55  ;;  %v2227_v26 = vmul.f32 %v2028_v59, %v6586_v53  ;;  %v2231_v31 = vmul.f32 %v2028_v59, %v6594_v57  ;;  %v6232_v59 = vld [vmem:[%s6571_s18 + $0x8] ss:$24 sps:$4 sm:$0xff]  }
 0x11e   : > { %v2490_v18 = vpack.c.bf16 %v2230_v40, %v2226_v6  ;;  %v2492_v60 = vpack.c.bf16 %v2232_v28, %v2228_v43  ;;  %v2234_v39 = vmul.f32 %v2040_v34, %v6584_v52  ;;  %v2238_v7 = vmul.f32 %v2040_v34, %v6592_v56  ;;  %2962 = vperm.xlu0 %6223, %v7574_v17   ;;  %v8913_v40 = vld [vmem:[#allocation14_spill] sm:$0xff] }
 0x11f   : > { %v2489_v50 = vpack.c.bf16 %v2229_v38, %v2225_v8  ;;  %v2491_v14 = vpack.c.bf16 %v2231_v31, %v2227_v26  ;;  %v2236_v63 = vmul.f32 %v2048_v47, %v6588_v54  ;;  %v2240_v19 = vmul.f32 %v2048_v47, %v6596_v58  ;;  %v8912_v47 = vld [vmem:[#allocation17_spill] sm:$0xff]  ;;  %v8914_v28 = vld [vmem:[#allocation18_spill] sm:$0xff]  ;;  %v8915_v26 = vld [vmem:[#allocation15_spill] sm:$0xff] }
 0x120   : > { %2714 = vmatprep.subr.bf16.mxu0 %v2490_v18  ;;  %2873 = vmatprep.subr.bf16.mxu1 %v2492_v60  ;;  %v2494_v1 = vpack.c.bf16 %v2238_v7, %v2234_v39  ;;  %v2233_v11 = vmul.f32 %v2036_v49, %v6582_v51  ;;  %v2237_v27 = vmul.f32 %v2036_v49, %v6590_v55 }
 0x121   : > { %2715 = vmatpush1.bf16.msra.mxu0 %v2489_v50  ;;  %2874 = vmatpush1.bf16.msra.mxu1 %v2491_v14  ;;  %v2496_v52 = vpack.c.bf16 %v2240_v19, %v2236_v63  ;;  %v2044_v56 = vrot.slane %v1792_v44, %v6460_v22  ;;  %v2245_v17 = vmul.f32 %v6845_v9, %v6809_v23 }
 0x122   : > { %2716 = vmatprep.subr.bf16.mxu0 %v2494_v1  ;;  %v2493_v54 = vpack.c.bf16 %v2237_v27, %v2233_v11  ;;  %v2498_v58 = vpack.c.bf16 %v7611_v62, %v7569_v41  ;;  %v2250_v32 = vmul.f32 %v6839_v35, %v6883_v3  ;;  %v2254_v51 = vmul.f32 %v6847_v42, %v6883_v3  ;;  %v8911_v62 = vld [vmem:[#allocation16_spill] sm:$0xff] }
 0x123   : > { %2875 = vmatprep.subr.bf16.mxu1 %v2496_v52  ;;  %v2235_v55 = vmul.f32 %v2044_v56, %v6586_v53  ;;  %v2239_v45 = vmul.f32 %v2044_v56, %v6594_v57  ;;  %v2243_v44 = vmul.f32 %v6841_v25, %v6812_v37  ;;  %v2247_v23 = vmul.f32 %v6849_v13, %v6812_v37 }
 0x124   : > { %v2500_v41 = vpack.c.bf16 %v7692_v12, %v7621_v33  ;;  %v2252_v34 = vmul.f32 %v6843_v0, %v8911_v62  ;;  %v2256_v3 = vmul.f32 %v6851_v48, %v8911_v62  ;;  %v2497_v57 = vpack.c.bf16 %v2245_v17, %v7696_v5  ;;  %v8916_v17 = vld [vmem:[#allocation19_spill] sm:$0xff] }
 0x125   : > { %2717 = vmatpush1.bf16.msra.mxu0 %v2493_v54  ;;  %v2495_v53 = vpack.c.bf16 %v2239_v45, %v2235_v55  ;;  %v2249_v49 = vmul.f32 %v8874_v46, %v8912_v47  ;;  %v2253_v37 = vmul.f32 %v6845_v9, %v8912_v47  ;;  %v2502_v6 = vpack.c.bf16 %v2254_v51, %v2250_v32  ;;  %v8917_v32 = vld [vmem:[#allocation21_spill] sm:$0xff]  ;;  %v8918_v45 = vld [vmem:[#allocation20_spill] sm:$0xff] }
 0x126   : > { %2739 = vmatprep.subr.bf16.mxu0 %v2498_v58  ;;  %v2258_v33 = vmul.f32 %v6839_v35, %v8913_v40  ;;  %v2262_v12 = vmul.f32 %v6847_v42, %v8913_v40  ;;  %v2499_v43 = vpack.c.bf16 %v2247_v23, %v2243_v44  ;;  %v2251_v8 = vmul.f32 %v6841_v25, %v8914_v28 }
 0x127   : > { %2876 = vmatpush1.bf16.msra.mxu1 %v2495_v53  ;;  %v2255_v5 = vmul.f32 %v6849_v13, %v8914_v28  ;;  %v2504_v38 = vpack.c.bf16 %v2256_v3, %v2252_v34  ;;  %v2260_v31 = vmul.f32 %v6843_v0, %v8915_v26  ;;  %v2264_v18 = vmul.f32 %v6851_v48, %v8915_v26  ;;  %v8920_v3 = vld [vmem:[#allocation23_spill] sm:$0xff] }
 0x128   : > { %2898 = vmatprep.subr.bf16.mxu1 %v2500_v41  ;;  %2719 = vmatmul.mubr.bf16.vlgmr.msra.gmra.mrb[0].mxu0 %v6232_v59  ;;  %v2501_v60 = vpack.c.bf16 %v2253_v37, %v2249_v49  ;;  %v2257_v39 = vmul.f32 %v8874_v46, %v6875_v15  ;;  %v2261_v7 = vmul.f32 %v6845_v9, %v6875_v15  ;;  %v8921_v49 = vld [vmem:[#allocation25_spill] sm:$0xff] }
 0x129   : > { %2740 = vmatpush1.bf16.msra.mxu0 %v2497_v57  ;;  %v2506_v50 = vpack.c.bf16 %v2262_v12, %v2258_v33  ;;  %v2266_v14 = vmul.f32 %v6839_v35, %v6927_v61  ;;  %v2270_v63 = vmul.f32 %v6847_v42, %v6927_v61  ;;  %v2503_v19 = vpack.c.bf16 %v2255_v5, %v2251_v8  ;;  %v8922_v33 = vld [vmem:[#allocation24_spill] sm:$0xff]  ;;  %v8923_v8 = vld [vmem:[#allocation26_spill] sm:$0xff] }
 0x12a   : > { %2878 = vmatmul.mubr.bf16.vlgmr.msra.gmra.mrb[0].mxu1 %v6232_v59  ;;  %2741 = vmatprep.subr.bf16.mxu0 %v2502_v6  ;;  %v2259_v1 = vmul.f32 %v6841_v25, %v6878_v16  ;;  %v2263_v11 = vmul.f32 %v6849_v13, %v6878_v16  ;;  %v2508_v27 = vpack.c.bf16 %v2264_v18, %v2260_v31  ;;  %v8919_v59 = vld [vmem:[#allocation22_spill] sm:$0xff]  ;;  %v8924_v31 = vld [vmem:[#allocation27_spill] sm:$0xff] }
 0x12b   : > { %2899 = vmatpush1.bf16.msra.mxu1 %v2499_v43  ;;  %v2268_v15 = vmul.f32 %v6843_v0, %v6930_v24  ;;  %v2272_v52 = vmul.f32 %v6851_v48, %v6930_v24  ;;  %v2505_v56 = vpack.c.bf16 %v2261_v7, %v2257_v39  ;;  %v2265_v61 = vmul.f32 %v8874_v46, %v8916_v17  ;;  %v8925_v7 = vld [vmem:[#allocation29_spill] sm:$0xff] }
 0x12c   : > { %2900 = vmatprep.subr.bf16.mxu1 %v2504_v38  ;;  %v2269_v54 = vmul.f32 %v6845_v9, %v8916_v17  ;;  %v2510_v58 = vpack.c.bf16 %v2270_v63, %v2266_v14  ;;  %v2274_v16 = vmul.f32 %v6839_v35, %v8917_v32  ;;  %v2278_v51 = vmul.f32 %v6847_v42, %v8917_v32 }
 0x12d   : > { %2742 = vmatpush1.bf16.msra.mxu0 %v2501_v60  ;;  %v2507_v55 = vpack.c.bf16 %v2263_v11, %v2259_v1  ;;  %v2267_v24 = vmul.f32 %v6841_v25, %v8918_v45  ;;  %v2271_v44 = vmul.f32 %v6849_v13, %v8918_v45  ;;  %v2512_v23 = vpack.c.bf16 %v2272_v52, %v2268_v15  ;;  %v8927_v15 = vld [vmem:[#allocation30_spill] sm:$0xff] }
 0x12e   : > { %2743 = vmatprep.subr.bf16.mxu0 %v2506_v50  ;;  %v2276_v41 = vmul.f32 %v6843_v0, %v8919_v59  ;;  %v2280_v62 = vmul.f32 %v6851_v48, %v8919_v59  ;;  %v2509_v34 = vpack.c.bf16 %v2269_v54, %v2265_v61  ;;  %v2273_v53 = vmul.f32 %v8874_v46, %v8920_v3  ;;  %v8928_v61 = vld [vmem:[#allocation31_spill] sm:$0xff] }
 0x12f   : > { %2901 = vmatpush1.bf16.msra.mxu1 %v2503_v19  ;;  %v2277_v57 = vmul.f32 %v6845_v9, %v8920_v3  ;;  %v2514_v47 = vpack.c.bf16 %v2278_v51, %v2274_v16  ;;  %v2282_v37 = vmul.f32 %v6839_v35, %v8921_v49  ;;  %v2286_v6 = vmul.f32 %v6847_v42, %v8921_v49  ;;  %v8926_v19 = vld [vmem:[#allocation28_spill] sm:$0xff]  ;;  %v8929_v16 = vld [vmem:[#allocation33_spill] sm:$0xff] }
 0x130   : > { %2902 = vmatprep.subr.bf16.mxu1 %v2508_v27  ;;  %v2511_v40 = vpack.c.bf16 %v2271_v44, %v2267_v24  ;;  %v2275_v12 = vmul.f32 %v6841_v25, %v8922_v33  ;;  %v2279_v43 = vmul.f32 %v6849_v13, %v8922_v33  ;;  %v2516_v28 = vpack.c.bf16 %v2280_v62, %v2276_v41  ;;  %v8930_v24 = vld [vmem:[#allocation32_spill] sm:$0xff]  ;;  %v8931_v41 = vld [vmem:[#allocation34_spill] sm:$0xff] }
 0x131   : > { %2744 = vmatpush1.bf16.msra.mxu0 %v2505_v56  ;;  %v2284_v5 = vmul.f32 %v6843_v0, %v8923_v8  ;;  %v2288_v38 = vmul.f32 %v6851_v48, %v8923_v8  ;;  %v2513_v26 = vpack.c.bf16 %v2277_v57, %v2273_v53  ;;  %v2281_v18 = vmul.f32 %v8874_v46, %v8924_v31  ;;  %v8932_v53 = vld [vmem:[#allocation35_spill] sm:$0xff] }
 0x132   : > { %2745 = vmatprep.subr.bf16.mxu0 %v2510_v58  ;;  %v2285_v60 = vmul.f32 %v6845_v9, %v8924_v31  ;;  %v2518_v39 = vpack.c.bf16 %v2286_v6, %v2282_v37  ;;  %v2290_v50 = vmul.f32 %v6839_v35, %v8925_v7  ;;  %v2294_v14 = vmul.f32 %v6847_v42, %v8925_v7  ;;  %v8933_v37 = vld [vmem:[#allocation8_spill] sm:$0xff] }
 0x133   : > { %2903 = vmatpush1.bf16.msra.mxu1 %v2507_v55  ;;  %v2515_v63 = vpack.c.bf16 %v2279_v43, %v2275_v12  ;;  %v2283_v1 = vmul.f32 %v6841_v25, %v8926_v19  ;;  %v2287_v11 = vmul.f32 %v6849_v13, %v8926_v19  ;;  %v2520_v27 = vpack.c.bf16 %v2288_v38, %v2284_v5  ;;  %v8934_v12 = vld [vmem:[#allocation36_spill] sm:$0xff]  ;;  %v8935_v5 = vld [vmem:[#allocation9_spill] sm:$0xff] }
 0x134   : > { %2904 = vmatprep.subr.bf16.mxu1 %v2512_v23  ;;  %v2292_v52 = vmul.f32 %v6843_v0, %v8927_v15  ;;  %v2296_v56 = vmul.f32 %v6851_v48, %v8927_v15  ;;  %v2517_v17 = vpack.c.bf16 %v2285_v60, %v2281_v18  ;;  %v2289_v54 = vmul.f32 %v8874_v46, %v8928_v61  ;;  %v8936_v18 = vld [vmem:[#allocation10_spill] sm:$0xff] }
 0x135   : > { %2746 = vmatpush1.bf16.msra.mxu0 %v2509_v34  ;;  %v2293_v58 = vmul.f32 %v6845_v9, %v8928_v61  ;;  %v2522_v32 = vpack.c.bf16 %v2294_v14, %v2290_v50  ;;  %v2298_v51 = vmul.f32 %v6839_v35, %v8929_v16  ;;  %v2302_v55 = vmul.f32 %v6847_v42, %v8929_v16  ;;  %v8937_v50 = vld [vmem:[#allocation37_spill] sm:$0xff]  ;;  %v6235_v16 = vld [vmem:[%s6571_s18 + $0x3c] ss:$24 sps:$4 sm:$0xff]  }
 0x136   : > { %2747 = vmatprep.subr.bf16.mxu0 %v2514_v47  ;;  %v2519_v45 = vpack.c.bf16 %v2287_v11, %v2283_v1  ;;  %v2291_v44 = vmul.f32 %v6841_v25, %v8930_v24  ;;  %v2295_v23 = vmul.f32 %v6849_v13, %v8930_v24  ;;  %v2524_v59 = vpack.c.bf16 %v2296_v56, %v2292_v52  ;;  %v8938_v1 = vld [vmem:[#allocation13_spill] sm:$0xff]  ;;  %v8939_v52 = vld [vmem:[#allocation38_spill] sm:$0xff] }
 0x137   : > { %2905 = vmatpush1.bf16.msra.mxu1 %v2511_v40  ;;  %v2300_v62 = vmul.f32 %v6843_v0, %v8931_v41  ;;  %v2304_v34 = vmul.f32 %v6851_v48, %v8931_v41  ;;  %v2521_v3 = vpack.c.bf16 %v2293_v58, %v2289_v54  ;;  %v2297_v57 = vmul.f32 %v8874_v46, %v8932_v53  ;;  %v8940_v54 = vld [vmem:[#allocation39_spill] sm:$0xff] }
 0x138   : > { %2906 = vmatprep.subr.bf16.mxu1 %v2516_v28  ;;  %v2301_v47 = vmul.f32 %v6845_v9, %v8932_v53  ;;  %v2526_v49 = vpack.c.bf16 %v2302_v55, %v2298_v51  ;;  %v2306_v6 = vmul.f32 %v6839_v35, %v8933_v37  ;;  %v2310_v40 = vmul.f32 %v6847_v42, %v8933_v37  ;;  %v8941_v55 = vld [vmem:[#allocation44_spill] sm:$0xff] }
 0x139   : > { %2748 = vmatpush1.bf16.msra.mxu0 %v2513_v26  ;;  %v2523_v33 = vpack.c.bf16 %v2295_v23, %v2291_v44  ;;  %v2299_v43 = vmul.f32 %v6841_v25, %v8934_v12  ;;  %v2303_v28 = vmul.f32 %v6849_v13, %v8934_v12  ;;  %v2528_v8 = vpack.c.bf16 %v2304_v34, %v2300_v62  ;;  %v8942_v23 = vld [vmem:[#allocation40_spill] sm:$0xff] }
 0x13a   : > { %2749 = vmatprep.subr.bf16.mxu0 %v2518_v39  ;;  %v2308_v38 = vmul.f32 %v6843_v0, %v8935_v5  ;;  %v2312_v26 = vmul.f32 %v6851_v48, %v8935_v5  ;;  %v2525_v31 = vpack.c.bf16 %v2301_v47, %v2297_v57  ;;  %v2305_v60 = vmul.f32 %v8874_v46, %v8936_v18  ;;  %v6237_v62 = vld [vmem:[%s6571_s18 + $0x38] ss:$24 sps:$4 sm:$0xff]  }
 0x13b   : > { %2907 = vmatpush1.bf16.msra.mxu1 %v2515_v63  ;;  %v2309_v39 = vmul.f32 %v6845_v9, %v8936_v18  ;;  %v2530_v7 = vpack.c.bf16 %v2310_v40, %v2306_v6  ;;  %v2314_v14 = vmul.f32 %v6839_v35, %v8937_v50  ;;  %v2318_v63 = vmul.f32 %v6847_v42, %v8937_v50  ;;  %v8945_v50 = vld [vmem:[#allocation47_spill] sm:$0xff] }
 0x13c   : > { %2908 = vmatprep.subr.bf16.mxu1 %v2520_v27  ;;  %v2527_v19 = vpack.c.bf16 %v2303_v28, %v2299_v43  ;;  %v2307_v11 = vmul.f32 %v6841_v25, %v8938_v1  ;;  %v2311_v27 = vmul.f32 %v6849_v13, %v8938_v1  ;;  %v2532_v15 = vpack.c.bf16 %v2312_v26, %v2308_v38  ;;  %v8946_v1 = vld [vmem:[#allocation41_spill] sm:$0xff] }
 0x13d   : > { %2750 = vmatpush1.bf16.msra.mxu0 %v2517_v17  ;;  %v2316_v56 = vmul.f32 %v6843_v0, %v8939_v52  ;;  %v2320_v17 = vmul.f32 %v6851_v48, %v8939_v52  ;;  %v2529_v61 = vpack.c.bf16 %v2309_v39, %v2305_v60  ;;  %v2313_v58 = vmul.f32 %v8874_v46, %v8940_v54 }
 0x13e   : > { %2751 = vmatprep.subr.bf16.mxu0 %v2522_v32  ;;  %v2317_v32 = vmul.f32 %v6845_v9, %v8940_v54  ;;  %v2534_v51 = vpack.c.bf16 %v2318_v63, %v2314_v14  ;;  %v2326_v24 = vmul.f32 %v6847_v42, %v8941_v55  ;;  %v2531_v44 = vpack.c.bf16 %v2311_v27, %v2307_v11 }
 0x13f   : > { %2909 = vmatpush1.bf16.msra.mxu1 %v2519_v45  ;;  %v2322_v45 = vmul.f32 %v6839_v35, %v8941_v55  ;;  %v2319_v41 = vmul.f32 %v6849_v13, %v8942_v23  ;;  %v2536_v34 = vpack.c.bf16 %v2320_v17, %v2316_v56  ;;  %2728 = vmatprep.mubr.bf16.mxu0 %v6235_v16  ;;  %v8948_v17 = vld [vmem:[#allocation48_spill] sm:$0xff] }
 0x140   : > { %2910 = vmatprep.subr.bf16.mxu1 %v2524_v59  ;;  %v2315_v59 = vmul.f32 %v6841_v25, %v8942_v23  ;;  %v2533_v47 = vpack.c.bf16 %v2317_v32, %v2313_v58  ;;  %v2334_v12 = vmul.f32 %v6847_v42, %v7252_v21  ;;  %2887 = vmatprep.mubr.bf16.mxu1 %v6235_v16  ;;  %v8949_v32 = vld [vmem:[#allocation43_spill] sm:$0xff] }
 0x141   : > { %2752 = vmatpush1.bf16.msra.mxu0 %v2521_v3  ;;  %v8943_v3 = vld [vmem:[#allocation45_spill] sm:$0xff]  ;;  %v2538_v40 = vpack.c.bf16 %v2326_v24, %v2322_v45  ;;  %v2323_v28 = vmul.f32 %v6841_v25, %v7249_v10  ;;  %v2332_v38 = vmul.f32 %v6843_v0, %v7255_v30  ;;  %v2336_v26 = vmul.f32 %v6851_v48, %v7255_v30 }
 0x142   : > { %2753 = vmatprep.subr.bf16.mxu0 %v2526_v49  ;;  %v2324_v53 = vmul.f32 %v6843_v0, %v8943_v3  ;;  %v2328_v57 = vmul.f32 %v6851_v48, %v8943_v3  ;;  %v8944_v49 = vld [vmem:[#allocation46_spill] sm:$0xff]  ;;  %v2535_v43 = vpack.c.bf16 %v2319_v41, %v2315_v59  ;;  %2729 = vmatmul.mubr.bf16.gmra.mrb[4].mxu0 %v6237_v62  ;;  %v8950_v45 = vld [vmem:[#allocation49_spill] sm:$0xff]  ;;  %v8952_v3 = vld [vmem:[#allocation52_spill] sm:$0xff] }
 0x143   : > { %2911 = vmatpush1.bf16.msra.mxu1 %v2523_v33  ;;  %v2321_v37 = vmul.f32 %v8874_v46, %v8944_v49  ;;  %v2325_v6 = vmul.f32 %v6845_v9, %v8944_v49  ;;  %v2330_v33 = vmul.f32 %v6839_v35, %v7252_v21  ;;  %v6240_v21 = vld [vmem:[%s6571_s18 + $0x14] ss:$24 sps:$4 sm:$0xff]   ;;  %v2329_v18 = vmul.f32 %v8874_v46, %v7258_v36 }
 0x144   : > { %2912 = vmatprep.subr.bf16.mxu1 %v2528_v8  ;;  %v2327_v8 = vmul.f32 %v6849_v13, %v7249_v10  ;;  %v2540_v5 = vpack.c.bf16 %v2328_v57, %v2324_v53  ;;  %2888 = vmatmul.mubr.bf16.gmra.mrb[4].mxu1 %v6237_v62  ;;  %v2333_v60 = vmul.f32 %v6845_v9, %v7258_v36  ;;  %v8951_v59 = vld [vmem:[#allocation50_spill] sm:$0xff]  ;;  %v8953_v49 = vld [vmem:[#allocation51_spill] sm:$0xff] }
 0x145   : > { %2754 = vmatpush1.bf16.msra.mxu0 %v2525_v31  ;;  %v2537_v31 = vpack.c.bf16 %v2325_v6, %v2321_v37  ;;  %v2542_v10 = vpack.c.bf16 %v2334_v12, %v2330_v33  ;;  %v2338_v39 = vmul.f32 %v6839_v35, %v7225_v2  ;;  %v2331_v14 = vmul.f32 %v6841_v25, %v8945_v50  ;;  %v8954_v33 = vld [vmem:[#allocation53_spill] sm:$0xff] }
 0x146   : > { %2755 = vmatprep.subr.bf16.mxu0 %v2530_v7  ;;  %v2342_v7 = vmul.f32 %v6847_v42, %v7225_v2  ;;  %v2539_v30 = vpack.c.bf16 %v2327_v8, %v2323_v28  ;;  %v2335_v63 = vmul.f32 %v6849_v13, %v8945_v50  ;;  %v2340_v36 = vmul.f32 %v6843_v0, %v8946_v1  ;;  %v8947_v2 = vld [vmem:[#allocation42_spill] sm:$0xff]  ;;  %v8958_v50 = vld [vmem:[#allocation57_spill] sm:$0xff] }
 0x147   : > { %2913 = vmatpush1.bf16.msra.mxu1 %v2527_v19  ;;  %v2544_v19 = vpack.c.bf16 %v2336_v26, %v2332_v38  ;;  %v2344_v11 = vmul.f32 %v6851_v48, %v8946_v1  ;;  %2771 = vmatprep.mubr.bf16.mxu0 %v6240_v21  ;;  %v2541_v27 = vpack.c.bf16 %v2333_v60, %v2329_v18  ;;  %v8955_v8 = vld [vmem:[#allocation54_spill] sm:$0xff] }
 0x148   : > { %2914 = vmatprep.subr.bf16.mxu1 %v2532_v15  ;;  %v2337_v15 = vmul.f32 %v8874_v46, %v8947_v2  ;;  %v2341_v52 = vmul.f32 %v6845_v9, %v8947_v2  ;;  %2930 = vmatprep.mubr.bf16.mxu1 %v6240_v21  ;;  %v2546_v56 = vpack.c.bf16 %v2342_v7, %v2338_v39  ;;  %v8956_v21 = vld [vmem:[#allocation56_spill] sm:$0xff] }
 0x149   : > { %2756 = vmatpush1.bf16.msra.mxu0 %v2529_v61  ;;  %v2346_v61 = vmul.f32 %v6839_v35, %v8948_v17  ;;  %v2350_v54 = vmul.f32 %v6847_v42, %v8948_v17  ;;  %v2543_v58 = vpack.c.bf16 %v2335_v63, %v2331_v14  ;;  %v2339_v16 = vmul.f32 %v6841_v25, %v8949_v32  ;;  %v3198_v17 = vld [vmem:[%s8686_s3 + $0x8] sm:$0xff] }
 0x14a   : > { %2757 = vmatprep.subr.bf16.mxu0 %v2534_v51  ;;  %v2343_v51 = vmul.f32 %v6849_v13, %v8949_v32  ;;  %v2548_v55 = vpack.c.bf16 %v2344_v11, %v2340_v36  ;;  %v2348_v24 = vmul.f32 %v6843_v0, %v8950_v45  ;;  %v2545_v23 = vpack.c.bf16 %v2341_v52, %v2337_v15  ;;  %v6241_v52 = vld [vmem:[%s6571_s18 + $0x44] ss:$24 sps:$4 sm:$0xff]   ;;  %v3199_v32 = vld [vmem:[%s8686_s3 + $0x10] sm:$0xff] }
 0x14b   : > { %2915 = vmatpush1.bf16.msra.mxu1 %v2531_v44  ;;  %v2352_v44 = vmul.f32 %v6851_v48, %v8950_v45  ;;  %v2345_v41 = vmul.f32 %v8874_v46, %v8951_v59  ;;  %v2349_v62 = vmul.f32 %v6845_v9, %v8951_v59  ;;  %v2354_v53 = vmul.f32 %v6839_v35, %v8952_v3  ;;  %v3510_v45 = vld [vmem:[%s8690_s7 + $0x10] sm:$0xff] }
 0x14c   : > { %2916 = vmatprep.subr.bf16.mxu1 %v2536_v34  ;;  %v2550_v34 = vpack.c.bf16 %v2350_v54, %v2346_v61  ;;  %v2358_v57 = vmul.f32 %v6847_v42, %v8952_v3  ;;  %v2347_v37 = vmul.f32 %v6841_v25, %v8953_v49  ;;  %v2351_v6 = vmul.f32 %v6849_v13, %v8953_v49  ;;  %v3197_v61 = vld [vmem:[%s8686_s3] sm:$0xff]  ;;  %v3744_v59 = vld [vmem:[%s8692_s9 + $0x10] sm:$0xff] }
 0x14d   : > { %2758 = vmatpush1.bf16.msra.mxu0 %v2533_v47  ;;  %v2547_v47 = vpack.c.bf16 %v2343_v51, %v2339_v16  ;;  %v2356_v12 = vmul.f32 %v6843_v0, %v8954_v33  ;;  %v2549_v28 = vpack.c.bf16 %v2349_v62, %v2345_v41  ;;  %v2357_v38 = vmul.f32 %v6845_v9, %v8955_v8  ;;  %v3200_v16 = vld [vmem:[%s8686_s3 + $0x18] sm:$0xff]  ;;  %v3508_v51 = vld [vmem:[%s8690_s7] sm:$0xff]  ;;  %v5803_v3 = vld [vmem:[%s8688_s5 + $0x30] sm:$0xff] }
 0x14e   : > { %2759 = vmatprep.subr.bf16.mxu0 %v2538_v40  ;;  %v2552_v40 = vpack.c.bf16 %v2352_v44, %v2348_v24  ;;  %v2554_v26 = vpack.c.bf16 %v2358_v57, %v2354_v53  ;;  %v2366_v18 = vmul.f32 %v6847_v42, %v8956_v21  ;;  %v2551_v60 = vpack.c.bf16 %v2351_v6, %v2347_v37  ;;  %v3451_v24 = vld [vmem:[%s8688_s5 + $0x18] sm:$0xff]  ;;  %v3742_v44 = vld [vmem:[%s8692_s9] sm:$0xff]  ;;  %v5811_v49 = vld [vmem:[%s8690_s7 + $0x30] sm:$0xff] }
 0x14f   : > { %2917 = vmatpush1.bf16.msra.mxu1 %v2535_v43  ;;  %v2360_v43 = vmul.f32 %v6851_v48, %v8954_v33  ;;  %v2364_v14 = vmul.f32 %v6843_v0, %v8958_v50  ;;  %v2368_v63 = vmul.f32 %v6851_v48, %v8958_v50  ;;  %v8816_v54 = vmov 0.0   ;;  %v3511_v41 = vld [vmem:[%s8690_s7 + $0x18] sm:$0xff]  ;;  %v5801_v62 = vld [vmem:[%s8688_s5 + $0x20] sm:$0xff]  ;;  %v5823_v33 = vld [vmem:[%s8692_s9 + $0x30] sm:$0xff] }
 0x150   : > { %2918 = vmatprep.subr.bf16.mxu1 %v2540_v5  ;;  %v2353_v5 = vmul.f32 %v8874_v46, %v8955_v8  ;;  %v3745_v53 = vld [vmem:[%s8692_s9 + $0x18] sm:$0xff]  ;;  %v5809_v57 = vld [vmem:[%s8690_s7 + $0x20] sm:$0xff]  ;;  %v5847_v8 = vld [vmem:[%s8688_s5 + $0x50] sm:$0xff] }
 0x151   : > { %2760 = vmatpush1.bf16.msra.mxu0 %v2537_v31  ;;  %v2362_v31 = vmul.f32 %v6839_v35, %v8956_v21  ;;  %v2560_v2 = vpack.c.bf16 %v2368_v63, %v2364_v14  ;;  %v5804_v37 = vld [vmem:[%s8688_s5 + $0x38] sm:$0xff]  ;;  %v5821_v6 = vld [vmem:[%s8692_s9 + $0x20] sm:$0xff]  ;;  %v5855_v21 = vld [vmem:[%s8690_s7 + $0x50] sm:$0xff] }
 0x152   : > { %2761 = vmatprep.subr.bf16.mxu0 %v2542_v10  ;;  %v8957_v10 = vld [vmem:[#allocation55_spill] sm:$0xff]  ;;  %v2553_v35 = vpack.c.bf16 %v2357_v38, %v2353_v5  ;;  %v5824_v5 = vld [vmem:[%s8692_s9 + $0x38] sm:$0xff]  ;;  %v5853_v38 = vld [vmem:[%s8690_s7 + $0x40] sm:$0xff] }
 0x153   : > { %2919 = vmatpush1.bf16.msra.mxu1 %v2539_v30  ;;  %v2355_v39 = vmul.f32 %v6841_v25, %v8957_v10  ;;  %v2359_v7 = vmul.f32 %v6849_v13, %v8957_v10  ;;  %v2556_v30 = vpack.c.bf16 %v2360_v43, %v2356_v12  ;;  %v2558_v36 = vpack.c.bf16 %v2366_v18, %v2362_v31  ;;  %v5812_v12 = vld [vmem:[%s8690_s7 + $0x38] sm:$0xff]  ;;  %v5845_v43 = vld [vmem:[%s8688_s5 + $0x40] sm:$0xff]  ;;  %v5867_v10 = vld [vmem:[%s8692_s9 + $0x50] sm:$0xff] }
 0x154   : > { %2920 = vmatprep.subr.bf16.mxu1 %v2544_v19  ;;  %v8959_v19 = vld [vmem:[#allocation58_spill] sm:$0xff]  ;;  %v5848_v31 = vld [vmem:[%s8688_s5 + $0x58] sm:$0xff]  ;;  %v5865_v18 = vld [vmem:[%s8692_s9 + $0x40] sm:$0xff] }
 0x155   : > { %2762 = vmatpush1.bf16.msra.mxu0 %v2541_v27  ;;  %v2361_v42 = vmul.f32 %v8874_v46, %v8959_v19  ;;  %v2365_v1 = vmul.f32 %v6845_v9, %v8959_v19  ;;  %v2555_v11 = vpack.c.bf16 %v2359_v7, %v2355_v39  ;;  %v8960_v27 = vld [vmem:[#allocation59_spill] sm:$0xff]  ;;  %v5856_v39 = vld [vmem:[%s8690_s7 + $0x58] sm:$0xff]  ;;  %v5469_v7 = vld [vmem:[%s8694_s11] sm:$0x7] }
 0x156   : > { %2763 = vmatprep.subr.bf16.mxu0 %v2546_v56  ;;  %v2363_v0 = vmul.f32 %v6841_v25, %v8960_v27  ;;  %v2367_v48 = vmul.f32 %v6849_v13, %v8960_v27  ;;  %v6238_v9 = vld [vmem:[%s6571_s18 + $0x10] ss:$24 sps:$4 sm:$0xff]   ;;  %v6243_v25 = vld [vmem:[%s6571_s18 + $0x40] ss:$24 sps:$4 sm:$0xff]   ;;  %v8961_v56 = vmov 2  }
 0x157   : > { %2921 = vmatpush1.bf16.msra.mxu1 %v2543_v58  ;;  %v2557_v46 = vpack.c.bf16 %v2365_v1, %v2361_v42  ;;  %v2954_v13 = vld [vmem:[%s8685_s2 + $0x18] sm:$0xff]  ;;  %v3448_v58 = vld [vmem:[%s8688_s5] sm:$0xff] }
 0x158   : > { %2922 = vmatprep.subr.bf16.mxu1 %v2548_v55  ;;  %v2559_v15 = vpack.c.bf16 %v2367_v48, %v2363_v0  ;;  %3042 = vperm.xlu1 %6222, %v2954_v13   ;;  %v3449_v55 = vld [vmem:[%s8688_s5 + $0x8] sm:$0xff]  ;;  %v5868_v50 = vld [vmem:[%s8692_s9 + $0x58] sm:$0xff] }
 0x159   : > { %2764 = vmatpush1.bf16.msra.mxu0 %v2545_v23  ;;  %2972 = vperm.xlu0 %6223, %v2954_v13   ;;  %v3509_v23 = vld [vmem:[%s8690_s7 + $0x8] sm:$0xff] }
 0x15a   : > { %2765 = vmatprep.subr.bf16.mxu0 %v2550_v34  ;;  %v3743_v34 = vld [vmem:[%s8692_s9 + $0x8] sm:$0xff] }
 0x15b   : > { %2923 = vmatpush1.bf16.msra.mxu1 %v2547_v47  ;;  %v5802_v47 = vld [vmem:[%s8688_s5 + $0x28] sm:$0xff] }
 0x15c   : > { %2924 = vmatprep.subr.bf16.mxu1 %v2552_v40  ;;  %6224 = vset.pattern.permute.xlu1 %v8961_v56  ;;  %v5810_v40 = vld [vmem:[%s8690_s7 + $0x28] sm:$0xff] }
 0x15d   : > { %2766 = vmatpush1.bf16.msra.mxu0 %v2549_v28  ;;  %3126 = vperm.xlu1 %6224, %v2954_v13   ;;  %v5822_v28 = vld [vmem:[%s8692_s9 + $0x28] sm:$0xff] }
 0x15e   : > { %2767 = vmatprep.subr.bf16.mxu0 %v2554_v26  ;;  %3208 = vperm.xlu0 %6223, %v3198_v17   ;;  %v5846_v26 = vld [vmem:[%s8688_s5 + $0x48] sm:$0xff] }
 0x15f   : > { %2925 = vmatpush1.bf16.msra.mxu1 %v2551_v60  ;;  %v5854_v60 = vld [vmem:[%s8690_s7 + $0x48] sm:$0xff] }
 0x160   : > { %2926 = vmatprep.subr.bf16.mxu1 %v2556_v30  ;;  %v5866_v30 = vld [vmem:[%s8692_s9 + $0x48] sm:$0xff] }
 0x161   : > { %2768 = vmatpush1.bf16.msra.mxu0 %v2553_v35  ;;  %6225 = vset.pattern.permute.xlu1 %v6308_v4  ;;  %v3450_v4 = vld [vmem:[%s8688_s5 + $0x10] sm:$0xff] }
 0x162   : > { %2769 = vmatprep.subr.bf16.mxu0 %v2558_v36  ;;  %3203 = vperm.xlu1 %6225, %v3197_v61  }
 0x163   : > { %2927 = vmatpush1.bf16.msra.mxu1 %v2555_v11  ;;  %3454 = vperm.xlu0 %6223, %v3448_v58  }
 0x164   : > { %2928 = vmatprep.subr.bf16.mxu1 %v2560_v2 }
 0x165   : > { %2770 = vmatpush1.bf16.msra.mxu0 %v2557_v46 }
 0x166   : > { %3213 = vperm.xlu1 %6225, %v3199_v32  }
 0x167   : > { %2929 = vmatpush1.bf16.msra.mxu1 %v2559_v15  ;;  %3464 = vperm.xlu0 %6223, %v3450_v4  }
 0x168   : > { %2772 = vmatmul.mubr.bf16.vlgmr.msra.gmra.mrb[0].mxu0 %v6238_v9 }
 0x169   : > { %2781 = vmatprep.mubr.bf16.mxu0 %v6241_v52 }
 0x16a   : > { %2931 = vmatmul.mubr.bf16.vlgmr.msra.gmra.mrb[0].mxu1 %v6238_v9  ;;  %3218 = vperm.xlu1 %6225, %v3200_v16   ;;  %v3237_v16 = vld [vmem:[%s8687_s4] sm:$0xff] }
 0x16b   : > { %2940 = vmatprep.mubr.bf16.mxu1 %v6241_v52  ;;  %3514 = vperm.xlu0 %6223, %v3508_v51   ;;  %v3238_v51 = vld [vmem:[%s8687_s4 + $0x8] sm:$0xff] }
 0x16e   : > { %3459 = vperm.xlu1 %6225, %v3449_v55   ;;  %v3239_v55 = vld [vmem:[%s8687_s4 + $0x10] sm:$0xff] }
 0x16f   : > { %3524 = vperm.xlu0 %6223, %v3510_v45   ;;  %v3240_v45 = vld [vmem:[%s8687_s4 + $0x18] sm:$0xff] }
 0x170   : > { %2782 = vmatmul.mubr.bf16.gmra.mrb[4].mxu0 %v6243_v25 }
 0x171   : > { %3318 = vmatprep.mubr.f32.mxu0 %v8816_v54 }
 0x172   : > { %2941 = vmatmul.mubr.bf16.gmra.mrb[4].mxu1 %v6243_v25  ;;  %3469 = vperm.xlu1 %6225, %v3451_v24  }
 0x173   : > { %3407 = vmatprep.mubr.f32.mxu1 %v8816_v54  ;;  %3748 = vperm.xlu0 %6223, %v3742_v44  }
 0x176   : > { %3519 = vperm.xlu1 %6225, %v3509_v23   ;;  %v3031_v24 = vpop.permute.xlu1 %3030 }
 0x177   : > { %3758 = vperm.xlu0 %6223, %v3744_v59  }
 0x17a   : > { %3529 = vperm.xlu1 %6225, %v3511_v41   ;;  %v3035_v44 = vpop.permute.xlu1 %3034  ;;  %v3115_v41 = vpop.permute.xlu0 %3114 }
 0x17b   : > { %4190 = vperm.xlu0 %6223, %v5801_v62  }
 0x17e   : > { %3753 = vperm.xlu1 %6225, %v3743_v34   ;;  %v6244_v34 = vld [vmem:[%s6444_s26] sm:$0x77] }
 0x17f   : > { %4200 = vperm.xlu0 %6223, %v5803_v3   ;;  %v3048_v3 = vrot.slane %v6244_v34, %v6473_v29 }
 0x182   : > { %3763 = vperm.xlu1 %6225, %v3745_v53   ;;  %v8970_v53 = vld [vmem:[#allocation7_spill] sm:$0xff] }
 0x183   : > { %4252 = vperm.xlu0 %6223, %v5809_v57   ;;  %v3052_v57 = vrot.slane %v6244_v34, %v8970_v53 }
 0x186   : > { %4195 = vperm.xlu1 %6225, %v5802_v47   ;;  %v6245_v47 = vld [vmem:[%s6444_s26 + $0x8] sm:$0x77] }
 0x187   : > { %4262 = vperm.xlu0 %6223, %v5811_v49   ;;  %v3056_v49 = vrot.slane %v6245_v47, %v6473_v29 }
 0x189   : > { %v3119_v23 = vpop.permute.xlu1 %3118 }
 0x18a   : > { %4205 = vperm.xlu1 %6225, %v5804_v37   ;;  %v3060_v37 = vrot.slane %v6245_v47, %v8970_v53 }
 0x18b   : > { %4488 = vperm.xlu0 %6223, %v5821_v6   ;;  %v3123_v6 = vpop.permute.xlu0 %3122 }
 0x18e   : > { %4257 = vperm.xlu1 %6225, %v5810_v40   ;;  %v2980_v40 = vrot.slane %v6244_v34, %v6454_v20 }
 0x18f   : > { %4498 = vperm.xlu0 %6223, %v5823_v33   ;;  %v3132_v33 = vrot.slane %v6244_v34, %v6460_v22 }
 0x192   : > { %4267 = vperm.xlu1 %6225, %v5812_v12   ;;  %v8971_v12 = vld [vmem:[#allocation6_spill] sm:$0xff] }
 0x193   : > { %4930 = vperm.xlu0 %6223, %v5845_v43   ;;  %v8164_v59 = vpop.permute.xlu1 %2967  ;;  %v3136_v43 = vrot.slane %v6244_v34, %v8971_v12 }
 0x196   : > { %4493 = vperm.xlu1 %6225, %v5822_v28   ;;  %v3140_v28 = vrot.slane %v6245_v47, %v6460_v22 }
 0x197   : > { %4940 = vperm.xlu0 %6223, %v5847_v8  }
 0x19a   : > { %4503 = vperm.xlu1 %6225, %v5824_v5   ;;  %v3068_v5 = vrot.slane %v3048_v3, %v6473_v29 }
 0x19b   : > { %4992 = vperm.xlu0 %6223, %v5853_v38   ;;  %v8166_v62 = vpop.permute.xlu1 %3038  ;;  %v3072_v38 = vrot.slane %v3052_v57, %v6473_v29 }
 0x19e   : > { %4935 = vperm.xlu1 %6225, %v5846_v26   ;;  %v3076_v26 = vrot.slane %v3056_v49, %v6473_v29 }
 0x19f   : > { %5002 = vperm.xlu0 %6223, %v5855_v21   ;;  %v3144_v21 = vrot.slane %v6245_v47, %v8971_v12 }
 0x1a2   : > { %4945 = vperm.xlu1 %6225, %v5848_v31   ;;  %v3080_v31 = vrot.slane %v3060_v37, %v6473_v29  ;;  %v3082_v29 = vmul.f32 %v3072_v38, %v3031_v24 }
 0x1a3   : > { %5228 = vperm.xlu0 %6223, %v5865_v18   ;;  %v8972_v18 = vld [vmem:[#allocation5_spill] sm:$0xff] }
 0x1a6   : > { %4997 = vperm.xlu1 %6225, %v5854_v60   ;;  %v2984_v60 = vrot.slane %v6244_v34, %v8972_v18 }
 0x1a7   : > { %5238 = vperm.xlu0 %6223, %v5867_v10   ;;  %v2988_v10 = vrot.slane %v6245_v47, %v6454_v20 }
 0x1aa   : > { %5007 = vperm.xlu1 %6225, %v5856_v39   ;;  %v3000_v39 = vrot.slane %v2980_v40, %v6454_v20 }
 0x1ab   : > { %5472 = vperm.xlu0 %6223, %v5469_v7   ;;  %v8189_v7 = vrot.slane %v3132_v33, %v6460_v22 }
 0x1ac   : > { %v3021_v37 = vmul.f32 %v3000_v39, %v8164_v59 }
 0x1ae   : > { %5233 = vperm.xlu1 %6225, %v5866_v30   ;;  %v8192_v30 = vrot.slane %v3136_v43, %v6460_v22 }
 0x1b0   : > { %v3170_v34 = vmul.f32 %v8192_v30, %v3119_v23 }
 0x1b2   : > { %5243 = vperm.xlu1 %6225, %v5868_v50   ;;  %v8195_v50 = vrot.slane %v3140_v28, %v6460_v22 }
 0x1b4   : > { %v3171_v3 = vmul.f32 %v8195_v50, %v3119_v23 }
 0x1d7   : > { %v8178_v8 = vpop.permute.xlu1 %3042 }
 0x23b   : > { %v2773_v14 = vpop.f32.mrb[0].mxu0 }
 0x23c   : > { %v2775_v63 = vpop.f32.mrb[1].mxu0 }
 0x23d   : > { %v2932_v35 = vpop.f32.mrb[0].mxu1  ;;  %v2777_v19 = vpop.f32.mrb[2].mxu0 }
 0x23e   : > { %v2934_v42 = vpop.f32.mrb[1].mxu1  ;;  %v8112_v1 = vpack.c.bf16 %v2777_v19, %v2773_v14  ;;  %v2779_v36 = vpop.f32.mrb[3].mxu0  ;;  %v2992_v14 = vrot.slane %v6245_v47, %v8972_v18  ;;  %v3083_v19 = vmul.f32 %v3076_v26, %v3031_v24 }
 0x23f   : > { %v2936_v11 = vpop.f32.mrb[2].mxu1  ;;  %v8114_v27 = vpack.c.bf16 %v2779_v36, %v2775_v63  ;;  %v2958_v63 = vpop.permute.xlu0 %2957  ;;  %v3084_v36 = vmul.f32 %v3080_v31, %v3031_v24 }
 0x240   : > { %8962 = vst [vmem:[#allocation11_spill] sm:$0xff] %v8112_v1  ;;  %v8116_v0 = vpack.c.bf16 %v2936_v11, %v2932_v35  ;;  %v2938_v48 = vpop.f32.mrb[3].mxu1  ;;  %v3081_v35 = vmul.f32 %v3068_v5, %v3031_v24  ;;  %v3085_v11 = vmul.f32 %v3068_v5, %v3035_v44  ;;  %v8217_v24 = vmul.f32 %v8195_v50, %v3123_v6 }
 0x241   : > { %8963 = vst [vmem:[#allocation12_spill] sm:$0xff] %v8114_v27  ;;  %v8118_v2 = vpack.c.bf16 %v2938_v48, %v2934_v42  ;;  %5884 = vmatprep.subr.bf16.mxu0 %v8114_v27  ;;  %v8199_v42 = vrot.slane %v3144_v21, %v6460_v22  ;;  %v3086_v48 = vmul.f32 %v3072_v38, %v3035_v44 }
 0x242   : > { %8964 = vst [vmem:[#allocation16_spill] sm:$0xff] %v8116_v0  ;;  %5886 = vmatpush1.bf16.msra.mxu0 %v8112_v1  ;;  %v3012_v22 = vrot.slane %v2992_v14, %v6454_v20 }
 0x243   : > { %8965 = vst [vmem:[#allocation17_spill] sm:$0xff] %v8118_v2  ;;  %5892 = vmatprep.subr.bf16.mxu1 %v8118_v2  ;;  %v2783_v46 = vpop.f32.mrb[4].mxu0  ;;  %v8223_v53 = vmul.f32 %v8199_v42, %v3123_v6 }
 0x244   : > { %5894 = vmatpush1.bf16.msra.mxu1 %v8116_v0  ;;  %v2785_v15 = vpop.f32.mrb[5].mxu0  ;;  %v3016_v12 = vmul.f32 %v3012_v22, %v2958_v63  ;;  %v3024_v28 = vmul.f32 %v3012_v22, %v8164_v59 }
 0x245   : > { %v2942_v9 = vpop.f32.mrb[4].mxu1  ;;  %v2787_v52 = vpop.f32.mrb[6].mxu0  ;;  %8974 = vst [vmem:[#allocation20_spill] sm:$0xff] %v8223_v53 }
 0x246   : > { %v2944_v25 = vpop.f32.mrb[5].mxu1  ;;  %v8124_v13 = vpack.c.bf16 %v2787_v52, %v2783_v46  ;;  %v2789_v56 = vpop.f32.mrb[7].mxu0  ;;  %v3087_v46 = vmul.f32 %v3076_v26, %v3035_v44  ;;  %v3004_v52 = vrot.slane %v2984_v60, %v6454_v20  ;;  %v3089_v60 = vmul.f32 %v3068_v5, %v8166_v62 }
 0x247   : > { %v2946_v17 = vpop.f32.mrb[6].mxu1  ;;  %v8126_v61 = vpack.c.bf16 %v2789_v56, %v2785_v15  ;;  %v8201_v15 = vpop.permute.xlu1 %3126  ;;  %v3013_v56 = vmul.f32 %v3000_v39, %v2958_v63  ;;  %v3100_v0 = vadd.f32 %v3084_v36, %v3016_v12 }
 0x248   : > { %8966 = vst [vmem:[#allocation14_spill] sm:$0xff] %v8124_v13  ;;  %v8128_v58 = vpack.c.bf16 %v2946_v17, %v2942_v9  ;;  %v2948_v32 = vpop.f32.mrb[7].mxu1  ;;  %v3088_v9 = vmul.f32 %v3080_v31, %v3035_v44  ;;  %v3165_v17 = vmul.f32 %v8189_v7, %v3115_v41  ;;  %v3169_v44 = vmul.f32 %v8189_v7, %v3119_v23 }
 0x249   : > { %8967 = vst [vmem:[#allocation18_spill] sm:$0xff] %v8126_v61  ;;  %v8130_v4 = vpack.c.bf16 %v2948_v32, %v2944_v25  ;;  %5888 = vmatprep.subr.bf16.mxu0 %v8126_v61  ;;  %v3008_v25 = vrot.slane %v2988_v10, %v6454_v20  ;;  %v3166_v32 = vmul.f32 %v8192_v30, %v3115_v41  ;;  %v2963_v20 = vpop.permute.xlu0 %2962 }
 0x24a   : > { %8968 = vst [vmem:[#allocation15_spill] sm:$0xff] %v8128_v58  ;;  %5890 = vmatpush1.bf16.msra.mxu0 %v8124_v13  ;;  %v3014_v57 = vmul.f32 %v3004_v52, %v2958_v63  ;;  %v3097_v49 = vadd.f32 %v3081_v35, %v3013_v56  ;;  %v3022_v40 = vmul.f32 %v3004_v52, %v8164_v59 }
 0x24b   : > { %8969 = vst [vmem:[#allocation19_spill] sm:$0xff] %v8130_v4  ;;  %5896 = vmatprep.subr.bf16.mxu1 %v8130_v4  ;;  %v3015_v47 = vmul.f32 %v3008_v25, %v2958_v63  ;;  %v3023_v33 = vmul.f32 %v3008_v25, %v8164_v59  ;;  %v3204_v43 = vpop.permute.xlu1 %3203  ;;  %v3017_v21 = vmul.f32 %v3000_v39, %v2963_v20 }
 0x24c   : > { %5898 = vmatpush1.bf16.msra.mxu1 %v8128_v58  ;;  %v3018_v18 = vmul.f32 %v3004_v52, %v2963_v20  ;;  %v3091_v10 = vmul.f32 %v3076_v26, %v8166_v62  ;;  %v3020_v14 = vmul.f32 %v3012_v22, %v2963_v20  ;;  %v3092_v35 = vmul.f32 %v3080_v31, %v8166_v62 }
 0x24d   : > { %5765 = vmatmul.mubr.msk.f32.vlgmr.msra.gmra.mrb[8].mxu0 %vm3241_vm6, %v3237_v16  ;;  %v3181_v56 = vadd.f32 %v3165_v17, %v3097_v49  ;;  %v3098_v58 = vadd.f32 %v3082_v29, %v3014_v57  ;;  %v3093_v63 = vmul.f32 %v3068_v5, %v8178_v8  ;;  %v3094_v13 = vmul.f32 %v3072_v38, %v8178_v8  ;;  %v2973_v4 = vpop.permute.xlu0 %2972 }
 0x24e   : > { %3324 = vmatprep.mubr.f32.mxu0 %v8816_v54  ;;  %v3095_v59 = vmul.f32 %v3076_v26, %v8178_v8  ;;  %v3096_v61 = vmul.f32 %v3080_v31, %v8178_v8  ;;  %v3025_v1 = vmul.f32 %v3000_v39, %v2973_v4  ;;  %v3026_v2 = vmul.f32 %v3004_v52, %v2973_v4 }
 0x24f   : > { %5769 = vmatmul.mubr.msk.f32.vlgmr.msra.gmra.mrb[8].mxu1 %vm3241_vm6, %v3237_v16  ;;  %v3167_v16 = vmul.f32 %v8195_v50, %v3115_v41  ;;  %v3101_v27 = vadd.f32 %v3085_v11, %v3017_v21  ;;  %v3027_v53 = vmul.f32 %v3008_v25, %v2973_v4  ;;  %v3102_v17 = vadd.f32 %v3086_v48, %v3018_v18 }
 0x250   : > { %3413 = vmatprep.mubr.f32.mxu1 %v8816_v54  ;;  %v3177_v29 = vmul.f32 %v8189_v7, %v8201_v15  ;;  %v3178_v26 = vmul.f32 %v8192_v30, %v8201_v15  ;;  %v3105_v57 = vadd.f32 %v3089_v60, %v3021_v37  ;;  %v3107_v8 = vadd.f32 %v3091_v10, %v3023_v33 }
 0x251   : > { %5766 = vmatmul.mubr.msk.f32.gmra.mrb[10].mxu0 %vm3241_vm6, %v3238_v51  ;;  %v3179_v31 = vmul.f32 %v8195_v50, %v8201_v15  ;;  %v3185_v39 = vadd.f32 %v3169_v44, %v3101_v27  ;;  %v3108_v11 = vadd.f32 %v3092_v35, %v3024_v28  ;;  %v3180_v48 = vmul.f32 %v8199_v42, %v8201_v15 }
 0x252   : > { %3330 = vmatprep.mubr.f32.mxu0 %v8816_v54  ;;  %v3191_v27 = vadd.f32 %v8217_v24, %v3107_v8 }
 0x253   : > { %5770 = vmatmul.mubr.msk.f32.gmra.mrb[10].mxu1 %vm3241_vm6, %v3238_v51  ;;  %v3168_v51 = vmul.f32 %v8199_v42, %v3115_v41  ;;  %v3172_v41 = vmul.f32 %v8199_v42, %v3119_v23  ;;  %v3090_v23 = vmul.f32 %v3072_v38, %v8166_v62  ;;  %v3104_v38 = vadd.f32 %v3088_v9, %v3020_v14 }
 0x254   : > { %3419 = vmatprep.mubr.f32.mxu1 %v8816_v54 }
 0x255   : > { %5767 = vmatmul.mubr.msk.f32.gmra.mrb[12].mxu0 %vm3241_vm6, %v3239_v55  ;;  %v3184_v36 = vadd.f32 %v3168_v51, %v3100_v0 }
 0x256   : > { %3336 = vmatprep.mubr.f32.mxu0 %v8816_v54 }
 0x257   : > { %5771 = vmatmul.mubr.msk.f32.gmra.mrb[12].mxu1 %vm3241_vm6, %v3239_v55  ;;  %v8211_v55 = vmul.f32 %v8189_v7, %v3123_v6  ;;  %v3221_v7 = vadd.f32 %v3204_v43, %v3181_v56 }
 0x258   : > { %3425 = vmatprep.mubr.f32.mxu1 %v8816_v54 }
 0x259   : > { %5768 = vmatmul.mubr.msk.f32.gmra.mrb[14].mxu0 %vm3241_vm6, %v3240_v45  ;;  %v3189_v50 = vadd.f32 %v8211_v55, %v3105_v57 }
 0x25a   : > { %3608 = vmatprep.mubr.f32.mxu0 %v8816_v54 }
 0x25b   : > { %5772 = vmatmul.mubr.msk.f32.gmra.mrb[14].mxu1 %vm3241_vm6, %v3240_v45  ;;  %v8214_v45 = vmul.f32 %v8192_v30, %v3123_v6  ;;  %v3019_v6 = vmul.f32 %v3008_v25, %v2963_v20  ;;  %v3028_v20 = vmul.f32 %v3012_v22, %v2973_v4  ;;  %v3106_v4 = vadd.f32 %v3090_v23, %v3022_v40 }
 0x25c   : > { %3697 = vmatprep.mubr.f32.mxu1 %v8816_v54  ;;  %v3099_v54 = vadd.f32 %v3083_v19, %v3015_v47  ;;  %v3182_v19 = vadd.f32 %v3166_v32, %v3098_v58  ;;  %v3186_v58 = vadd.f32 %v3170_v34, %v3102_v17  ;;  %v3188_v25 = vadd.f32 %v3172_v41, %v3104_v38 }
 0x25d   : > { %8973 = vst [vmem:[#allocation21_spill] sm:$0xff] %v8214_v45  ;;  %v3214_v45 = vpop.permute.xlu1 %3213  ;;  %v3103_v62 = vadd.f32 %v3087_v46, %v3019_v6  ;;  %v3209_v46 = vpop.permute.xlu0 %3208  ;;  %v3109_v30 = vadd.f32 %v3093_v63, %v3025_v1  ;;  %v3110_v22 = vadd.f32 %v3094_v13, %v3026_v2  ;;  %v3111_v1 = vadd.f32 %v3095_v59, %v3027_v53 }
 0x25e   : > { %v3183_v5 = vadd.f32 %v3167_v16, %v3099_v54  ;;  %v3222_v52 = vadd.f32 %v3204_v43, %v3182_v19  ;;  %v3224_v16 = vadd.f32 %v3204_v43, %v3184_v36  ;;  %v3225_v42 = vadd.f32 %v3209_v46, %v3185_v39 }
 0x25f   : > { %v3187_v54 = vadd.f32 %v3171_v3, %v3103_v62  ;;  %v8976_v3 = vld [vmem:[#allocation20_spill] sm:$0xff]  ;;  %v3112_v40 = vadd.f32 %v3096_v61, %v3028_v20  ;;  %v3228_v28 = vadd.f32 %v3209_v46, %v3188_v25  ;;  %v3193_v55 = vadd.f32 %v3177_v29, %v3109_v30 }
 0x260   : > { %v3223_v9 = vadd.f32 %v3204_v43, %v3183_v5  ;;  %v3192_v34 = vadd.f32 %v8976_v3, %v3108_v11  ;;  %v3226_v43 = vadd.f32 %v3209_v46, %v3186_v58  ;;  %v3229_v13 = vadd.f32 %v3214_v45, %v3189_v50 }
 0x261   : > { %v8246_v0 = vpop.permute.xlu1 %3218  ;;  %v3227_v41 = vadd.f32 %v3209_v46, %v3187_v54  ;;  %v3455_v21 = vpop.permute.xlu0 %3454  ;;  %v3231_v18 = vadd.f32 %v3214_v45, %v3191_v27  ;;  %v3194_v6 = vadd.f32 %v3178_v26, %v3110_v22  ;;  %v3195_v59 = vadd.f32 %v3179_v31, %v3111_v1 }
 0x262   : > { %v3232_v35 = vadd.f32 %v3214_v45, %v3192_v34  ;;  %v3196_v20 = vadd.f32 %v3180_v48, %v3112_v40  ;;  %v3233_v19 = vadd.f32 %v8246_v0, %v3193_v55 }
 0x263   : > { %v3234_v57 = vadd.f32 %v8246_v0, %v3194_v6  ;;  %v3235_v3 = vadd.f32 %v8246_v0, %v3195_v59 }
 0x264   : > { %v8975_v15 = vld [vmem:[#allocation21_spill] sm:$0xff]  ;;  %v3236_v40 = vadd.f32 %v8246_v0, %v3196_v20 }
 0x265   : > { %v3190_v47 = vadd.f32 %v8975_v15, %v3106_v4  ;;  %v3460_v56 = vpop.permute.xlu1 %3459 }
 0x267   : > { %v3230_v14 = vadd.f32 %v3214_v45, %v3190_v47 }
 0x320   : > { %v3320_v32 = vpop.f32.mrb[8].mxu0 }
 0x321   : > { %v3432_v51 = vadd.f32 %v3320_v32, %v3221_v7  ;;  %v3322_v44 = vpop.f32.mrb[9].mxu0 }
 0x322   : > { %v3409_v49 = vpop.f32.mrb[8].mxu1  ;;  %v3433_v37 = vadd.f32 %v3322_v44, %v3222_v52 }
 0x323   : > { %v3434_v33 = vadd.f32 %v3409_v49, %v3223_v9  ;;  %v3411_v12 = vpop.f32.mrb[9].mxu1  ;;  %v8252_v60 = vadd.f32 %v3455_v21, %v3432_v51  ;;  %v3470_v49 = vpop.permute.xlu1 %3469 }
 0x324   : > { %v3435_v24 = vadd.f32 %v3411_v12, %v3224_v16  ;;  %v3326_v2 = vpop.f32.mrb[10].mxu0  ;;  %v8254_v53 = vadd.f32 %v3455_v21, %v3433_v37  ;;  %v3465_v16 = vpop.permute.xlu0 %3464 }
 0x325   : > { %v3436_v23 = vadd.f32 %v3326_v2, %v3225_v42  ;;  %v3328_v10 = vpop.f32.mrb[11].mxu0  ;;  %v8256_v62 = vadd.f32 %v3455_v21, %v3434_v33  ;;  %v3492_v8 = vmax.f32 %v8252_v60, 0.0 }
 0x326   : > { %v3415_v61 = vpop.f32.mrb[10].mxu1  ;;  %v3437_v63 = vadd.f32 %v3328_v10, %v3226_v43  ;;  %v8261_v38 = vadd.f32 %v3455_v21, %v3435_v24  ;;  %v3493_v48 = vmax.f32 %v8254_v53, 0.0 }
 0x327   : > { %v8258_v17 = vadd.f32 %v3460_v56, %v3436_v23  ;;  %v3438_v29 = vadd.f32 %v3415_v61, %v3227_v41  ;;  %v3417_v5 = vpop.f32.mrb[11].mxu1  ;;  %v3494_v9 = vmax.f32 %v8256_v62, 0.0 }
 0x328   : > { %v8263_v26 = vadd.f32 %v3460_v56, %v3437_v63  ;;  %v3439_v45 = vadd.f32 %v3417_v5, %v3228_v28  ;;  %v3332_v36 = vpop.f32.mrb[12].mxu0  ;;  %v3495_v50 = vmax.f32 %v8261_v38, 0.0  ;;  %v3488_v5 = vld [vmem:[%s8689_s6] sm:$0xff] }
 0x329   : > { %v3496_v31 = vmax.f32 %v8258_v17, 0.0  ;;  %v8268_v39 = vadd.f32 %v3460_v56, %v3438_v29  ;;  %v3440_v4 = vadd.f32 %v3332_v36, %v3229_v13  ;;  %v3334_v11 = vpop.f32.mrb[13].mxu0  ;;  %v3490_v36 = vld [vmem:[%s8689_s6 + $0x10] sm:$0xff] }
 0x32a   : > { %v3497_v46 = vmax.f32 %v8263_v26, 0.0  ;;  %v8272_v7 = vadd.f32 %v3460_v56, %v3439_v45  ;;  %v3421_v54 = vpop.f32.mrb[12].mxu1  ;;  %v3441_v58 = vadd.f32 %v3334_v11, %v3230_v14  ;;  %v3489_v45 = vld [vmem:[%s8689_s6 + $0x8] sm:$0xff] }
 0x32b   : > { %v5901_v52 = vpack.c.bf16 %v3496_v31, %v3492_v8  ;;  %v3498_v25 = vmax.f32 %v8268_v39, 0.0  ;;  %v3442_v30 = vadd.f32 %v3421_v54, %v3231_v18  ;;  %v3423_v32 = vpop.f32.mrb[13].mxu1  ;;  %v8278_v15 = vadd.f32 %v3465_v16, %v3440_v4  ;;  %v3515_v4 = vpop.permute.xlu0 %3514 }
 0x32c   : > { %v3499_v27 = vmax.f32 %v8272_v7, 0.0  ;;  %v3443_v22 = vadd.f32 %v3423_v32, %v3232_v35  ;;  %v3338_v51 = vpop.f32.mrb[14].mxu0  ;;  %v5899_v44 = vpack.c.bf16 %v3497_v46, %v3493_v48  ;;  %v8281_v37 = vadd.f32 %v3465_v16, %v3441_v58  ;;  %v3520_v54 = vpop.permute.xlu1 %3519 }
 0x32d   : > { %v5909_v42 = vpack.c.bf16 %v3498_v25, %v3494_v9  ;;  %v3444_v47 = vadd.f32 %v3338_v51, %v3233_v19  ;;  %v3340_v34 = vpop.f32.mrb[15].mxu0  ;;  %v8284_v12 = vadd.f32 %v3465_v16, %v3442_v30  ;;  %v3500_v13 = vmax.f32 %v8278_v15, 0.0 }
 0x32e   : > { %v3427_v41 = vpop.f32.mrb[14].mxu1  ;;  %v3445_v1 = vadd.f32 %v3340_v34, %v3234_v57  ;;  %5900 = vmatprep.subr.bf16.mxu0 %v5899_v44  ;;  %v5907_v33 = vpack.c.bf16 %v3499_v27, %v3495_v50  ;;  %v8288_v21 = vadd.f32 %v3465_v16, %v3443_v22  ;;  %v3501_v6 = vmax.f32 %v8281_v37, 0.0  ;;  %v3491_v57 = vld [vmem:[%s8689_s6 + $0x18] sm:$0xff] }
 0x32f   : > { %v8286_v43 = vadd.f32 %v3470_v49, %v3444_v47  ;;  %v3446_v28 = vadd.f32 %v3427_v41, %v3235_v3  ;;  %v3429_v55 = vpop.f32.mrb[15].mxu1  ;;  %5902 = vmatpush1.bf16.msra.mxu0 %v5901_v52  ;;  %v3502_v14 = vmax.f32 %v8284_v12, 0.0  ;;  %v8977_v19 = vmov 0.0  }
 0x330   : > { %v8290_v24 = vadd.f32 %v3470_v49, %v3445_v1  ;;  %v3447_v2 = vadd.f32 %v3429_v55, %v3236_v40  ;;  %5908 = vmatprep.subr.bf16.mxu1 %v5907_v33  ;;  %v3503_v61 = vmax.f32 %v8288_v21, 0.0  ;;  %v3525_v33 = vpop.permute.xlu0 %3524 }
 0x331   : > { %v3504_v18 = vmax.f32 %v8286_v43, 0.0  ;;  %v8294_v0 = vadd.f32 %v3470_v49, %v3446_v28  ;;  %5910 = vmatpush1.bf16.msra.mxu1 %v5909_v42 }
 0x332   : > { %v3505_v23 = vmax.f32 %v8290_v24, 0.0  ;;  %v8298_v10 = vadd.f32 %v3470_v49, %v3447_v2 }
 0x333   : > { %v5905_v35 = vpack.c.bf16 %v3504_v18, %v3500_v13  ;;  %v3506_v56 = vmax.f32 %v8294_v0, 0.0 }
 0x334   : > { %v3507_v63 = vmax.f32 %v8298_v10, 0.0  ;;  %v5903_v59 = vpack.c.bf16 %v3505_v23, %v3501_v6 }
 0x335   : > { %v5913_v20 = vpack.c.bf16 %v3506_v56, %v3502_v14  ;;  %v3530_v14 = vpop.permute.xlu1 %3529 }
 0x336   : > { %5904 = vmatprep.subr.bf16.mxu0 %v5903_v59  ;;  %v5911_v29 = vpack.c.bf16 %v3507_v63, %v3503_v61 }
 0x337   : > { %5906 = vmatpush1.bf16.msra.mxu0 %v5905_v35 }
 0x338   : > { %5912 = vmatprep.subr.bf16.mxu1 %v5911_v29 }
 0x339   : > { %5914 = vmatpush1.bf16.msra.mxu1 %v5913_v20 }
 0x33a   : > { %5773 = vmatmul.mubr.msk.f32.vlgmr.msra.gmra.mrb[16].mxu0 %vm3241_vm6, %v3488_v5 }
 0x33b   : > { %3614 = vmatprep.mubr.f32.mxu0 %v8977_v19 }
 0x33c   : > { %5777 = vmatmul.mubr.msk.f32.vlgmr.msra.gmra.mrb[16].mxu1 %vm3241_vm6, %v3488_v5 }
 0x33d   : > { %3703 = vmatprep.mubr.f32.mxu1 %v8977_v19 }
 0x33e   : > { %5774 = vmatmul.mubr.msk.f32.gmra.mrb[18].mxu0 %vm3241_vm6, %v3489_v45 }
 0x33f   : > { %3620 = vmatprep.mubr.f32.mxu0 %v8977_v19 }
 0x340   : > { %5778 = vmatmul.mubr.msk.f32.gmra.mrb[18].mxu1 %vm3241_vm6, %v3489_v45 }
 0x341   : > { %3709 = vmatprep.mubr.f32.mxu1 %v8977_v19 }
 0x342   : > { %5775 = vmatmul.mubr.msk.f32.gmra.mrb[20].mxu0 %vm3241_vm6, %v3490_v36 }
 0x343   : > { %3626 = vmatprep.mubr.f32.mxu0 %v8977_v19 }
 0x344   : > { %5779 = vmatmul.mubr.msk.f32.gmra.mrb[20].mxu1 %vm3241_vm6, %v3490_v36 }
 0x345   : > { %3715 = vmatprep.mubr.f32.mxu1 %v8977_v19 }
 0x346   : > { %5776 = vmatmul.mubr.msk.f32.gmra.mrb[22].mxu0 %vm3241_vm6, %v3491_v57 }
 0x347   : > { %3842 = vmatprep.mubr.f32.mxu0 %v8977_v19 }
 0x348   : > { %5780 = vmatmul.mubr.msk.f32.gmra.mrb[22].mxu1 %vm3241_vm6, %v3491_v57 }
 0x349   : > { %3931 = vmatprep.mubr.f32.mxu1 %v8977_v19 }
 0x40d   : > { %v3610_v8 = vpop.f32.mrb[16].mxu0 }
 0x40e   : > { %v3612_v31 = vpop.f32.mrb[17].mxu0  ;;  %v3611_v48 = vadd.f32 %v3610_v8, %v3515_v4 }
 0x40f   : > { %v3699_v11 = vpop.f32.mrb[16].mxu1  ;;  %v3613_v58 = vadd.f32 %v3612_v31, %v3515_v4 }
 0x410   : > { %v3701_v46 = vpop.f32.mrb[17].mxu1  ;;  %v3700_v52 = vadd.f32 %v3699_v11, %v3515_v4  ;;  %v3726_v27 = vmax.f32 %v3611_v48, 0.0 }
 0x411   : > { %v3616_v9 = vpop.f32.mrb[18].mxu0  ;;  %v3702_v32 = vadd.f32 %v3701_v46, %v3515_v4  ;;  %v3727_v42 = vmax.f32 %v3613_v58, 0.0 }
 0x412   : > { %v3617_v25 = vadd.f32 %v3616_v9, %v3520_v54  ;;  %v3618_v30 = vpop.f32.mrb[19].mxu0  ;;  %v3728_v49 = vmax.f32 %v3700_v52, 0.0 }
 0x413   : > { %v3705_v16 = vpop.f32.mrb[18].mxu1  ;;  %v3619_v50 = vadd.f32 %v3618_v30, %v3520_v54  ;;  %v3729_v28 = vmax.f32 %v3702_v32, 0.0 }
 0x414   : > { %v3730_v22 = vmax.f32 %v3617_v25, 0.0  ;;  %v3706_v51 = vadd.f32 %v3705_v16, %v3520_v54  ;;  %v3707_v44 = vpop.f32.mrb[19].mxu1  ;;  %v3722_v16 = vld [vmem:[#allocation2] sm:$0xff] }
 0x415   : > { %v3731_v47 = vmax.f32 %v3619_v50, 0.0  ;;  %v3708_v3 = vadd.f32 %v3707_v44, %v3520_v54  ;;  %v3622_v34 = vpop.f32.mrb[20].mxu0  ;;  %v8978_v50 = vld [vmem:[#allocation12_spill] sm:$0xff]  ;;  %v8981_v44 = vld [vmem:[#allocation18_spill] sm:$0xff] }
 0x416   : > { %v5917_v41 = vpack.c.bf16 %v3730_v22, %v3726_v27  ;;  %v3732_v1 = vmax.f32 %v3706_v51, 0.0  ;;  %v3624_v40 = vpop.f32.mrb[21].mxu0  ;;  %v3623_v6 = vadd.f32 %v3622_v34, %v3525_v33  ;;  %v8979_v27 = vld [vmem:[#allocation17_spill] sm:$0xff]  ;;  %v8980_v22 = vld [vmem:[#allocation11_spill] sm:$0xff]  ;;  %v3723_v51 = vld [vmem:[#allocation2 + $0x8] sm:$0xff] }
 0x417   : > { %v5915_v55 = vpack.c.bf16 %v3731_v47, %v3727_v42  ;;  %v3733_v2 = vmax.f32 %v3708_v3, 0.0  ;;  %v3711_v13 = vpop.f32.mrb[20].mxu1  ;;  %v3625_v56 = vadd.f32 %v3624_v40, %v3525_v33  ;;  %v8982_v42 = vld [vmem:[#allocation16_spill] sm:$0xff]  ;;  %v8983_v47 = vld [vmem:[#allocation19_spill] sm:$0xff]  ;;  %v8984_v3 = vld [vmem:[#allocation14_spill] sm:$0xff] }
 0x418   : > { %v5925_v18 = vpack.c.bf16 %v3732_v1, %v3728_v49  ;;  %v3713_v23 = vpop.f32.mrb[21].mxu1  ;;  %v3712_v63 = vadd.f32 %v3711_v13, %v3525_v33  ;;  %v3734_v36 = vmax.f32 %v3623_v6, 0.0  ;;  %v3724_v34 = vld [vmem:[#allocation2 + $0x10] sm:$0xff]  ;;  %v5789_v1 = vld [vmem:[%s8687_s4 + $0x20] sm:$0xff]  ;;  %v5790_v40 = vld [vmem:[%s8687_s4 + $0x28] sm:$0xff] }
 0x419   : > { %v5923_v35 = vpack.c.bf16 %v3733_v2, %v3729_v28  ;;  %v3628_v61 = vpop.f32.mrb[22].mxu0  ;;  %5916 = vmatprep.subr.bf16.mxu0 %v5915_v55  ;;  %v3714_v29 = vadd.f32 %v3713_v23, %v3525_v33  ;;  %v3735_v4 = vmax.f32 %v3625_v56, 0.0  ;;  %v8985_v49 = vld [vmem:[#allocation15_spill] sm:$0xff]  ;;  %v5792_v28 = vld [vmem:[%s8687_s4 + $0x38] sm:$0xff]  ;;  %v3749_v55 = vpop.permute.xlu0 %3748 }
 0x41a   : > { %v3629_v59 = vadd.f32 %v3628_v61, %v3530_v14  ;;  %v3630_v20 = vpop.f32.mrb[23].mxu0  ;;  %5918 = vmatpush1.bf16.msra.mxu0 %v5917_v41  ;;  %v3736_v46 = vmax.f32 %v3712_v63, 0.0  ;;  %v3725_v41 = vld [vmem:[#allocation2 + $0x18] sm:$0xff]  ;;  %v5791_v33 = vld [vmem:[%s8687_s4 + $0x30] sm:$0xff]  ;;  %v3754_v2 = vpop.permute.xlu1 %3753  ;;  %v6059_v56 = vadd.f32 %v3749_v55, %v8256_v62 }
 0x41b   : > { %v3717_v5 = vpop.f32.mrb[22].mxu1  ;;  %5924 = vmatprep.subr.bf16.mxu1 %v5923_v35  ;;  %v3631_v45 = vadd.f32 %v3630_v20, %v3530_v14  ;;  %v3737_v9 = vmax.f32 %v3714_v29, 0.0  ;;  %v6061_v20 = vadd.f32 %v3749_v55, %v8261_v38 }
 0x41c   : > { %v3738_v57 = vmax.f32 %v3629_v59, 0.0  ;;  %v3718_v8 = vadd.f32 %v3717_v5, %v3530_v14  ;;  %v3719_v31 = vpop.f32.mrb[23].mxu1  ;;  %5926 = vmatpush1.bf16.msra.mxu1 %v5925_v18  ;;  %v6043_v18 = vadd.f32 %v3749_v55, %v8252_v60 }
 0x41d   : > { %v3739_v11 = vmax.f32 %v3631_v45, 0.0  ;;  %v3720_v48 = vadd.f32 %v3719_v31, %v3530_v14  ;;  %v3759_v13 = vpop.permute.xlu0 %3758  ;;  %v6045_v14 = vadd.f32 %v3749_v55, %v8254_v53  ;;  %v6047_v45 = vadd.f32 %v3754_v2, %v8258_v17 }
 0x41e   : > { %v5921_v54 = vpack.c.bf16 %v3738_v57, %v3734_v36  ;;  %v3740_v58 = vmax.f32 %v3718_v8, 0.0  ;;  %v8385_v6 = vpop.permute.xlu1 %3763  ;;  %v6063_v8 = vadd.f32 %v3754_v2, %v8268_v39  ;;  %v6049_v31 = vadd.f32 %v3754_v2, %v8263_v26 }
 0x41f   : > { %v5919_v52 = vpack.c.bf16 %v3739_v11, %v3735_v4  ;;  %v3741_v25 = vmax.f32 %v3720_v48, 0.0  ;;  %v6065_v53 = vadd.f32 %v3754_v2, %v8272_v7  ;;  %v6051_v48 = vadd.f32 %v3759_v13, %v8278_v15 }
 0x420   : > { %v5929_v30 = vpack.c.bf16 %v3740_v58, %v3736_v46  ;;  %v6067_v38 = vadd.f32 %v3759_v13, %v8284_v12  ;;  %v6069_v39 = vadd.f32 %v3759_v13, %v8288_v21  ;;  %v6055_v15 = vadd.f32 %v8385_v6, %v8286_v43 }
 0x421   : > { %v5927_v32 = vpack.c.bf16 %v3741_v25, %v3737_v9  ;;  %5920 = vmatprep.subr.bf16.mxu0 %v5919_v52  ;;  %v4191_v36 = vpop.permute.xlu0 %4190  ;;  %v6053_v9 = vadd.f32 %v3759_v13, %v8281_v37  ;;  %v6057_v37 = vadd.f32 %v8385_v6, %v8290_v24 }
 0x422   : > { %5922 = vmatpush1.bf16.msra.mxu0 %v5921_v54  ;;  %v4196_v46 = vpop.permute.xlu1 %4195 }
 0x423   : > { %5928 = vmatprep.subr.bf16.mxu1 %v5927_v32  ;;  %5932 = vmatprep.subr.bf16.mxu0 %v8978_v50 }
 0x424   : > { %5930 = vmatpush1.bf16.msra.mxu1 %v5929_v30 }
 0x425   : > { %5940 = vmatprep.subr.bf16.mxu1 %v8979_v27  ;;  %5781 = vmatmul.mubr.msk.f32.vlgmr.msra.gmra.mrb[24].mxu0 %vm3241_vm6, %v3722_v16 }
 0x426   : > { %5934 = vmatpush1.bf16.msra.mxu0 %v8980_v22  ;;  %3848 = vmatprep.mubr.f32.mxu0 %v8977_v19 }
 0x427   : > { %5785 = vmatmul.mubr.msk.f32.vlgmr.msra.gmra.mrb[24].mxu1 %vm3241_vm6, %v3722_v16  ;;  %5936 = vmatprep.subr.bf16.mxu0 %v8981_v44 }
 0x428   : > { %5942 = vmatpush1.bf16.msra.mxu1 %v8982_v42  ;;  %3937 = vmatprep.mubr.f32.mxu1 %v8977_v19 }
 0x429   : > { %5944 = vmatprep.subr.bf16.mxu1 %v8983_v47  ;;  %5782 = vmatmul.mubr.msk.f32.gmra.mrb[26].mxu0 %vm3241_vm6, %v3723_v51 }
 0x42a   : > { %5938 = vmatpush1.bf16.msra.mxu0 %v8984_v3  ;;  %3854 = vmatprep.mubr.f32.mxu0 %v8977_v19 }
 0x42b   : > { %5786 = vmatmul.mubr.msk.f32.gmra.mrb[26].mxu1 %vm3241_vm6, %v3723_v51 }
 0x42c   : > { %5946 = vmatpush1.bf16.msra.mxu1 %v8985_v49  ;;  %3943 = vmatprep.mubr.f32.mxu1 %v8977_v19 }
 0x42d   : > { %5783 = vmatmul.mubr.msk.f32.gmra.mrb[28].mxu0 %vm3241_vm6, %v3724_v34 }
 0x42e   : > { %3860 = vmatprep.mubr.f32.mxu0 %v8977_v19 }
 0x42f   : > { %5787 = vmatmul.mubr.msk.f32.gmra.mrb[28].mxu1 %vm3241_vm6, %v3724_v34 }
 0x430   : > { %3949 = vmatprep.mubr.f32.mxu1 %v8977_v19 }
 0x431   : > { %5784 = vmatmul.mubr.msk.f32.gmra.mrb[30].mxu0 %vm3241_vm6, %v3725_v41 }
 0x432   : > { %4053 = vmatprep.mubr.f32.mxu0 %v8977_v19 }
 0x433   : > { %5788 = vmatmul.mubr.msk.f32.gmra.mrb[30].mxu1 %vm3241_vm6, %v3725_v41 }
 0x434   : > { %4142 = vmatprep.mubr.f32.mxu1 %v8977_v19 }
 0x435   : > { %5793 = vmatmul.mubr.msk.f32.vlgmr.msra.gmra.mrb[24].mxu0 %vm3241_vm6, %v5789_v1 }
 0x436   : > { %4059 = vmatprep.mubr.f32.mxu0 %v8977_v19 }
 0x437   : > { %5797 = vmatmul.mubr.msk.f32.vlgmr.msra.gmra.mrb[24].mxu1 %vm3241_vm6, %v5789_v1 }
 0x438   : > { %4148 = vmatprep.mubr.f32.mxu1 %v8977_v19 }
 0x439   : > { %5794 = vmatmul.mubr.msk.f32.gmra.mrb[26].mxu0 %vm3241_vm6, %v5790_v40 }
 0x43a   : > { %4065 = vmatprep.mubr.f32.mxu0 %v8977_v19 }
 0x43b   : > { %5798 = vmatmul.mubr.msk.f32.gmra.mrb[26].mxu1 %vm3241_vm6, %v5790_v40 }
 0x43c   : > { %4154 = vmatprep.mubr.f32.mxu1 %v8977_v19 }
 0x43d   : > { %5795 = vmatmul.mubr.msk.f32.gmra.mrb[28].mxu0 %vm3241_vm6, %v5791_v33 }
 0x43e   : > { %4071 = vmatprep.mubr.f32.mxu0 %v8977_v19 }
 0x43f   : > { %5799 = vmatmul.mubr.msk.f32.gmra.mrb[28].mxu1 %vm3241_vm6, %v5791_v33 }
 0x440   : > { %4160 = vmatprep.mubr.f32.mxu1 %v8977_v19 }
 0x441   : > { %5796 = vmatmul.mubr.msk.f32.gmra.mrb[30].mxu0 %vm3241_vm6, %v5792_v28 }
 0x442   : > { %4346 = vmatprep.mubr.f32.mxu0 %v8977_v19 }
 0x443   : > { %5800 = vmatmul.mubr.msk.f32.gmra.mrb[30].mxu1 %vm3241_vm6, %v5792_v28 }
 0x444   : > { %4435 = vmatprep.mubr.f32.mxu1 %v8977_v19 }
 0x508   : > { %v4055_v23 = vpop.f32.mrb[24].mxu0 }
 0x509   : > { %v6044_v35 = vadd.f32 %v6043_v18, %v4055_v23  ;;  %v4057_v61 = vpop.f32.mrb[25].mxu0 }
 0x50a   : > { %v4144_v63 = vpop.f32.mrb[24].mxu1  ;;  %v6046_v59 = vadd.f32 %v6045_v14, %v4057_v61  ;;  %v4201_v14 = vpop.permute.xlu0 %4200 }
 0x50b   : > { %v6060_v29 = vadd.f32 %v6059_v56, %v4144_v63  ;;  %v4146_v5 = vpop.f32.mrb[25].mxu1  ;;  %v8394_v4 = vadd.f32 %v6044_v35, %v4191_v36 }
 0x50c   : > { %v6062_v57 = vadd.f32 %v6061_v20, %v4146_v5  ;;  %v4061_v60 = vpop.f32.mrb[26].mxu0  ;;  %v8398_v54 = vadd.f32 %v6046_v59, %v4191_v36 }
 0x50d   : > { %v6048_v62 = vadd.f32 %v6047_v45, %v4061_v60  ;;  %v4063_v11 = vpop.f32.mrb[27].mxu0  ;;  %v8402_v26 = vadd.f32 %v6060_v29, %v4191_v36  ;;  %v4229_v21 = vmax.f32 %v8394_v4, 0.0  ;;  %v6071_v45 = vadd.f32 %v8385_v6, %v8294_v0 }
 0x50e   : > { %v4150_v17 = vpop.f32.mrb[26].mxu1  ;;  %v6050_v58 = vadd.f32 %v6049_v31, %v4063_v11  ;;  %v8408_v30 = vadd.f32 %v6062_v57, %v4191_v36  ;;  %v4230_v40 = vmax.f32 %v8398_v54, 0.0  ;;  %v4206_v57 = vpop.permute.xlu1 %4205 }
 0x50f   : > { %v8404_v7 = vadd.f32 %v6048_v62, %v4196_v46  ;;  %v6064_v52 = vadd.f32 %v6063_v8, %v4150_v17  ;;  %v4152_v25 = vpop.f32.mrb[27].mxu1  ;;  %v4231_v2 = vmax.f32 %v8402_v26, 0.0 }
 0x510   : > { %v8410_v12 = vadd.f32 %v6050_v58, %v4196_v46  ;;  %v6066_v32 = vadd.f32 %v6065_v53, %v4152_v25  ;;  %v4067_v16 = vpop.f32.mrb[28].mxu0  ;;  %v4232_v35 = vmax.f32 %v8408_v30, 0.0  ;;  %v6073_v53 = vadd.f32 %v8385_v6, %v8298_v10 }
 0x511   : > { %v4233_v51 = vmax.f32 %v8404_v7, 0.0  ;;  %v8416_v34 = vadd.f32 %v6064_v52, %v4196_v46  ;;  %v6052_v41 = vadd.f32 %v6051_v48, %v4067_v16  ;;  %v4069_v1 = vpop.f32.mrb[29].mxu0 }
 0x512   : > { %v4234_v43 = vmax.f32 %v8410_v12, 0.0  ;;  %v8420_v33 = vadd.f32 %v6066_v32, %v4196_v46  ;;  %v4156_v28 = vpop.f32.mrb[28].mxu1  ;;  %v6054_v55 = vadd.f32 %v6053_v9, %v4069_v1 }
 0x513   : > { %v5949_v13 = vpack.c.bf16 %v4233_v51, %v4229_v21  ;;  %v4235_v24 = vmax.f32 %v8416_v34, 0.0  ;;  %v6068_v18 = vadd.f32 %v6067_v38, %v4156_v28  ;;  %v4158_v23 = vpop.f32.mrb[29].mxu1  ;;  %v8426_v29 = vadd.f32 %v6052_v41, %v4201_v14  ;;  %v5807_v28 = vld [vmem:[%s8689_s6 + $0x30] sm:$0xff] }
 0x514   : > { %v4236_v56 = vmax.f32 %v8420_v33, 0.0  ;;  %v6070_v61 = vadd.f32 %v6069_v39, %v4158_v23  ;;  %v4073_v63 = vpop.f32.mrb[30].mxu0  ;;  %v5947_v59 = vpack.c.bf16 %v4234_v43, %v4230_v40  ;;  %v8430_v60 = vadd.f32 %v6054_v55, %v4201_v14  ;;  %v5805_v40 = vld [vmem:[%s8689_s6 + $0x20] sm:$0xff]  ;;  %v5806_v43 = vld [vmem:[%s8689_s6 + $0x28] sm:$0xff]  ;;  %v5808_v55 = vld [vmem:[%s8689_s6 + $0x38] sm:$0xff] }
 0x515   : > { %v5957_v20 = vpack.c.bf16 %v4235_v24, %v4231_v2  ;;  %v6056_v5 = vadd.f32 %v6055_v15, %v4073_v63  ;;  %v4075_v36 = vpop.f32.mrb[31].mxu0  ;;  %v8434_v11 = vadd.f32 %v6068_v18, %v4201_v14  ;;  %v4237_v9 = vmax.f32 %v8426_v29, 0.0  ;;  %v4253_v24 = vpop.permute.xlu0 %4252 }
 0x516   : > { %v4162_v8 = vpop.f32.mrb[30].mxu1  ;;  %v6058_v31 = vadd.f32 %v6057_v37, %v4075_v36  ;;  %5948 = vmatprep.subr.bf16.mxu0 %v5947_v59  ;;  %v5955_v62 = vpack.c.bf16 %v4236_v56, %v4232_v35  ;;  %v8438_v17 = vadd.f32 %v6070_v61, %v4201_v14  ;;  %v4238_v6 = vmax.f32 %v8430_v60, 0.0  ;;  %v4258_v35 = vpop.permute.xlu1 %4257 }
 0x517   : > { %v8436_v48 = vadd.f32 %v6056_v5, %v4206_v57  ;;  %v6072_v38 = vadd.f32 %v6071_v45, %v4162_v8  ;;  %v4164_v46 = vpop.f32.mrb[31].mxu1  ;;  %5950 = vmatpush1.bf16.msra.mxu0 %v5949_v13  ;;  %v4239_v15 = vmax.f32 %v8434_v11, 0.0 }
 0x518   : > { %v8440_v0 = vadd.f32 %v6058_v31, %v4206_v57  ;;  %v6074_v58 = vadd.f32 %v6073_v53, %v4164_v46  ;;  %5956 = vmatprep.subr.bf16.mxu1 %v5955_v62  ;;  %v4240_v37 = vmax.f32 %v8438_v17, 0.0 }
 0x519   : > { %v4241_v39 = vmax.f32 %v8436_v48, 0.0  ;;  %v8444_v10 = vadd.f32 %v6072_v38, %v4206_v57  ;;  %5958 = vmatpush1.bf16.msra.mxu1 %v5957_v20 }
 0x51a   : > { %v4242_v52 = vmax.f32 %v8440_v0, 0.0  ;;  %v8448_v25 = vadd.f32 %v6074_v58, %v4206_v57 }
 0x51b   : > { %v5953_v32 = vpack.c.bf16 %v4241_v39, %v4237_v9  ;;  %v4243_v16 = vmax.f32 %v8444_v10, 0.0 }
 0x51c   : > { %v4244_v21 = vmax.f32 %v8448_v25, 0.0  ;;  %v5951_v51 = vpack.c.bf16 %v4242_v52, %v4238_v6 }
 0x51d   : > { %v5961_v41 = vpack.c.bf16 %v4243_v16, %v4239_v15  ;;  %v4263_v15 = vpop.permute.xlu0 %4262 }
 0x51e   : > { %5952 = vmatprep.subr.bf16.mxu0 %v5951_v51  ;;  %v5959_v1 = vpack.c.bf16 %v4244_v21, %v4240_v37 }
 0x51f   : > { %5954 = vmatpush1.bf16.msra.mxu0 %v5953_v32 }
 0x520   : > { %5960 = vmatprep.subr.bf16.mxu1 %v5959_v1 }
 0x521   : > { %5962 = vmatpush1.bf16.msra.mxu1 %v5961_v41 }
 0x522   : > { %5813 = vmatmul.mubr.msk.f32.vlgmr.msra.gmra.mrb[32].mxu0 %vm3241_vm6, %v5805_v40 }
 0x523   : > { %4352 = vmatprep.mubr.f32.mxu0 %v8977_v19 }
 0x524   : > { %5817 = vmatmul.mubr.msk.f32.vlgmr.msra.gmra.mrb[32].mxu1 %vm3241_vm6, %v5805_v40  ;;  %v4268_v40 = vpop.permute.xlu1 %4267 }
 0x525   : > { %4441 = vmatprep.mubr.f32.mxu1 %v8977_v19 }
 0x526   : > { %5814 = vmatmul.mubr.msk.f32.gmra.mrb[34].mxu0 %vm3241_vm6, %v5806_v43 }
 0x527   : > { %4358 = vmatprep.mubr.f32.mxu0 %v8977_v19 }
 0x528   : > { %5818 = vmatmul.mubr.msk.f32.gmra.mrb[34].mxu1 %vm3241_vm6, %v5806_v43 }
 0x529   : > { %4447 = vmatprep.mubr.f32.mxu1 %v8977_v19 }
 0x52a   : > { %5815 = vmatmul.mubr.msk.f32.gmra.mrb[36].mxu0 %vm3241_vm6, %v5807_v28 }
 0x52b   : > { %4364 = vmatprep.mubr.f32.mxu0 %v8977_v19 }
 0x52c   : > { %5819 = vmatmul.mubr.msk.f32.gmra.mrb[36].mxu1 %vm3241_vm6, %v5807_v28 }
 0x52d   : > { %4453 = vmatprep.mubr.f32.mxu1 %v8977_v19 }
 0x52e   : > { %5816 = vmatmul.mubr.msk.f32.gmra.mrb[38].mxu0 %vm3241_vm6, %v5808_v55 }
 0x52f   : > { %4582 = vmatprep.mubr.f32.mxu0 %v8977_v19 }
 0x530   : > { %5820 = vmatmul.mubr.msk.f32.gmra.mrb[38].mxu1 %vm3241_vm6, %v5808_v55 }
 0x531   : > { %4671 = vmatprep.mubr.f32.mxu1 %v8977_v19 }
 0x5f5   : > { %v4348_v2 = vpop.f32.mrb[32].mxu0 }
 0x5f6   : > { %v4350_v13 = vpop.f32.mrb[33].mxu0  ;;  %v4349_v23 = vadd.f32 %v4348_v2, %v4253_v24 }
 0x5f7   : > { %v4437_v18 = vpop.f32.mrb[32].mxu1  ;;  %v4351_v56 = vadd.f32 %v4350_v13, %v4253_v24 }
 0x5f8   : > { %v4439_v14 = vpop.f32.mrb[33].mxu1  ;;  %v4438_v63 = vadd.f32 %v4437_v18, %v4253_v24  ;;  %v4465_v57 = vmax.f32 %v4349_v23, 0.0 }
 0x5f9   : > { %v4354_v61 = vpop.f32.mrb[34].mxu0  ;;  %v4440_v5 = vadd.f32 %v4439_v14, %v4253_v24  ;;  %v4466_v62 = vmax.f32 %v4351_v56, 0.0 }
 0x5fa   : > { %v4355_v59 = vadd.f32 %v4354_v61, %v4258_v35  ;;  %v4356_v20 = vpop.f32.mrb[35].mxu0  ;;  %v4467_v9 = vmax.f32 %v4438_v63, 0.0 }
 0x5fb   : > { %v4443_v45 = vpop.f32.mrb[34].mxu1  ;;  %v4357_v36 = vadd.f32 %v4356_v20, %v4258_v35  ;;  %v4468_v32 = vmax.f32 %v4440_v5, 0.0 }
 0x5fc   : > { %v4469_v8 = vmax.f32 %v4355_v59, 0.0  ;;  %v4444_v31 = vadd.f32 %v4443_v45, %v4258_v35  ;;  %v4445_v53 = vpop.f32.mrb[35].mxu1 }
 0x5fd   : > { %v4470_v38 = vmax.f32 %v4357_v36, 0.0  ;;  %v4446_v46 = vadd.f32 %v4445_v53, %v4258_v35  ;;  %v4360_v58 = vpop.f32.mrb[36].mxu0 }
 0x5fe   : > { %v5965_v39 = vpack.c.bf16 %v4469_v8, %v4465_v57  ;;  %v4471_v6 = vmax.f32 %v4444_v31, 0.0  ;;  %v4362_v52 = vpop.f32.mrb[37].mxu0  ;;  %v4361_v41 = vadd.f32 %v4360_v58, %v4263_v15  ;;  %v4462_v58 = vld [vmem:[#allocation2 + $0x28] sm:$0xff] }
 0x5ff   : > { %v5963_v16 = vpack.c.bf16 %v4470_v38, %v4466_v62  ;;  %v4472_v37 = vmax.f32 %v4446_v46, 0.0  ;;  %v4449_v21 = vpop.f32.mrb[36].mxu1  ;;  %v4363_v28 = vadd.f32 %v4362_v52, %v4263_v15  ;;  %v4461_v46 = vld [vmem:[#allocation2 + $0x20] sm:$0xff] }
 0x600   : > { %v5973_v51 = vpack.c.bf16 %v4471_v6, %v4467_v9  ;;  %v4451_v1 = vpop.f32.mrb[37].mxu1  ;;  %v4450_v2 = vadd.f32 %v4449_v21, %v4263_v15  ;;  %v4473_v35 = vmax.f32 %v4361_v41, 0.0 }
 0x601   : > { %v5971_v43 = vpack.c.bf16 %v4472_v37, %v4468_v32  ;;  %v4366_v55 = vpop.f32.mrb[38].mxu0  ;;  %5964 = vmatprep.subr.bf16.mxu0 %v5963_v16  ;;  %v4452_v18 = vadd.f32 %v4451_v1, %v4263_v15  ;;  %v4474_v59 = vmax.f32 %v4363_v28, 0.0 }
 0x602   : > { %v4367_v13 = vadd.f32 %v4366_v55, %v4268_v40  ;;  %v4368_v24 = vpop.f32.mrb[39].mxu0  ;;  %5966 = vmatpush1.bf16.msra.mxu0 %v5965_v39  ;;  %v4475_v45 = vmax.f32 %v4450_v2, 0.0 }
 0x603   : > { %v4455_v23 = vpop.f32.mrb[38].mxu1  ;;  %5972 = vmatprep.subr.bf16.mxu1 %v5971_v43  ;;  %v4369_v14 = vadd.f32 %v4368_v24, %v4268_v40  ;;  %v4476_v8 = vmax.f32 %v4452_v18, 0.0 }
 0x604   : > { %v4477_v56 = vmax.f32 %v4367_v13, 0.0  ;;  %v4456_v61 = vadd.f32 %v4455_v23, %v4268_v40  ;;  %v4457_v63 = vpop.f32.mrb[39].mxu1  ;;  %5974 = vmatpush1.bf16.msra.mxu1 %v5973_v51 }
 0x605   : > { %v4478_v20 = vmax.f32 %v4369_v14, 0.0  ;;  %v4458_v5 = vadd.f32 %v4457_v63, %v4268_v40 }
 0x606   : > { %v5969_v36 = vpack.c.bf16 %v4477_v56, %v4473_v35  ;;  %v4479_v57 = vmax.f32 %v4456_v61, 0.0 }
 0x607   : > { %v5967_v31 = vpack.c.bf16 %v4478_v20, %v4474_v59  ;;  %v4480_v53 = vmax.f32 %v4458_v5, 0.0 }
 0x608   : > { %v5977_v62 = vpack.c.bf16 %v4479_v57, %v4475_v45 }
 0x609   : > { %v5975_v38 = vpack.c.bf16 %v4480_v53, %v4476_v8  ;;  %5968 = vmatprep.subr.bf16.mxu0 %v5967_v31 }
 0x60a   : > { %5970 = vmatpush1.bf16.msra.mxu0 %v5969_v36 }
 0x60b   : > { %5976 = vmatprep.subr.bf16.mxu1 %v5975_v38  ;;  %5980 = vmatprep.subr.bf16.mxu0 %v8978_v50  ;;  %v4463_v50 = vld [vmem:[#allocation2 + $0x30] sm:$0xff] }
 0x60c   : > { %5978 = vmatpush1.bf16.msra.mxu1 %v5977_v62 }
 0x60d   : > { %5988 = vmatprep.subr.bf16.mxu1 %v8979_v27  ;;  %5825 = vmatmul.mubr.msk.f32.vlgmr.msra.gmra.mrb[40].mxu0 %vm3241_vm6, %v4461_v46  ;;  %v4464_v27 = vld [vmem:[#allocation2 + $0x38] sm:$0xff] }
 0x60e   : > { %5982 = vmatpush1.bf16.msra.mxu0 %v8980_v22  ;;  %4588 = vmatprep.mubr.f32.mxu0 %v8977_v19  ;;  %v5833_v22 = vld [vmem:[%s8687_s4 + $0x40] sm:$0xff] }
 0x60f   : > { %5829 = vmatmul.mubr.msk.f32.vlgmr.msra.gmra.mrb[40].mxu1 %vm3241_vm6, %v4461_v46  ;;  %5984 = vmatprep.subr.bf16.mxu0 %v8981_v44  ;;  %v5834_v44 = vld [vmem:[%s8687_s4 + $0x48] sm:$0xff] }
 0x610   : > { %5990 = vmatpush1.bf16.msra.mxu1 %v8982_v42  ;;  %4677 = vmatprep.mubr.f32.mxu1 %v8977_v19  ;;  %v5835_v42 = vld [vmem:[%s8687_s4 + $0x50] sm:$0xff] }
 0x611   : > { %5992 = vmatprep.subr.bf16.mxu1 %v8983_v47  ;;  %5826 = vmatmul.mubr.msk.f32.gmra.mrb[42].mxu0 %vm3241_vm6, %v4462_v58  ;;  %v5836_v47 = vld [vmem:[%s8687_s4 + $0x58] sm:$0xff] }
 0x612   : > { %5986 = vmatpush1.bf16.msra.mxu0 %v8984_v3  ;;  %4594 = vmatprep.mubr.f32.mxu0 %v8977_v19  ;;  %v4489_v3 = vpop.permute.xlu0 %4488 }
 0x613   : > { %5830 = vmatmul.mubr.msk.f32.gmra.mrb[42].mxu1 %vm3241_vm6, %v4462_v58  ;;  %v6075_v39 = vadd.f32 %v4489_v3, %v8394_v4  ;;  %v6077_v15 = vadd.f32 %v4489_v3, %v8398_v54  ;;  %v6091_v16 = vadd.f32 %v4489_v3, %v8402_v26  ;;  %v6093_v41 = vadd.f32 %v4489_v3, %v8408_v30 }
 0x614   : > { %5994 = vmatpush1.bf16.msra.mxu1 %v8985_v49  ;;  %4683 = vmatprep.mubr.f32.mxu1 %v8977_v19  ;;  %v4494_v49 = vpop.permute.xlu1 %4493 }
 0x615   : > { %5827 = vmatmul.mubr.msk.f32.gmra.mrb[44].mxu0 %vm3241_vm6, %v4463_v50  ;;  %v6079_v43 = vadd.f32 %v4494_v49, %v8404_v7  ;;  %v6081_v4 = vadd.f32 %v4494_v49, %v8410_v12  ;;  %v6095_v54 = vadd.f32 %v4494_v49, %v8416_v34  ;;  %v6097_v26 = vadd.f32 %v4494_v49, %v8420_v33 }
 0x616   : > { %4600 = vmatprep.mubr.f32.mxu0 %v8977_v19  ;;  %v4499_v9 = vpop.permute.xlu0 %4498 }
 0x617   : > { %5831 = vmatmul.mubr.msk.f32.gmra.mrb[44].mxu1 %vm3241_vm6, %v4463_v50  ;;  %v6083_v18 = vadd.f32 %v4499_v9, %v8426_v29  ;;  %v6099_v7 = vadd.f32 %v4499_v9, %v8434_v11  ;;  %v6085_v56 = vadd.f32 %v4499_v9, %v8430_v60  ;;  %v6101_v59 = vadd.f32 %v4499_v9, %v8438_v17 }
 0x618   : > { %4689 = vmatprep.mubr.f32.mxu1 %v8977_v19  ;;  %v8535_v6 = vpop.permute.xlu1 %4503 }
 0x619   : > { %5828 = vmatmul.mubr.msk.f32.gmra.mrb[46].mxu0 %vm3241_vm6, %v4464_v27  ;;  %v6087_v45 = vadd.f32 %v8535_v6, %v8436_v48 }
 0x61a   : > { %4793 = vmatprep.mubr.f32.mxu0 %v8977_v19  ;;  %v4931_v2 = vpop.permute.xlu0 %4930 }
 0x61b   : > { %5832 = vmatmul.mubr.msk.f32.gmra.mrb[46].mxu1 %vm3241_vm6, %v4464_v27  ;;  %v6089_v27 = vadd.f32 %v8535_v6, %v8440_v0 }
 0x61c   : > { %4882 = vmatprep.mubr.f32.mxu1 %v8977_v19  ;;  %v4936_v23 = vpop.permute.xlu1 %4935 }
 0x61d   : > { %5837 = vmatmul.mubr.msk.f32.vlgmr.msra.gmra.mrb[40].mxu0 %vm3241_vm6, %v5833_v22 }
 0x61e   : > { %4799 = vmatprep.mubr.f32.mxu0 %v8977_v19  ;;  %v4941_v49 = vpop.permute.xlu0 %4940 }
 0x61f   : > { %5841 = vmatmul.mubr.msk.f32.vlgmr.msra.gmra.mrb[40].mxu1 %vm3241_vm6, %v5833_v22 }
 0x620   : > { %4888 = vmatprep.mubr.f32.mxu1 %v8977_v19 }
 0x621   : > { %5838 = vmatmul.mubr.msk.f32.gmra.mrb[42].mxu0 %vm3241_vm6, %v5834_v44 }
 0x622   : > { %4805 = vmatprep.mubr.f32.mxu0 %v8977_v19 }
 0x623   : > { %5842 = vmatmul.mubr.msk.f32.gmra.mrb[42].mxu1 %vm3241_vm6, %v5834_v44 }
 0x624   : > { %4894 = vmatprep.mubr.f32.mxu1 %v8977_v19 }
 0x625   : > { %5839 = vmatmul.mubr.msk.f32.gmra.mrb[44].mxu0 %vm3241_vm6, %v5835_v42 }
 0x626   : > { %4811 = vmatprep.mubr.f32.mxu0 %v8977_v19 }
 0x627   : > { %5843 = vmatmul.mubr.msk.f32.gmra.mrb[44].mxu1 %vm3241_vm6, %v5835_v42 }
 0x628   : > { %4900 = vmatprep.mubr.f32.mxu1 %v8977_v19 }
 0x629   : > { %5840 = vmatmul.mubr.msk.f32.gmra.mrb[46].mxu0 %vm3241_vm6, %v5836_v47 }
 0x62a   : > { %5086 = vmatprep.mubr.f32.mxu0 %v8977_v19 }
 0x62b   : > { %5844 = vmatmul.mubr.msk.f32.gmra.mrb[46].mxu1 %vm3241_vm6, %v5836_v47 }
 0x62c   : > { %5175 = vmatprep.mubr.f32.mxu1 %v8977_v19 }
 0x6f0   : > { %v4795_v52 = vpop.f32.mrb[40].mxu0 }
 0x6f1   : > { %v6076_v32 = vadd.f32 %v6075_v39, %v4795_v52  ;;  %v4797_v37 = vpop.f32.mrb[41].mxu0 }
 0x6f2   : > { %v4884_v21 = vpop.f32.mrb[40].mxu1  ;;  %v6078_v51 = vadd.f32 %v6077_v15, %v4797_v37  ;;  %v6103_v15 = vadd.f32 %v8535_v6, %v8444_v10 }
 0x6f3   : > { %v6092_v1 = vadd.f32 %v6091_v16, %v4884_v21  ;;  %v4886_v40 = vpop.f32.mrb[41].mxu1  ;;  %v8549_v61 = vadd.f32 %v6076_v32, %v4931_v2  ;;  %v4946_v16 = vpop.permute.xlu1 %4945 }
 0x6f4   : > { %v6094_v28 = vadd.f32 %v6093_v41, %v4886_v40  ;;  %v4801_v55 = vpop.f32.mrb[42].mxu0  ;;  %v8545_v14 = vadd.f32 %v6078_v51, %v4931_v2  ;;  %v6105_v51 = vadd.f32 %v8535_v6, %v8448_v25 }
 0x6f5   : > { %v6080_v13 = vadd.f32 %v6079_v43, %v4801_v55  ;;  %v4803_v24 = vpop.f32.mrb[43].mxu0  ;;  %v8560_v11 = vadd.f32 %v6092_v1, %v4931_v2  ;;  %v4969_v46 = vmax.f32 %v8549_v61, 0.0 }
 0x6f6   : > { %v4890_v30 = vpop.f32.mrb[42].mxu1  ;;  %v6082_v35 = vadd.f32 %v6081_v4, %v4803_v24  ;;  %v8554_v33 = vadd.f32 %v6094_v28, %v4931_v2  ;;  %v4970_v31 = vmax.f32 %v8545_v14, 0.0 }
 0x6f7   : > { %v8551_v12 = vadd.f32 %v6080_v13, %v4936_v23  ;;  %v6096_v63 = vadd.f32 %v6095_v54, %v4890_v30  ;;  %v4892_v34 = vpop.f32.mrb[43].mxu1  ;;  %v4971_v9 = vmax.f32 %v8560_v11, 0.0 }
 0x6f8   : > { %v8556_v29 = vadd.f32 %v6082_v35, %v4936_v23  ;;  %v6098_v20 = vadd.f32 %v6097_v26, %v4892_v34  ;;  %v4807_v5 = vpop.f32.mrb[44].mxu0  ;;  %v4972_v22 = vmax.f32 %v8554_v33, 0.0 }
 0x6f9   : > { %v4973_v60 = vmax.f32 %v8551_v12, 0.0  ;;  %v8563_v36 = vadd.f32 %v6096_v63, %v4936_v23  ;;  %v6084_v57 = vadd.f32 %v6083_v18, %v4807_v5  ;;  %v4809_v8 = vpop.f32.mrb[45].mxu0  ;;  %v5850_v5 = vld [vmem:[%s8689_s6 + $0x48] sm:$0xff] }
 0x6fa   : > { %v4974_v17 = vmax.f32 %v8556_v29, 0.0  ;;  %v8567_v53 = vadd.f32 %v6098_v20, %v4936_v23  ;;  %v4896_v62 = vpop.f32.mrb[44].mxu1  ;;  %v6086_v38 = vadd.f32 %v6085_v56, %v4809_v8  ;;  %v5849_v20 = vld [vmem:[%s8689_s6 + $0x40] sm:$0xff] }
 0x6fb   : > { %v4975_v48 = vmax.f32 %v8563_v36, 0.0  ;;  %v6100_v58 = vadd.f32 %v6099_v7, %v4896_v62  ;;  %v4898_v50 = vpop.f32.mrb[45].mxu1  ;;  %v5997_v39 = vpack.c.bf16 %v4973_v60, %v4969_v46  ;;  %v8582_v40 = vadd.f32 %v6084_v57, %v4941_v49  ;;  %v5852_v60 = vld [vmem:[%s8689_s6 + $0x58] sm:$0xff]  ;;  %v4998_v46 = vpop.permute.xlu1 %4997 }
 0x6fc   : > { %v4976_v44 = vmax.f32 %v8567_v53, 0.0  ;;  %v6102_v42 = vadd.f32 %v6101_v59, %v4898_v50  ;;  %v4813_v47 = vpop.f32.mrb[46].mxu0  ;;  %v5995_v3 = vpack.c.bf16 %v4974_v17, %v4970_v31  ;;  %v8578_v37 = vadd.f32 %v6086_v38, %v4941_v49  ;;  %v4993_v31 = vpop.permute.xlu0 %4992 }
 0x6fd   : > { %v6088_v52 = vadd.f32 %v6087_v45, %v4813_v47  ;;  %v4815_v32 = vpop.f32.mrb[47].mxu0  ;;  %v6005_v1 = vpack.c.bf16 %v4975_v48, %v4971_v9  ;;  %v8590_v13 = vadd.f32 %v6100_v58, %v4941_v49  ;;  %v4977_v18 = vmax.f32 %v8582_v40, 0.0  ;;  %v5851_v45 = vld [vmem:[%s8689_s6 + $0x50] sm:$0xff] }
 0x6fe   : > { %v4902_v0 = vpop.f32.mrb[46].mxu1  ;;  %v6090_v21 = vadd.f32 %v6089_v27, %v4815_v32  ;;  %5996 = vmatprep.subr.bf16.mxu0 %v5995_v3  ;;  %v6003_v41 = vpack.c.bf16 %v4976_v44, %v4972_v22  ;;  %v8586_v10 = vadd.f32 %v6102_v42, %v4941_v49  ;;  %v4978_v54 = vmax.f32 %v8578_v37, 0.0 }
 0x6ff   : > { %v8584_v43 = vadd.f32 %v6088_v52, %v4946_v16  ;;  %v6104_v28 = vadd.f32 %v6103_v15, %v4902_v0  ;;  %v4904_v55 = vpop.f32.mrb[47].mxu1  ;;  %5998 = vmatpush1.bf16.msra.mxu0 %v5997_v39  ;;  %v4979_v56 = vmax.f32 %v8590_v13, 0.0 }
 0x700   : > { %v8588_v4 = vadd.f32 %v6090_v21, %v4946_v16  ;;  %v6106_v2 = vadd.f32 %v6105_v51, %v4904_v55  ;;  %6004 = vmatprep.subr.bf16.mxu1 %v6003_v41  ;;  %v4980_v30 = vmax.f32 %v8586_v10, 0.0 }
 0x701   : > { %v4981_v25 = vmax.f32 %v8584_v43, 0.0  ;;  %v8593_v6 = vadd.f32 %v6104_v28, %v4946_v16  ;;  %6006 = vmatpush1.bf16.msra.mxu1 %v6005_v1  ;;  %v5003_v1 = vpop.permute.xlu0 %5002 }
 0x702   : > { %v4982_v24 = vmax.f32 %v8588_v4, 0.0  ;;  %v8597_v26 = vadd.f32 %v6106_v2, %v4946_v16 }
 0x703   : > { %v4983_v23 = vmax.f32 %v8593_v6, 0.0  ;;  %v6001_v63 = vpack.c.bf16 %v4981_v25, %v4977_v18 }
 0x704   : > { %v4984_v35 = vmax.f32 %v8597_v26, 0.0  ;;  %v5999_v7 = vpack.c.bf16 %v4982_v24, %v4978_v54 }
 0x705   : > { %v6009_v59 = vpack.c.bf16 %v4983_v23, %v4979_v56  ;;  %v5008_v23 = vpop.permute.xlu1 %5007 }
 0x706   : > { %6000 = vmatprep.subr.bf16.mxu0 %v5999_v7  ;;  %v6007_v34 = vpack.c.bf16 %v4984_v35, %v4980_v30 }
 0x707   : > { %6002 = vmatpush1.bf16.msra.mxu0 %v6001_v63 }
 0x708   : > { %6008 = vmatprep.subr.bf16.mxu1 %v6007_v34 }
 0x709   : > { %6010 = vmatpush1.bf16.msra.mxu1 %v6009_v59 }
 0x70a   : > { %5857 = vmatmul.mubr.msk.f32.vlgmr.msra.gmra.mrb[48].mxu0 %vm3241_vm6, %v5849_v20 }
 0x70b   : > { %5092 = vmatprep.mubr.f32.mxu0 %v8977_v19 }
 0x70c   : > { %5861 = vmatmul.mubr.msk.f32.vlgmr.msra.gmra.mrb[48].mxu1 %vm3241_vm6, %v5849_v20 }
 0x70d   : > { %5181 = vmatprep.mubr.f32.mxu1 %v8977_v19 }
 0x70e   : > { %5858 = vmatmul.mubr.msk.f32.gmra.mrb[50].mxu0 %vm3241_vm6, %v5850_v5 }
 0x70f   : > { %5098 = vmatprep.mubr.f32.mxu0 %v8977_v19 }
 0x710   : > { %5862 = vmatmul.mubr.msk.f32.gmra.mrb[50].mxu1 %vm3241_vm6, %v5850_v5 }
 0x711   : > { %5187 = vmatprep.mubr.f32.mxu1 %v8977_v19 }
 0x712   : > { %5859 = vmatmul.mubr.msk.f32.gmra.mrb[52].mxu0 %vm3241_vm6, %v5851_v45 }
 0x713   : > { %5104 = vmatprep.mubr.f32.mxu0 %v8977_v19 }
 0x714   : > { %5863 = vmatmul.mubr.msk.f32.gmra.mrb[52].mxu1 %vm3241_vm6, %v5851_v45 }
 0x715   : > { %5193 = vmatprep.mubr.f32.mxu1 %v8977_v19 }
 0x716   : > { %5860 = vmatmul.mubr.msk.f32.gmra.mrb[54].mxu0 %vm3241_vm6, %v5852_v60 }
 0x717   : > { %5322 = vmatprep.mubr.f32.mxu0 %v8977_v19 }
 0x718   : > { %5864 = vmatmul.mubr.msk.f32.gmra.mrb[54].mxu1 %vm3241_vm6, %v5852_v60 }
 0x719   : > { %5411 = vmatprep.mubr.f32.mxu1 %v8977_v19 }
 0x7dd   : > { %v5088_v57 = vpop.f32.mrb[48].mxu0 }
 0x7de   : > { %v5090_v8 = vpop.f32.mrb[49].mxu0  ;;  %v5089_v62 = vadd.f32 %v5088_v57, %v4993_v31 }
 0x7df   : > { %v5177_v17 = vpop.f32.mrb[48].mxu1  ;;  %v5091_v48 = vadd.f32 %v5090_v8, %v4993_v31 }
 0x7e0   : > { %v5179_v38 = vpop.f32.mrb[49].mxu1  ;;  %v5178_v50 = vadd.f32 %v5177_v17, %v4993_v31  ;;  %v5205_v3 = vmax.f32 %v5089_v62, 0.0 }
 0x7e1   : > { %v5094_v58 = vpop.f32.mrb[50].mxu0  ;;  %v5180_v44 = vadd.f32 %v5179_v38, %v4993_v31  ;;  %v5206_v52 = vmax.f32 %v5091_v48, 0.0 }
 0x7e2   : > { %v5095_v27 = vadd.f32 %v5094_v58, %v4998_v46  ;;  %v5096_v22 = vpop.f32.mrb[51].mxu0  ;;  %v5207_v0 = vmax.f32 %v5178_v50, 0.0 }
 0x7e3   : > { %v5183_v42 = vpop.f32.mrb[50].mxu1  ;;  %v5097_v47 = vadd.f32 %v5096_v22, %v4998_v46  ;;  %v5208_v28 = vmax.f32 %v5180_v44, 0.0 }
 0x7e4   : > { %v5209_v49 = vmax.f32 %v5095_v27, 0.0  ;;  %v5184_v9 = vadd.f32 %v5183_v42, %v4998_v46  ;;  %v5185_v39 = vpop.f32.mrb[51].mxu1  ;;  %v5201_v42 = vld [vmem:[#allocation2 + $0x40] sm:$0xff] }
 0x7e5   : > { %v5210_v15 = vmax.f32 %v5097_v47, 0.0  ;;  %v5186_v32 = vadd.f32 %v5185_v39, %v4998_v46  ;;  %v5100_v16 = vpop.f32.mrb[52].mxu0  ;;  %v5202_v47 = vld [vmem:[#allocation2 + $0x48] sm:$0xff] }
 0x7e6   : > { %v6013_v21 = vpack.c.bf16 %v5209_v49, %v5205_v3  ;;  %v5211_v51 = vmax.f32 %v5184_v9, 0.0  ;;  %v5102_v41 = vpop.f32.mrb[53].mxu0  ;;  %v5101_v24 = vadd.f32 %v5100_v16, %v5003_v1  ;;  %v5203_v3 = vld [vmem:[#allocation2 + $0x50] sm:$0xff]  ;;  %v5204_v49 = vld [vmem:[#allocation2 + $0x58] sm:$0xff]  ;;  %v5229_v9 = vpop.permute.xlu0 %5228 }
 0x7e7   : > { %v6011_v55 = vpack.c.bf16 %v5210_v15, %v5206_v52  ;;  %v5212_v2 = vmax.f32 %v5186_v32, 0.0  ;;  %v5189_v25 = vpop.f32.mrb[52].mxu1  ;;  %v5103_v35 = vadd.f32 %v5102_v41, %v5003_v1 }
 0x7e8   : > { %v6021_v54 = vpack.c.bf16 %v5211_v51, %v5207_v0  ;;  %v5191_v18 = vpop.f32.mrb[53].mxu1  ;;  %v5190_v56 = vadd.f32 %v5189_v25, %v5003_v1  ;;  %v5213_v45 = vmax.f32 %v5101_v24, 0.0  ;;  %v5234_v51 = vpop.permute.xlu1 %5233 }
 0x7e9   : > { %v6019_v30 = vpack.c.bf16 %v5212_v2, %v5208_v28  ;;  %v5106_v7 = vpop.f32.mrb[54].mxu0  ;;  %6012 = vmatprep.subr.bf16.mxu0 %v6011_v55  ;;  %v5192_v59 = vadd.f32 %v5191_v18, %v5003_v1  ;;  %v5214_v31 = vmax.f32 %v5103_v35, 0.0 }
 0x7ea   : > { %v5107_v63 = vadd.f32 %v5106_v7, %v5008_v23  ;;  %v5108_v34 = vpop.f32.mrb[55].mxu0  ;;  %6014 = vmatpush1.bf16.msra.mxu0 %v6013_v21  ;;  %v5215_v38 = vmax.f32 %v5190_v56, 0.0  ;;  %v5239_v35 = vpop.permute.xlu0 %5238 }
 0x7eb   : > { %v5195_v20 = vpop.f32.mrb[54].mxu1  ;;  %6020 = vmatprep.subr.bf16.mxu1 %v6019_v30  ;;  %v5109_v5 = vadd.f32 %v5108_v34, %v5008_v23  ;;  %v5216_v58 = vmax.f32 %v5192_v59, 0.0 }
 0x7ec   : > { %v5217_v60 = vmax.f32 %v5107_v63, 0.0  ;;  %v5196_v57 = vadd.f32 %v5195_v20, %v5008_v23  ;;  %v5197_v8 = vpop.f32.mrb[55].mxu1  ;;  %6022 = vmatpush1.bf16.msra.mxu1 %v6021_v54 }
 0x7ed   : > { %v5218_v17 = vmax.f32 %v5109_v5, 0.0  ;;  %v5198_v62 = vadd.f32 %v5197_v8, %v5008_v23 }
 0x7ee   : > { %v6017_v46 = vpack.c.bf16 %v5217_v60, %v5213_v45  ;;  %v5219_v48 = vmax.f32 %v5196_v57, 0.0 }
 0x7ef   : > { %v6015_v50 = vpack.c.bf16 %v5218_v17, %v5214_v31  ;;  %v5220_v27 = vmax.f32 %v5198_v62, 0.0 }
 0x7f0   : > { %v6025_v22 = vpack.c.bf16 %v5219_v48, %v5215_v38 }
 0x7f1   : > { %v6023_v44 = vpack.c.bf16 %v5220_v27, %v5216_v58  ;;  %6016 = vmatprep.subr.bf16.mxu0 %v6015_v50 }
 0x7f2   : > { %6018 = vmatpush1.bf16.msra.mxu0 %v6017_v46 }
 0x7f3   : > { %6024 = vmatprep.subr.bf16.mxu1 %v6023_v44 }
 0x7f4   : > { %6026 = vmatpush1.bf16.msra.mxu1 %v6025_v22 }
 0x7f5   : > { %5869 = vmatmul.mubr.msk.f32.vlgmr.msra.gmra.mrb[56].mxu0 %vm3241_vm6, %v5201_v42 }
 0x7f6   : > { %5328 = vmatprep.mubr.f32.mxu0 %v8977_v19 }
 0x7f7   : > { %5873 = vmatmul.mubr.msk.f32.vlgmr.msra.gmra.mrb[56].mxu1 %vm3241_vm6, %v5201_v42 }
 0x7f8   : > { %5417 = vmatprep.mubr.f32.mxu1 %v8977_v19 }
 0x7f9   : > { %5870 = vmatmul.mubr.msk.f32.gmra.mrb[58].mxu0 %vm3241_vm6, %v5202_v47 }
 0x7fa   : > { %5334 = vmatprep.mubr.f32.mxu0 %v8977_v19 }
 0x7fb   : > { %5874 = vmatmul.mubr.msk.f32.gmra.mrb[58].mxu1 %vm3241_vm6, %v5202_v47 }
 0x7fc   : > { %5423 = vmatprep.mubr.f32.mxu1 %v8977_v19 }
 0x7fd   : > { %5871 = vmatmul.mubr.msk.f32.gmra.mrb[60].mxu0 %vm3241_vm6, %v5203_v3 }
 0x7fe   : > { %5340 = vmatprep.mubr.f32.mxu0 %v8977_v19 }
 0x7ff   : > { %5875 = vmatmul.mubr.msk.f32.gmra.mrb[60].mxu1 %vm3241_vm6, %v5203_v3 }
 0x800   : > { %5429 = vmatprep.mubr.f32.mxu1 %v8977_v19 }
 0x801   : > { %5872 = vmatmul.mubr.msk.f32.gmra.mrb[62].mxu0 %vm3241_vm6, %v5204_v49 }
 0x802   : > { %5542 = vmatprep.mubr.f32.mxu0 %v8977_v19 }
 0x803   : > { %5876 = vmatmul.mubr.msk.f32.gmra.mrb[62].mxu1 %vm3241_vm6, %v5204_v49 }
 0x804   : > { %5613 = vmatprep.mubr.f32.mxu1 %v8977_v19 }
 0x8c8   : > { %v5324_v39 = vpop.f32.mrb[56].mxu0 }
 0x8c9   : > { %v5325_v52 = vadd.f32 %v5324_v39, %v5229_v9  ;;  %v5326_v15 = vpop.f32.mrb[57].mxu0 }
 0x8ca   : > { %v5413_v32 = vpop.f32.mrb[56].mxu1  ;;  %v5327_v16 = vadd.f32 %v5326_v15, %v5229_v9 }
 0x8cb   : > { %v5414_v0 = vadd.f32 %v5413_v32, %v5229_v9  ;;  %v5415_v21 = vpop.f32.mrb[57].mxu1  ;;  %v5436_v28 = vadd.f32 %v5325_v52, %v8549_v61 }
 0x8cc   : > { %v5416_v41 = vadd.f32 %v5415_v21, %v5229_v9  ;;  %v5330_v1 = vpop.f32.mrb[58].mxu0  ;;  %v5437_v25 = vadd.f32 %v5327_v16, %v8545_v14 }
 0x8cd   : > { %v5331_v55 = vadd.f32 %v5330_v1, %v5234_v51  ;;  %v5332_v2 = vpop.f32.mrb[59].mxu0  ;;  %v5438_v19 = vadd.f32 %v5414_v0, %v8560_v11  ;;  %v5453_v61 = vmax.f32 %v5436_v28, 0.0 }
 0x8ce   : > { %v5419_v54 = vpop.f32.mrb[58].mxu1  ;;  %v5333_v24 = vadd.f32 %v5332_v2, %v5234_v51  ;;  %v5439_v7 = vadd.f32 %v5416_v41, %v8554_v33  ;;  %v5454_v45 = vmax.f32 %v5437_v25, 0.0 }
 0x8cf   : > { %v5440_v18 = vadd.f32 %v5331_v55, %v8551_v12  ;;  %v5420_v23 = vadd.f32 %v5419_v54, %v5234_v51  ;;  %v5421_v30 = vpop.f32.mrb[59].mxu1  ;;  %v5455_v8 = vmax.f32 %v5438_v19, 0.0 }
 0x8d0   : > { %v5441_v56 = vadd.f32 %v5333_v24, %v8556_v29  ;;  %v5422_v63 = vadd.f32 %v5421_v30, %v5234_v51  ;;  %v5336_v34 = vpop.f32.mrb[60].mxu0  ;;  %v5244_v29 = vpop.permute.xlu1 %5243  ;;  %v5456_v38 = vmax.f32 %v5439_v7, 0.0 }
 0x8d1   : > { %v5457_v59 = vmax.f32 %v5440_v18, 0.0  ;;  %v5442_v20 = vadd.f32 %v5420_v23, %v8563_v36  ;;  %v5337_v14 = vadd.f32 %v5336_v34, %v5239_v35  ;;  %v5338_v5 = vpop.f32.mrb[61].mxu0 }
 0x8d2   : > { %v5458_v60 = vmax.f32 %v5441_v56, 0.0  ;;  %v5443_v11 = vadd.f32 %v5422_v63, %v8567_v53  ;;  %v5425_v12 = vpop.f32.mrb[60].mxu1  ;;  %v5339_v57 = vadd.f32 %v5338_v5, %v5239_v35 }
 0x8d3   : > { %v6029_v31 = vpack.c.bf16 %v5457_v59, %v5453_v61  ;;  %v5459_v17 = vmax.f32 %v5442_v20, 0.0  ;;  %v5426_v33 = vadd.f32 %v5425_v12, %v5239_v35  ;;  %v5427_v62 = vpop.f32.mrb[61].mxu1  ;;  %v5444_v27 = vadd.f32 %v5337_v14, %v8582_v40 }
 0x8d4   : > { %v5460_v46 = vmax.f32 %v5443_v11, 0.0  ;;  %v5428_v48 = vadd.f32 %v5427_v62, %v5239_v35  ;;  %v5342_v58 = vpop.f32.mrb[62].mxu0  ;;  %v6027_v50 = vpack.c.bf16 %v5458_v60, %v5454_v45  ;;  %v5445_v53 = vadd.f32 %v5339_v57, %v8578_v37 }
 0x8d5   : > { %v6037_v36 = vpack.c.bf16 %v5459_v17, %v5455_v8  ;;  %v5343_v22 = vadd.f32 %v5342_v58, %v5244_v29  ;;  %v5344_v44 = vpop.f32.mrb[63].mxu0  ;;  %v5446_v49 = vadd.f32 %v5426_v33, %v8590_v13  ;;  %v5461_v16 = vmax.f32 %v5444_v27, 0.0 }
 0x8d6   : > { %v5431_v42 = vpop.f32.mrb[62].mxu1  ;;  %v5345_v47 = vadd.f32 %v5344_v44, %v5244_v29  ;;  %6028 = vmatprep.subr.bf16.mxu0 %v6027_v50  ;;  %v6035_v3 = vpack.c.bf16 %v5460_v46, %v5456_v38  ;;  %v5447_v15 = vadd.f32 %v5428_v48, %v8586_v10  ;;  %v5462_v21 = vmax.f32 %v5445_v53, 0.0 }
 0x8d7   : > { %v5448_v9 = vadd.f32 %v5343_v22, %v8584_v43  ;;  %v5432_v39 = vadd.f32 %v5431_v42, %v5244_v29  ;;  %v5433_v52 = vpop.f32.mrb[63].mxu1  ;;  %6030 = vmatpush1.bf16.msra.mxu0 %v6029_v31  ;;  %v5463_v41 = vmax.f32 %v5446_v49, 0.0 }
 0x8d8   : > { %v5449_v32 = vadd.f32 %v5345_v47, %v8588_v4  ;;  %v5434_v40 = vadd.f32 %v5433_v52, %v5244_v29  ;;  %6036 = vmatprep.subr.bf16.mxu1 %v6035_v3  ;;  %v5464_v28 = vmax.f32 %v5447_v15, 0.0 }
 0x8d9   : > { %v5465_v0 = vmax.f32 %v5448_v9, 0.0  ;;  %v5450_v37 = vadd.f32 %v5432_v39, %v8593_v6  ;;  %6038 = vmatpush1.bf16.msra.mxu1 %v6037_v36  ;;  %v5452_v6 = vld [vmem:[%s8693_s10] sm:$0x7] }
 0x8da   : > { %v5466_v51 = vmax.f32 %v5449_v32, 0.0  ;;  %v5451_v13 = vadd.f32 %v5434_v40, %v8597_v26  ;;  %v5473_v26 = vpop.permute.xlu0 %5472 }
 0x8db   : > { %v6033_v43 = vpack.c.bf16 %v5465_v0, %v5461_v16  ;;  %v5467_v1 = vmax.f32 %v5450_v37, 0.0 }
 0x8dc   : > { %v5468_v55 = vmax.f32 %v5451_v13, 0.0  ;;  %v6031_v2 = vpack.c.bf16 %v5466_v51, %v5462_v21 }
 0x8dd   : > { %v6041_v10 = vpack.c.bf16 %v5467_v1, %v5463_v41 }
 0x8de   : > { %6032 = vmatprep.subr.bf16.mxu0 %v6031_v2  ;;  %v6039_v4 = vpack.c.bf16 %v5468_v55, %v5464_v28 }
 0x8df   : > { %6034 = vmatpush1.bf16.msra.mxu0 %v6033_v43 }
 0x8e0   : > { %6040 = vmatprep.subr.bf16.mxu1 %v6039_v4 }
 0x8e1   : > { %6042 = vmatpush1.bf16.msra.mxu1 %v6041_v10 }
 0x8e2   : > { %5877 = vmatmul.mubr.msk.f32.vlgmr.msra.gmra.mrb[64].mxu0 %vm3241_vm6, %v5452_v6 }
 0x8e4   : > { %5878 = vmatmul.mubr.msk.f32.vlgmr.msra.gmra.mrb[64].mxu1 %vm3241_vm6, %v5452_v6 }
 0x9b5   : > { %v5544_v25 = vpop.f32.mrb[64].mxu0 }
 0x9b6   : > { %v5545_v54 = vadd.f32 %v5544_v25, %v5473_v26  ;;  %v5546_v24 = vpop.f32.mrb[65].mxu0 }
 0x9b7   : > { %v5615_v19 = vpop.f32.mrb[64].mxu1  ;;  %v5547_v18 = vadd.f32 %v5546_v24, %v5473_v26 }
 0x9b8   : > { %v5616_v23 = vadd.f32 %v5615_v19, %v5473_v26  ;;  %v5617_v30 = vpop.f32.mrb[65].mxu1 }
 0x9b9   : > { %v5624_v35 = vcombine.low %v5545_v54, %v5547_v18  ;;  %v5618_v7 = vadd.f32 %v5617_v30, %v5473_v26 }
 0x9bb   : > { %5628 = vst [vmem:[%s486_s15] sm:$0x77] %v5624_v35  ;;  %v5625_v56 = vcombine.low %v5616_v23, %v5618_v7 }
 0x9bd   : > { %5629 = vst [vmem:[%s486_s15 + $0x8] sm:$0x77] %v5625_v56 }
 0x9be PF: > { %s23_s23 = sadd.s32 1, %s6300_s23   ;;  %s8986_s21 = smov %s6296_s22 }
 0x9bf   : > { %p20_p4 = scmp.ge.s32.totalorder %s23_s23, 4   ;;  %s8987_s22 = smov %s8989_s25 }
 0x9c1   :  { %22 = sbr.rel (!%p20_p4) target bundleno = 2 (0x2), region = 118 }
 0x9c8   :  { %5660 = vsyncpa [#allocation3], 1 }
 0x9c9   :  { %5662 = vsyncpa [#allocation3 + $0x1], 1 }

</bundles_post_ra>
